<compile_context>
chip_gen: v7x
topology: tpu7x:2x2x1
jax: 0.10.0
libtpu: 0.0.40
codegen_flags: <defaults>
</compile_context>

<pallas_src>
import jax
import jax.numpy as jnp
from jax.experimental import pallas as pl
from jax.experimental.pallas import tpu as pltpu

# ----------------------------- hparams (small) ------------------------------
CI_ENC_DIM = 8
IN_DIM = 2 * CI_ENC_DIM          # decoder per-step input dim (16)
CON_DIM = 16                     # controller GRU dim
CO_DIM = 8                       # controller output dim
GEN_DIM = 32                     # generator GRU dim
FAC_DIM = 8                      # factor dim
CELL_CLIP = 5.0
DROPOUT_RATE = 0.0               # dropout -> identity (eval mode)
B = 2                            # batch
T = 8                            # sequence length

STATE_DIMS = [GEN_DIM, CON_DIM, CO_DIM, CO_DIM, CO_DIM, FAC_DIM]
S = sum(STATE_DIMS)              # 80
CON_IN = IN_DIM + FAC_DIM        # controller cell raw input width (24)

# offsets of the split of the hidden/state vector (PyTorch concat order)
O_GEN = 0
O_CON = O_GEN + GEN_DIM
O_COMEAN = O_CON + CON_DIM
O_COSTD = O_COMEAN + CO_DIM
O_GENIN = O_COSTD + CO_DIM
O_FAC = O_GENIN + CO_DIM


# ----------------------------- fused GRU cell math ---------------------------
def _fused_gru_core(xh, h, w_comb, b_ih, w_hh_n_t, hidden_size, clip_value):
    """ClippedGRUCell step with the x/h z,r matmuls fused into one MXU pass.

    w_comb = [[W_ih^T], [W_hh_zr^T | 0]] of shape (x_dim + H, 3H), so
        xh @ w_comb + b_ih == [x_z + h_z, x_r + h_r, x_n]
    (bias_hh is identically zero: requires_grad=False and zeros init).
    """
    pre = jnp.dot(xh, w_comb, preferred_element_type=jnp.float32) + b_ih
    z = jax.nn.sigmoid(pre[:, 0:hidden_size])
    r = jax.nn.sigmoid(pre[:, hidden_size:2 * hidden_size])
    h_n = jnp.dot(r * h, w_hh_n_t, preferred_element_type=jnp.float32)
    n = jnp.tanh(pre[:, 2 * hidden_size:3 * hidden_size] + h_n)
    h_new = z * h + (1.0 - z) * n
    return jnp.clip(h_new, -clip_value, clip_value)


# --------------------------------- kernel ------------------------------------
def _make_decoder_kernel(sample_posteriors, seq_len):
    def kernel(*refs):
        i = 0
        inp_ref = refs[i]; i += 1                 # (T, B, IN_DIM)
        eps_ref = None
        if sample_posteriors:
            eps_ref = refs[i]; i += 1             # (T, B, CO_DIM)
        (gen0_ref, con0_ref, fac0_ref,
         wc_comb_ref, bc_ih_ref, wc_nh_ref,
         wg_comb_ref, bg_ih_ref, wg_nh_ref,
         wco_ref, bco_ref, wfac_ref,
         gen_out, con_out, comean_out, costd_out, genin_out, fac_out) = refs[i:]

        # Hoist all weights out of the unrolled loop (loaded once).
        wc_comb = wc_comb_ref[...]; bc_ih = bc_ih_ref[...]; wc_nh = wc_nh_ref[...]
        wg_comb = wg_comb_ref[...]; bg_ih = bg_ih_ref[...]; wg_nh = wg_nh_ref[...]
        wco = wco_ref[...]; bco = bco_ref[...]; wfac = wfac_ref[...]

        # Recurrent state stays in vregs for the whole sequence.
        gen_state = gen0_ref[...]
        con_state = con0_ref[...]
        factor = fac0_ref[...]

        # dropout_rate == 0.0 (eval): dropout is the identity.
        # use_con is True for these hparams (ci_enc_dim, con_dim, co_dim > 0).
        for t in range(seq_len):                  # fully unrolled recurrence
            x_t = inp_ref[t]                      # (B, IN_DIM), static index

            # Controller GRU: combined operand [x_t | factor | con_state].
            con_xh = jnp.concatenate([x_t, factor, con_state], axis=1)
            con_state = _fused_gru_core(con_xh, con_state, wc_comb, bc_ih,
                                        wc_nh, CON_DIM, CELL_CLIP)

            co_params = jnp.dot(con_state, wco,
                                preferred_element_type=jnp.float32) + bco
            co_mean = co_params[:, 0:CO_DIM]
            co_std = jnp.exp(0.5 * co_params[:, CO_DIM:2 * CO_DIM])  # sqrt(exp(logvar))
            if sample_posteriors:
                gen_input = co_mean + co_std * eps_ref[t]   # Normal.rsample, eps precomputed
            else:
                gen_input = co_mean

            # Generator GRU: combined operand [gen_input | gen_state].
            gen_xh = jnp.concatenate([gen_input, gen_state], axis=1)
            gen_state = _fused_gru_core(gen_xh, gen_state, wg_comb, bg_ih,
                                        wg_nh, GEN_DIM, CELL_CLIP)

            # KernelNormalizedLinear: rows pre-normalized in the wrapper.
            factor = jnp.dot(gen_state, wfac, preferred_element_type=jnp.float32)

            # Per-component outputs written at static time indices (VMEM only;
            # the single HBM writeback per output happens once at the end).
            gen_out[t] = gen_state
            con_out[t] = con_state
            comean_out[t] = co_mean
            costd_out[t] = co_std
            genin_out[t] = gen_input
            fac_out[t] = factor

    return kernel


# -------------------------- weight packing (wrapper) --------------------------
def pack_params(p):
    """Build the fused kernel operands from torch-layout parameters."""
    wc_ih = p["wc_ih"]            # (3*CON_DIM, CON_IN)
    wc_hh = p["wc_hh"]            # (3*CON_DIM, CON_DIM)
    wg_ih = p["wg_ih"]            # (3*GEN_DIM, CO_DIM)
    wg_hh = p["wg_hh"]            # (3*GEN_DIM, GEN_DIM)

    # controller combined weight: (CON_IN + CON_DIM, 3*CON_DIM)
    wc_hh_zr_t = jnp.concatenate(
        [wc_hh[:2 * CON_DIM].T, jnp.zeros((CON_DIM, CON_DIM), jnp.float32)], axis=1)
    wc_comb = jnp.concatenate([wc_ih.T, wc_hh_zr_t], axis=0)

    # generator combined weight: (CO_DIM + GEN_DIM, 3*GEN_DIM)
    wg_hh_zr_t = jnp.concatenate(
        [wg_hh[:2 * GEN_DIM].T, jnp.zeros((GEN_DIM, GEN_DIM), jnp.float32)], axis=1)
    wg_comb = jnp.concatenate([wg_ih.T, wg_hh_zr_t], axis=0)

    return dict(
        wc_comb=wc_comb, bc_ih=p["bc_ih"][None, :], wc_hh_n_t=wc_hh[2 * CON_DIM:].T,
        wg_comb=wg_comb, bg_ih=p["bg_ih"][None, :], wg_hh_n_t=wg_hh[2 * GEN_DIM:].T,
        wco_t=p["wco"].T, bco=p["bco"][None, :],
        wfac_t=p["wfac_n"].T,
    )


# --------------------------------- wrapper ------------------------------------
def decoder_rnn_forward(inputs, h0, params, eps=None, sample_posteriors=True):
    """inputs: (B, T, IN_DIM); h0: (B, S); eps: (T, B, CO_DIM) (if sampling).
    Returns (output (B, T, S), hidden (B, S)) matching DecoderRNN.forward."""
    batch, seq_len, in_dim = inputs.shape
    assert (batch, seq_len, in_dim) == (B, T, IN_DIM)

    inp_tm = jnp.transpose(inputs, (1, 0, 2)).astype(jnp.float32)   # time-major

    # h0 split in the wrapper (XLA) so the kernel never touches unaligned
    # lane slices of the packed state.  Only gen/con/factor of h0 are live;
    # co_mean/co_std/gen_input are overwritten before use when use_con=True.
    gen0 = h0[:, O_GEN:O_GEN + GEN_DIM].astype(jnp.float32)
    con0 = h0[:, O_CON:O_CON + CON_DIM].astype(jnp.float32)
    fac0 = h0[:, O_FAC:O_FAC + FAC_DIM].astype(jnp.float32)

    packed = pack_params(params)
    weight_order = ["wc_comb", "bc_ih", "wc_hh_n_t",
                    "wg_comb", "bg_ih", "wg_hh_n_t",
                    "wco_t", "bco", "wfac_t"]
    weights = [packed[k] for k in weight_order]

    operands = [inp_tm]
    if sample_posteriors:
        operands.append(eps.astype(jnp.float32))
    operands += [gen0, con0, fac0] + weights

    def full_spec(shape):
        n = len(shape)
        return pl.BlockSpec(shape, lambda i, _n=n: (0,) * _n)

    in_specs = [full_spec(op.shape) for op in operands]

    out_dims = [GEN_DIM, CON_DIM, CO_DIM, CO_DIM, CO_DIM, FAC_DIM]
    out_shape = tuple(jax.ShapeDtypeStruct((T, B, d), jnp.float32) for d in out_dims)
    out_specs = [full_spec((T, B, d)) for d in out_dims]

    # Advisory cost estimate so XLA schedules around this tiny call sensibly.
    flops = 2 * B * T * ((CON_IN + CON_DIM) * 3 * CON_DIM     # fused con matmul
                         + CON_DIM * CON_DIM                  # (r*h) @ W_hh_n
                         + CON_DIM * 2 * CO_DIM               # co_linear
                         + (CO_DIM + GEN_DIM) * 3 * GEN_DIM   # fused gen matmul
                         + GEN_DIM * GEN_DIM                  # (r*h) @ W_hh_n
                         + GEN_DIM * FAC_DIM)                 # fac_linear
    transcendentals = B * T * (3 * CON_DIM + 3 * GEN_DIM + CO_DIM)
    bytes_accessed = 4 * (sum(int(op.size) for op in operands) + T * B * S)

    kernel = _make_decoder_kernel(sample_posteriors, T)

    # NOTE: the time recurrence is inherently sequential.  For large-batch
    # runs on v7x (2 TensorCores) a leading 'parallel' grid axis over batch
    # blocks would let both cores split the batch; at B=2 there is nothing
    # to split, so a single invocation is used.
    outs = pl.pallas_call(
        kernel,
        out_shape=out_shape,
        grid_spec=pltpu.PrefetchScalarGridSpec(
            num_scalar_prefetch=0,
            grid=(1,),
            in_specs=in_specs,
            out_specs=out_specs,
        ),
        compiler_params=pltpu.CompilerParams(
            dimension_semantics=("arbitrary",)),
        cost_estimate=pl.CostEstimate(flops=flops,
                                      transcendentals=transcendentals,
                                      bytes_accessed=bytes_accessed),
    )(*operands)

    out_tm = jnp.concatenate(list(outs), axis=-1)   # (T, B, S), PyTorch concat order
    out = jnp.transpose(out_tm, (1, 0, 2))          # (B, T, S)
    h_last = out[:, -1]                             # hidden == last output step
    return out, h_last


# ------------------------- deterministic parameter init -----------------------
def init_params(key):
    ks = jax.random.split(key, 6)

    def vscale(k, shape, scale_dim):
        return jax.random.normal(k, shape, jnp.float32) / jnp.sqrt(jnp.float32(scale_dim))

    # gen_cell: ClippedGRUCell(co_dim, gen_dim); bias_hh zeros,
    # bias_ih = ones with the last hidden_size entries zeroed.
    wg_ih = vscale(ks[0], (3 * GEN_DIM, CO_DIM), CO_DIM)
    wg_hh = vscale(ks[1], (3 * GEN_DIM, GEN_DIM), GEN_DIM)
    bg_ih = jnp.concatenate([jnp.ones((2 * GEN_DIM,), jnp.float32),
                             jnp.zeros((GEN_DIM,), jnp.float32)])

    # con_cell: ClippedGRUCell(2*ci_enc_dim + fac_dim, con_dim)
    wc_ih = vscale(ks[2], (3 * CON_DIM, CON_IN), CON_IN)
    wc_hh = vscale(ks[3], (3 * CON_DIM, CON_DIM), CON_DIM)
    bc_ih = jnp.concatenate([jnp.ones((2 * CON_DIM,), jnp.float32),
                             jnp.zeros((CON_DIM,), jnp.float32)])

    # co_linear: Linear(con_dim, 2*co_dim), bias zeros
    wco = vscale(ks[4], (2 * CO_DIM, CON_DIM), CON_DIM)
    bco = jnp.zeros((2 * CO_DIM,), jnp.float32)

    # fac_linear: KernelNormalizedLinear(gen_dim, fac_dim, bias=False):
    # F.normalize(weight, p=2, dim=1) applied once here (rows L2-normalized).
    wfac = vscale(ks[5], (FAC_DIM, GEN_DIM), GEN_DIM)
    wfac_n = wfac / jnp.maximum(jnp.linalg.norm(wfac, axis=1, keepdims=True), 1e-12)

    return dict(wg_ih=wg_ih, wg_hh=wg_hh, bg_ih=bg_ih,
                wc_ih=wc_ih, wc_hh=wc_hh, bc_ih=bc_ih,
                wco=wco, bco=bco, wfac_n=wfac_n)


# --------------------------- pure-JAX reference (check) -----------------------
def _gru_step_ref(x, h, w_ih, b_ih, w_hh, hidden_size, clip_value):
    """Direct transcription of ClippedGRUCell.forward (bias_hh == 0)."""
    x_all = x @ w_ih.T + b_ih
    x_z, x_r, x_n = jnp.split(x_all, 3, axis=1)
    h_all = h @ w_hh[:2 * hidden_size].T
    h_z, h_r = jnp.split(h_all, 2, axis=1)
    z = jax.nn.sigmoid(x_z + h_z)
    r = jax.nn.sigmoid(x_r + h_r)
    n = jnp.tanh(x_n + (r * h) @ w_hh[2 * hidden_size:].T)
    h_new = z * h + (1.0 - z) * n
    return jnp.clip(h_new, -clip_value, clip_value)


def reference_forward(inputs, h0, params, eps, sample_posteriors=True):
    def cell(h, xe):
        x_t, eps_t = xe
        gen_state = h[:, O_GEN:O_GEN + GEN_DIM]
        con_state = h[:, O_CON:O_CON + CON_DIM]
        factor = h[:, O_FAC:O_FAC + FAC_DIM]
        con_input = jnp.concatenate([x_t, factor], axis=1)
        con_state = _gru_step_ref(con_input, con_state, params["wc_ih"],
                                  params["bc_ih"], params["wc_hh"], CON_DIM, CELL_CLIP)
        co_params = con_state @ params["wco"].T + params["bco"]
        co_mean = co_params[:, :CO_DIM]
        co_std = jnp.exp(0.5 * co_params[:, CO_DIM:])
        gen_input = co_mean + co_std * eps_t if sample_posteriors else co_mean
        gen_state = _gru_step_ref(gen_input, gen_state, params["wg_ih"],
                                  params["bg_ih"], params["wg_hh"], GEN_DIM, CELL_CLIP)
        factor = gen_state @ params["wfac_n"].T
        new_h = jnp.concatenate(
            [gen_state, con_state, co_mean, co_std, gen_input, factor], axis=1)
        return new_h, new_h

    h_final, outs = jax.lax.scan(cell, h0, (jnp.transpose(inputs, (1, 0, 2)), eps))
    return jnp.transpose(outs, (1, 0, 2)), h_final


# ------------------------------------ main ------------------------------------
if __name__ == "__main__":
    key = jax.random.PRNGKey(0)
    kp, kx, kh, ke = jax.random.split(key, 4)
    params = init_params(kp)
    x = jax.random.normal(kx, (B, T, IN_DIM), jnp.float32)
    h0 = 0.1 * jax.random.normal(kh, (B, S), jnp.float32)
    # rsample noise for the controller-output posterior, precomputed (deterministic)
    eps = jax.random.normal(ke, (T, B, CO_DIM), jnp.float32)

    out, h_last = decoder_rnn_forward(x, h0, params, eps, sample_posteriors=True)
    jax.block_until_ready((out, h_last))

    ref_out, ref_h = reference_forward(x, h0, params, eps, sample_posteriors=True)
    assert out.shape == (B, T, S) and h_last.shape == (B, S)
    # Tolerance kept at 1e-2: the XLA reference and the in-kernel MXU path may
    # use different default f32 matmul precisions on TPU (bf16-pass vs multi-pass),
    # which can produce ~1e-3-level differences after the 8-step recurrence.
    assert jnp.allclose(out, ref_out, atol=1e-2, rtol=1e-2)
    assert jnp.allclose(h_last, ref_h, atol=1e-2, rtol=1e-2)
    print("KERNEL_OK")
</pallas_src>

<mosaic_0001>
module attributes {stable_mosaic.version = 11 : i64} {
  func.func @kernel(%arg0: i32, %arg1: memref<8x2x16xf32, #tpu.memory_space<vmem>>, %arg2: memref<8x2x8xf32, #tpu.memory_space<vmem>>, %arg3: memref<2x32xf32, #tpu.memory_space<vmem>>, %arg4: memref<2x16xf32, #tpu.memory_space<vmem>>, %arg5: memref<2x8xf32, #tpu.memory_space<vmem>>, %arg6: memref<40x48xf32, #tpu.memory_space<vmem>>, %arg7: memref<1x48xf32, #tpu.memory_space<vmem>>, %arg8: memref<16x16xf32, #tpu.memory_space<vmem>>, %arg9: memref<40x96xf32, #tpu.memory_space<vmem>>, %arg10: memref<1x96xf32, #tpu.memory_space<vmem>>, %arg11: memref<32x32xf32, #tpu.memory_space<vmem>>, %arg12: memref<16x16xf32, #tpu.memory_space<vmem>>, %arg13: memref<1x16xf32, #tpu.memory_space<vmem>>, %arg14: memref<32x8xf32, #tpu.memory_space<vmem>>, %arg15: memref<8x2x32xf32, #tpu.memory_space<vmem>>, %arg16: memref<8x2x16xf32, #tpu.memory_space<vmem>>, %arg17: memref<8x2x8xf32, #tpu.memory_space<vmem>>, %arg18: memref<8x2x8xf32, #tpu.memory_space<vmem>>, %arg19: memref<8x2x8xf32, #tpu.memory_space<vmem>>, %arg20: memref<8x2x8xf32, #tpu.memory_space<vmem>>) attributes {dimension_semantics = [#tpu.dimension_semantics<arbitrary>], iteration_bounds = array<i64: 1>, scalar_prefetch = 0 : i64, scratch_operands = 0 : i64, tpu.core_type = #tpu.core_type<tc>, window_params = [{pipeline_mode = #tpu.pipeline_mode<synchronous>, transform_indices = @transform_0, window_bounds = array<i64: 8, 2, 16>}, {pipeline_mode = #tpu.pipeline_mode<synchronous>, transform_indices = @transform_1, window_bounds = array<i64: 8, 2, 8>}, {pipeline_mode = #tpu.pipeline_mode<synchronous>, transform_indices = @transform_2, window_bounds = array<i64: 2, 32>}, {pipeline_mode = #tpu.pipeline_mode<synchronous>, transform_indices = @transform_3, window_bounds = array<i64: 2, 16>}, {pipeline_mode = #tpu.pipeline_mode<synchronous>, transform_indices = @transform_4, window_bounds = array<i64: 2, 8>}, {pipeline_mode = #tpu.pipeline_mode<synchronous>, transform_indices = @transform_5, window_bounds = array<i64: 40, 48>}, {pipeline_mode = #tpu.pipeline_mode<synchronous>, transform_indices = @transform_6, window_bounds = array<i64: 1, 48>}, {pipeline_mode = #tpu.pipeline_mode<synchronous>, transform_indices = @transform_7, window_bounds = array<i64: 16, 16>}, {pipeline_mode = #tpu.pipeline_mode<synchronous>, transform_indices = @transform_8, window_bounds = array<i64: 40, 96>}, {pipeline_mode = #tpu.pipeline_mode<synchronous>, transform_indices = @transform_9, window_bounds = array<i64: 1, 96>}, {pipeline_mode = #tpu.pipeline_mode<synchronous>, transform_indices = @transform_10, window_bounds = array<i64: 32, 32>}, {pipeline_mode = #tpu.pipeline_mode<synchronous>, transform_indices = @transform_11, window_bounds = array<i64: 16, 16>}, {pipeline_mode = #tpu.pipeline_mode<synchronous>, transform_indices = @transform_12, window_bounds = array<i64: 1, 16>}, {pipeline_mode = #tpu.pipeline_mode<synchronous>, transform_indices = @transform_13, window_bounds = array<i64: 32, 8>}, {pipeline_mode = #tpu.pipeline_mode<synchronous>, transform_indices = @transform_14, window_bounds = array<i64: 8, 2, 32>}, {pipeline_mode = #tpu.pipeline_mode<synchronous>, transform_indices = @transform_15, window_bounds = array<i64: 8, 2, 16>}, {pipeline_mode = #tpu.pipeline_mode<synchronous>, transform_indices = @transform_16, window_bounds = array<i64: 8, 2, 8>}, {pipeline_mode = #tpu.pipeline_mode<synchronous>, transform_indices = @transform_17, window_bounds = array<i64: 8, 2, 8>}, {pipeline_mode = #tpu.pipeline_mode<synchronous>, transform_indices = @transform_18, window_bounds = array<i64: 8, 2, 8>}, {pipeline_mode = #tpu.pipeline_mode<synchronous>, transform_indices = @transform_19, window_bounds = array<i64: 8, 2, 8>}]} {
    %c0 = arith.constant 0 : index
    %c0_0 = arith.constant 0 : index
    %0 = vector.load %arg6[%c0, %c0_0] : memref<40x48xf32, #tpu.memory_space<vmem>>, vector<40x48xf32>
    %c0_1 = arith.constant 0 : index
    %c0_2 = arith.constant 0 : index
    %1 = vector.load %arg7[%c0_1, %c0_2] : memref<1x48xf32, #tpu.memory_space<vmem>>, vector<1x48xf32>
    %c0_3 = arith.constant 0 : index
    %c0_4 = arith.constant 0 : index
    %2 = vector.load %arg8[%c0_3, %c0_4] : memref<16x16xf32, #tpu.memory_space<vmem>>, vector<16x16xf32>
    %c0_5 = arith.constant 0 : index
    %c0_6 = arith.constant 0 : index
    %3 = vector.load %arg9[%c0_5, %c0_6] : memref<40x96xf32, #tpu.memory_space<vmem>>, vector<40x96xf32>
    %c0_7 = arith.constant 0 : index
    %c0_8 = arith.constant 0 : index
    %4 = vector.load %arg10[%c0_7, %c0_8] : memref<1x96xf32, #tpu.memory_space<vmem>>, vector<1x96xf32>
    %c0_9 = arith.constant 0 : index
    %c0_10 = arith.constant 0 : index
    %5 = vector.load %arg11[%c0_9, %c0_10] : memref<32x32xf32, #tpu.memory_space<vmem>>, vector<32x32xf32>
    %c0_11 = arith.constant 0 : index
    %c0_12 = arith.constant 0 : index
    %6 = vector.load %arg12[%c0_11, %c0_12] : memref<16x16xf32, #tpu.memory_space<vmem>>, vector<16x16xf32>
    %c0_13 = arith.constant 0 : index
    %c0_14 = arith.constant 0 : index
    %7 = vector.load %arg13[%c0_13, %c0_14] : memref<1x16xf32, #tpu.memory_space<vmem>>, vector<1x16xf32>
    %c0_15 = arith.constant 0 : index
    %c0_16 = arith.constant 0 : index
    %8 = vector.load %arg14[%c0_15, %c0_16] : memref<32x8xf32, #tpu.memory_space<vmem>>, vector<32x8xf32>
    %c0_17 = arith.constant 0 : index
    %c0_18 = arith.constant 0 : index
    %9 = vector.load %arg3[%c0_17, %c0_18] : memref<2x32xf32, #tpu.memory_space<vmem>>, vector<2x32xf32>
    %c0_19 = arith.constant 0 : index
    %c0_20 = arith.constant 0 : index
    %10 = vector.load %arg4[%c0_19, %c0_20] : memref<2x16xf32, #tpu.memory_space<vmem>>, vector<2x16xf32>
    %c0_21 = arith.constant 0 : index
    %c0_22 = arith.constant 0 : index
    %11 = vector.load %arg5[%c0_21, %c0_22] : memref<2x8xf32, #tpu.memory_space<vmem>>, vector<2x8xf32>
    %c0_23 = arith.constant 0 : index
    %c0_24 = arith.constant 0 : index
    %c0_25 = arith.constant 0 : index
    %12 = vector.load %arg1[%c0_23, %c0_24, %c0_25] : memref<8x2x16xf32, #tpu.memory_space<vmem>>, vector<1x2x16xf32>
    %13 = vector.shape_cast %12 : vector<1x2x16xf32> to vector<2x16xf32>
    %14 = tpu.concatenate %13, %11, %10 in 1 : vector<2x16xf32>, vector<2x8xf32>, vector<2x16xf32> -> vector<2x40xf32>
    %cst = arith.constant dense<0.000000e+00> : vector<2x48xf32>
    %15 = tpu.matmul %14, %0, %cst {dimension_numbers = #tpu.dot_dimension_numbers<[1], [0], [0], [1], [0, 0, 1, 1], [], []>} : vector<2x40xf32>, vector<40x48xf32>, vector<2x48xf32> -> vector<2x48xf32>
    %16 = vector.broadcast %1 : vector<1x48xf32> to vector<2x48xf32>
    %17 = arith.addf %15, %16 : vector<2x48xf32>
    %18 = vector.extract_strided_slice %17 {offsets = [0, 0], sizes = [2, 16], strides = [1, 1]} : vector<2x48xf32> to vector<2x16xf32>
    %19 = arith.negf %18 : vector<2x16xf32>
    %20 = math.exp %19 : vector<2x16xf32>
    %cst_26 = arith.constant 1.000000e+00 : f32
    %21 = vector.broadcast %cst_26 : f32 to vector<2x16xf32>
    %22 = arith.addf %21, %20 : vector<2x16xf32>
    %23 = arith.divf %21, %22 : vector<2x16xf32>
    %24 = vector.extract_strided_slice %17 {offsets = [0, 16], sizes = [2, 16], strides = [1, 1]} : vector<2x48xf32> to vector<2x16xf32>
    %25 = arith.negf %24 : vector<2x16xf32>
    %26 = math.exp %25 : vector<2x16xf32>
    %cst_27 = arith.constant 1.000000e+00 : f32
    %27 = vector.broadcast %cst_27 : f32 to vector<2x16xf32>
    %28 = arith.addf %27, %26 : vector<2x16xf32>
    %29 = arith.divf %27, %28 : vector<2x16xf32>
    %30 = arith.mulf %29, %10 : vector<2x16xf32>
    %cst_28 = arith.constant dense<0.000000e+00> : vector<2x16xf32>
    %31 = tpu.matmul %30, %2, %cst_28 {dimension_numbers = #tpu.dot_dimension_numbers<[1], [0], [0], [1], [0, 0, 1, 1], [], []>} : vector<2x16xf32>, vector<16x16xf32>, vector<2x16xf32> -> vector<2x16xf32>
    %32 = vector.extract_strided_slice %17 {offsets = [0, 32], sizes = [2, 16], strides = [1, 1]} : vector<2x48xf32> to vector<2x16xf32>
    %33 = arith.addf %32, %31 : vector<2x16xf32>
    %34 = math.tanh %33 : vector<2x16xf32>
    %35 = arith.mulf %23, %10 : vector<2x16xf32>
    %cst_29 = arith.constant 1.000000e+00 : f32
    %36 = vector.broadcast %cst_29 : f32 to vector<2x16xf32>
    %37 = arith.subf %36, %23 : vector<2x16xf32>
    %38 = arith.mulf %37, %34 : vector<2x16xf32>
    %39 = arith.addf %35, %38 : vector<2x16xf32>
    %cst_30 = arith.constant -5.000000e+00 : f32
    %cst_31 = arith.constant 5.000000e+00 : f32
    %40 = vector.broadcast %cst_30 : f32 to vector<2x16xf32>
    %41 = arith.maximumf %40, %39 : vector<2x16xf32>
    %42 = vector.broadcast %cst_31 : f32 to vector<2x16xf32>
    %43 = arith.minimumf %42, %41 : vector<2x16xf32>
    %cst_32 = arith.constant dense<0.000000e+00> : vector<2x16xf32>
    %44 = tpu.matmul %43, %6, %cst_32 {dimension_numbers = #tpu.dot_dimension_numbers<[1], [0], [0], [1], [0, 0, 1, 1], [], []>} : vector<2x16xf32>, vector<16x16xf32>, vector<2x16xf32> -> vector<2x16xf32>
    %45 = vector.broadcast %7 : vector<1x16xf32> to vector<2x16xf32>
    %46 = arith.addf %44, %45 : vector<2x16xf32>
    %47 = vector.extract_strided_slice %46 {offsets = [0, 0], sizes = [2, 8], strides = [1, 1]} : vector<2x16xf32> to vector<2x8xf32>
    %48 = vector.extract_strided_slice %46 {offsets = [0, 8], sizes = [2, 8], strides = [1, 1]} : vector<2x16xf32> to vector<2x8xf32>
    %cst_33 = arith.constant 5.000000e-01 : f32
    %49 = vector.broadcast %cst_33 : f32 to vector<2x8xf32>
    %50 = arith.mulf %49, %48 : vector<2x8xf32>
    %51 = math.exp %50 : vector<2x8xf32>
    %c0_34 = arith.constant 0 : index
    %c0_35 = arith.constant 0 : index
    %c0_36 = arith.constant 0 : index
    %52 = vector.load %arg2[%c0_34, %c0_35, %c0_36] : memref<8x2x8xf32, #tpu.memory_space<vmem>>, vector<1x2x8xf32>
    %53 = vector.shape_cast %52 : vector<1x2x8xf32> to vector<2x8xf32>
    %54 = arith.mulf %51, %53 : vector<2x8xf32>
    %55 = arith.addf %47, %54 : vector<2x8xf32>
    %56 = tpu.concatenate %55, %9 in 1 : vector<2x8xf32>, vector<2x32xf32> -> vector<2x40xf32>
    %cst_37 = arith.constant dense<0.000000e+00> : vector<2x96xf32>
    %57 = tpu.matmul %56, %3, %cst_37 {dimension_numbers = #tpu.dot_dimension_numbers<[1], [0], [0], [1], [0, 0, 1, 1], [], []>} : vector<2x40xf32>, vector<40x96xf32>, vector<2x96xf32> -> vector<2x96xf32>
    %58 = vector.broadcast %4 : vector<1x96xf32> to vector<2x96xf32>
    %59 = arith.addf %57, %58 : vector<2x96xf32>
    %60 = vector.extract_strided_slice %59 {offsets = [0, 0], sizes = [2, 32], strides = [1, 1]} : vector<2x96xf32> to vector<2x32xf32>
    %61 = arith.negf %60 : vector<2x32xf32>
    %62 = math.exp %61 : vector<2x32xf32>
    %cst_38 = arith.constant 1.000000e+00 : f32
    %63 = vector.broadcast %cst_38 : f32 to vector<2x32xf32>
    %64 = arith.addf %63, %62 : vector<2x32xf32>
    %65 = arith.divf %63, %64 : vector<2x32xf32>
    %66 = vector.extract_strided_slice %59 {offsets = [0, 32], sizes = [2, 32], strides = [1, 1]} : vector<2x96xf32> to vector<2x32xf32>
    %67 = arith.negf %66 : vector<2x32xf32>
    %68 = math.exp %67 : vector<2x32xf32>
    %cst_39 = arith.constant 1.000000e+00 : f32
    %69 = vector.broadcast %cst_39 : f32 to vector<2x32xf32>
    %70 = arith.addf %69, %68 : vector<2x32xf32>
    %71 = arith.divf %69, %70 : vector<2x32xf32>
    %72 = arith.mulf %71, %9 : vector<2x32xf32>
    %cst_40 = arith.constant dense<0.000000e+00> : vector<2x32xf32>
    %73 = tpu.matmul %72, %5, %cst_40 {dimension_numbers = #tpu.dot_dimension_numbers<[1], [0], [0], [1], [0, 0, 1, 1], [], []>} : vector<2x32xf32>, vector<32x32xf32>, vector<2x32xf32> -> vector<2x32xf32>
    %74 = vector.extract_strided_slice %59 {offsets = [0, 64], sizes = [2, 32], strides = [1, 1]} : vector<2x96xf32> to vector<2x32xf32>
    %75 = arith.addf %74, %73 : vector<2x32xf32>
    %76 = math.tanh %75 : vector<2x32xf32>
    %77 = arith.mulf %65, %9 : vector<2x32xf32>
    %cst_41 = arith.constant 1.000000e+00 : f32
    %78 = vector.broadcast %cst_41 : f32 to vector<2x32xf32>
    %79 = arith.subf %78, %65 : vector<2x32xf32>
    %80 = arith.mulf %79, %76 : vector<2x32xf32>
    %81 = arith.addf %77, %80 : vector<2x32xf32>
    %cst_42 = arith.constant -5.000000e+00 : f32
    %cst_43 = arith.constant 5.000000e+00 : f32
    %82 = vector.broadcast %cst_42 : f32 to vector<2x32xf32>
    %83 = arith.maximumf %82, %81 : vector<2x32xf32>
    %84 = vector.broadcast %cst_43 : f32 to vector<2x32xf32>
    %85 = arith.minimumf %84, %83 : vector<2x32xf32>
    %cst_44 = arith.constant dense<0.000000e+00> : vector<2x8xf32>
    %86 = tpu.matmul %85, %8, %cst_44 {dimension_numbers = #tpu.dot_dimension_numbers<[1], [0], [0], [1], [0, 0, 1, 1], [], []>} : vector<2x32xf32>, vector<32x8xf32>, vector<2x8xf32> -> vector<2x8xf32>
    %c0_45 = arith.constant 0 : index
    %c0_46 = arith.constant 0 : index
    %c0_47 = arith.constant 0 : index
    %87 = vector.load %arg15[%c0_45, %c0_46, %c0_47] : memref<8x2x32xf32, #tpu.memory_space<vmem>>, vector<1x2x32xf32>
    %88 = vector.shape_cast %87 : vector<1x2x32xf32> to vector<2x32xf32>
    %89 = vector.shape_cast %85 : vector<2x32xf32> to vector<1x2x32xf32>
    tpu.vector_store %arg15[%c0_45, %c0_46, %c0_47], %89 {strides = array<i32>} : memref<8x2x32xf32, #tpu.memory_space<vmem>>, vector<1x2x32xf32>,
    %c0_48 = arith.constant 0 : index
    %c0_49 = arith.constant 0 : index
    %c0_50 = arith.constant 0 : index
    %90 = vector.load %arg16[%c0_48, %c0_49, %c0_50] : memref<8x2x16xf32, #tpu.memory_space<vmem>>, vector<1x2x16xf32>
    %91 = vector.shape_cast %90 : vector<1x2x16xf32> to vector<2x16xf32>
    %92 = vector.shape_cast %43 : vector<2x16xf32> to vector<1x2x16xf32>
    tpu.vector_store %arg16[%c0_48, %c0_49, %c0_50], %92 {strides = array<i32>} : memref<8x2x16xf32, #tpu.memory_space<vmem>>, vector<1x2x16xf32>,
    %c0_51 = arith.constant 0 : index
    %c0_52 = arith.constant 0 : index
    %c0_53 = arith.constant 0 : index
    %93 = vector.load %arg17[%c0_51, %c0_52, %c0_53] : memref<8x2x8xf32, #tpu.memory_space<vmem>>, vector<1x2x8xf32>
    %94 = vector.shape_cast %93 : vector<1x2x8xf32> to vector<2x8xf32>
    %95 = vector.shape_cast %47 : vector<2x8xf32> to vector<1x2x8xf32>
    tpu.vector_store %arg17[%c0_51, %c0_52, %c0_53], %95 {strides = array<i32>} : memref<8x2x8xf32, #tpu.memory_space<vmem>>, vector<1x2x8xf32>,
    %c0_54 = arith.constant 0 : index
    %c0_55 = arith.constant 0 : index
    %c0_56 = arith.constant 0 : index
    %96 = vector.load %arg18[%c0_54, %c0_55, %c0_56] : memref<8x2x8xf32, #tpu.memory_space<vmem>>, vector<1x2x8xf32>
    %97 = vector.shape_cast %96 : vector<1x2x8xf32> to vector<2x8xf32>
    %98 = vector.shape_cast %51 : vector<2x8xf32> to vector<1x2x8xf32>
    tpu.vector_store %arg18[%c0_54, %c0_55, %c0_56], %98 {strides = array<i32>} : memref<8x2x8xf32, #tpu.memory_space<vmem>>, vector<1x2x8xf32>,
    %c0_57 = arith.constant 0 : index
    %c0_58 = arith.constant 0 : index
    %c0_59 = arith.constant 0 : index
    %99 = vector.load %arg19[%c0_57, %c0_58, %c0_59] : memref<8x2x8xf32, #tpu.memory_space<vmem>>, vector<1x2x8xf32>
    %100 = vector.shape_cast %99 : vector<1x2x8xf32> to vector<2x8xf32>
    %101 = vector.shape_cast %55 : vector<2x8xf32> to vector<1x2x8xf32>
    tpu.vector_store %arg19[%c0_57, %c0_58, %c0_59], %101 {strides = array<i32>} : memref<8x2x8xf32, #tpu.memory_space<vmem>>, vector<1x2x8xf32>,
    %c0_60 = arith.constant 0 : index
    %c0_61 = arith.constant 0 : index
    %c0_62 = arith.constant 0 : index
    %102 = vector.load %arg20[%c0_60, %c0_61, %c0_62] : memref<8x2x8xf32, #tpu.memory_space<vmem>>, vector<1x2x8xf32>
    %103 = vector.shape_cast %102 : vector<1x2x8xf32> to vector<2x8xf32>
    %104 = vector.shape_cast %86 : vector<2x8xf32> to vector<1x2x8xf32>
    tpu.vector_store %arg20[%c0_60, %c0_61, %c0_62], %104 {strides = array<i32>} : memref<8x2x8xf32, #tpu.memory_space<vmem>>, vector<1x2x8xf32>,
    %c1 = arith.constant 1 : index
    %c0_63 = arith.constant 0 : index
    %c0_64 = arith.constant 0 : index
    %105 = vector.load %arg1[%c1, %c0_63, %c0_64] : memref<8x2x16xf32, #tpu.memory_space<vmem>>, vector<1x2x16xf32>
    %106 = vector.shape_cast %105 : vector<1x2x16xf32> to vector<2x16xf32>
    %107 = tpu.concatenate %106, %86, %43 in 1 : vector<2x16xf32>, vector<2x8xf32>, vector<2x16xf32> -> vector<2x40xf32>
    %cst_65 = arith.constant dense<0.000000e+00> : vector<2x48xf32>
    %108 = tpu.matmul %107, %0, %cst_65 {dimension_numbers = #tpu.dot_dimension_numbers<[1], [0], [0], [1], [0, 0, 1, 1], [], []>} : vector<2x40xf32>, vector<40x48xf32>, vector<2x48xf32> -> vector<2x48xf32>
    %109 = vector.broadcast %1 : vector<1x48xf32> to vector<2x48xf32>
    %110 = arith.addf %108, %109 : vector<2x48xf32>
    %111 = vector.extract_strided_slice %110 {offsets = [0, 0], sizes = [2, 16], strides = [1, 1]} : vector<2x48xf32> to vector<2x16xf32>
    %112 = arith.negf %111 : vector<2x16xf32>
    %113 = math.exp %112 : vector<2x16xf32>
    %cst_66 = arith.constant 1.000000e+00 : f32
    %114 = vector.broadcast %cst_66 : f32 to vector<2x16xf32>
    %115 = arith.addf %114, %113 : vector<2x16xf32>
    %116 = arith.divf %114, %115 : vector<2x16xf32>
    %117 = vector.extract_strided_slice %110 {offsets = [0, 16], sizes = [2, 16], strides = [1, 1]} : vector<2x48xf32> to vector<2x16xf32>
    %118 = arith.negf %117 : vector<2x16xf32>
    %119 = math.exp %118 : vector<2x16xf32>
    %cst_67 = arith.constant 1.000000e+00 : f32
    %120 = vector.broadcast %cst_67 : f32 to vector<2x16xf32>
    %121 = arith.addf %120, %119 : vector<2x16xf32>
    %122 = arith.divf %120, %121 : vector<2x16xf32>
    %123 = arith.mulf %122, %43 : vector<2x16xf32>
    %cst_68 = arith.constant dense<0.000000e+00> : vector<2x16xf32>
    %124 = tpu.matmul %123, %2, %cst_68 {dimension_numbers = #tpu.dot_dimension_numbers<[1], [0], [0], [1], [0, 0, 1, 1], [], []>} : vector<2x16xf32>, vector<16x16xf32>, vector<2x16xf32> -> vector<2x16xf32>
    %125 = vector.extract_strided_slice %110 {offsets = [0, 32], sizes = [2, 16], strides = [1, 1]} : vector<2x48xf32> to vector<2x16xf32>
    %126 = arith.addf %125, %124 : vector<2x16xf32>
    %127 = math.tanh %126 : vector<2x16xf32>
    %128 = arith.mulf %116, %43 : vector<2x16xf32>
    %cst_69 = arith.constant 1.000000e+00 : f32
    %129 = vector.broadcast %cst_69 : f32 to vector<2x16xf32>
    %130 = arith.subf %129, %116 : vector<2x16xf32>
    %131 = arith.mulf %130, %127 : vector<2x16xf32>
    %132 = arith.addf %128, %131 : vector<2x16xf32>
    %cst_70 = arith.constant -5.000000e+00 : f32
    %cst_71 = arith.constant 5.000000e+00 : f32
    %133 = vector.broadcast %cst_70 : f32 to vector<2x16xf32>
    %134 = arith.maximumf %133, %132 : vector<2x16xf32>
    %135 = vector.broadcast %cst_71 : f32 to vector<2x16xf32>
    %136 = arith.minimumf %135, %134 : vector<2x16xf32>
    %cst_72 = arith.constant dense<0.000000e+00> : vector<2x16xf32>
    %137 = tpu.matmul %136, %6, %cst_72 {dimension_numbers = #tpu.dot_dimension_numbers<[1], [0], [0], [1], [0, 0, 1, 1], [], []>} : vector<2x16xf32>, vector<16x16xf32>, vector<2x16xf32> -> vector<2x16xf32>
    %138 = vector.broadcast %7 : vector<1x16xf32> to vector<2x16xf32>
    %139 = arith.addf %137, %138 : vector<2x16xf32>
    %140 = vector.extract_strided_slice %139 {offsets = [0, 0], sizes = [2, 8], strides = [1, 1]} : vector<2x16xf32> to vector<2x8xf32>
    %141 = vector.extract_strided_slice %139 {offsets = [0, 8], sizes = [2, 8], strides = [1, 1]} : vector<2x16xf32> to vector<2x8xf32>
    %cst_73 = arith.constant 5.000000e-01 : f32
    %142 = vector.broadcast %cst_73 : f32 to vector<2x8xf32>
    %143 = arith.mulf %142, %141 : vector<2x8xf32>
    %144 = math.exp %143 : vector<2x8xf32>
    %c1_74 = arith.constant 1 : index
    %c0_75 = arith.constant 0 : index
    %c0_76 = arith.constant 0 : index
    %145 = vector.load %arg2[%c1_74, %c0_75, %c0_76] : memref<8x2x8xf32, #tpu.memory_space<vmem>>, vector<1x2x8xf32>
    %146 = vector.shape_cast %145 : vector<1x2x8xf32> to vector<2x8xf32>
    %147 = arith.mulf %144, %146 : vector<2x8xf32>
    %148 = arith.addf %140, %147 : vector<2x8xf32>
    %149 = tpu.concatenate %148, %85 in 1 : vector<2x8xf32>, vector<2x32xf32> -> vector<2x40xf32>
    %cst_77 = arith.constant dense<0.000000e+00> : vector<2x96xf32>
    %150 = tpu.matmul %149, %3, %cst_77 {dimension_numbers = #tpu.dot_dimension_numbers<[1], [0], [0], [1], [0, 0, 1, 1], [], []>} : vector<2x40xf32>, vector<40x96xf32>, vector<2x96xf32> -> vector<2x96xf32>
    %151 = vector.broadcast %4 : vector<1x96xf32> to vector<2x96xf32>
    %152 = arith.addf %150, %151 : vector<2x96xf32>
    %153 = vector.extract_strided_slice %152 {offsets = [0, 0], sizes = [2, 32], strides = [1, 1]} : vector<2x96xf32> to vector<2x32xf32>
    %154 = arith.negf %153 : vector<2x32xf32>
    %155 = math.exp %154 : vector<2x32xf32>
    %cst_78 = arith.constant 1.000000e+00 : f32
    %156 = vector.broadcast %cst_78 : f32 to vector<2x32xf32>
    %157 = arith.addf %156, %155 : vector<2x32xf32>
    %158 = arith.divf %156, %157 : vector<2x32xf32>
    %159 = vector.extract_strided_slice %152 {offsets = [0, 32], sizes = [2, 32], strides = [1, 1]} : vector<2x96xf32> to vector<2x32xf32>
    %160 = arith.negf %159 : vector<2x32xf32>
    %161 = math.exp %160 : vector<2x32xf32>
    %cst_79 = arith.constant 1.000000e+00 : f32
    %162 = vector.broadcast %cst_79 : f32 to vector<2x32xf32>
    %163 = arith.addf %162, %161 : vector<2x32xf32>
    %164 = arith.divf %162, %163 : vector<2x32xf32>
    %165 = arith.mulf %164, %85 : vector<2x32xf32>
    %cst_80 = arith.constant dense<0.000000e+00> : vector<2x32xf32>
    %166 = tpu.matmul %165, %5, %cst_80 {dimension_numbers = #tpu.dot_dimension_numbers<[1], [0], [0], [1], [0, 0, 1, 1], [], []>} : vector<2x32xf32>, vector<32x32xf32>, vector<2x32xf32> -> vector<2x32xf32>
    %167 = vector.extract_strided_slice %152 {offsets = [0, 64], sizes = [2, 32], strides = [1, 1]} : vector<2x96xf32> to vector<2x32xf32>
    %168 = arith.addf %167, %166 : vector<2x32xf32>
    %169 = math.tanh %168 : vector<2x32xf32>
    %170 = arith.mulf %158, %85 : vector<2x32xf32>
    %cst_81 = arith.constant 1.000000e+00 : f32
    %171 = vector.broadcast %cst_81 : f32 to vector<2x32xf32>
    %172 = arith.subf %171, %158 : vector<2x32xf32>
    %173 = arith.mulf %172, %169 : vector<2x32xf32>
    %174 = arith.addf %170, %173 : vector<2x32xf32>
    %cst_82 = arith.constant -5.000000e+00 : f32
    %cst_83 = arith.constant 5.000000e+00 : f32
    %175 = vector.broadcast %cst_82 : f32 to vector<2x32xf32>
    %176 = arith.maximumf %175, %174 : vector<2x32xf32>
    %177 = vector.broadcast %cst_83 : f32 to vector<2x32xf32>
    %178 = arith.minimumf %177, %176 : vector<2x32xf32>
    %cst_84 = arith.constant dense<0.000000e+00> : vector<2x8xf32>
    %179 = tpu.matmul %178, %8, %cst_84 {dimension_numbers = #tpu.dot_dimension_numbers<[1], [0], [0], [1], [0, 0, 1, 1], [], []>} : vector<2x32xf32>, vector<32x8xf32>, vector<2x8xf32> -> vector<2x8xf32>
    %c1_85 = arith.constant 1 : index
    %c0_86 = arith.constant 0 : index
    %c0_87 = arith.constant 0 : index
    %180 = vector.load %arg15[%c1_85, %c0_86, %c0_87] : memref<8x2x32xf32, #tpu.memory_space<vmem>>, vector<1x2x32xf32>
    %181 = vector.shape_cast %180 : vector<1x2x32xf32> to vector<2x32xf32>
    %182 = vector.shape_cast %178 : vector<2x32xf32> to vector<1x2x32xf32>
    tpu.vector_store %arg15[%c1_85, %c0_86, %c0_87], %182 {strides = array<i32>} : memref<8x2x32xf32, #tpu.memory_space<vmem>>, vector<1x2x32xf32>,
    %c1_88 = arith.constant 1 : index
    %c0_89 = arith.constant 0 : index
    %c0_90 = arith.constant 0 : index
    %183 = vector.load %arg16[%c1_88, %c0_89, %c0_90] : memref<8x2x16xf32, #tpu.memory_space<vmem>>, vector<1x2x16xf32>
    %184 = vector.shape_cast %183 : vector<1x2x16xf32> to vector<2x16xf32>
    %185 = vector.shape_cast %136 : vector<2x16xf32> to vector<1x2x16xf32>
    tpu.vector_store %arg16[%c1_88, %c0_89, %c0_90], %185 {strides = array<i32>} : memref<8x2x16xf32, #tpu.memory_space<vmem>>, vector<1x2x16xf32>,
    %c1_91 = arith.constant 1 : index
    %c0_92 = arith.constant 0 : index
    %c0_93 = arith.constant 0 : index
    %186 = vector.load %arg17[%c1_91, %c0_92, %c0_93] : memref<8x2x8xf32, #tpu.memory_space<vmem>>, vector<1x2x8xf32>
    %187 = vector.shape_cast %186 : vector<1x2x8xf32> to vector<2x8xf32>
    %188 = vector.shape_cast %140 : vector<2x8xf32> to vector<1x2x8xf32>
    tpu.vector_store %arg17[%c1_91, %c0_92, %c0_93], %188 {strides = array<i32>} : memref<8x2x8xf32, #tpu.memory_space<vmem>>, vector<1x2x8xf32>,
    %c1_94 = arith.constant 1 : index
    %c0_95 = arith.constant 0 : index
    %c0_96 = arith.constant 0 : index
    %189 = vector.load %arg18[%c1_94, %c0_95, %c0_96] : memref<8x2x8xf32, #tpu.memory_space<vmem>>, vector<1x2x8xf32>
    %190 = vector.shape_cast %189 : vector<1x2x8xf32> to vector<2x8xf32>
    %191 = vector.shape_cast %144 : vector<2x8xf32> to vector<1x2x8xf32>
    tpu.vector_store %arg18[%c1_94, %c0_95, %c0_96], %191 {strides = array<i32>} : memref<8x2x8xf32, #tpu.memory_space<vmem>>, vector<1x2x8xf32>,
    %c1_97 = arith.constant 1 : index
    %c0_98 = arith.constant 0 : index
    %c0_99 = arith.constant 0 : index
    %192 = vector.load %arg19[%c1_97, %c0_98, %c0_99] : memref<8x2x8xf32, #tpu.memory_space<vmem>>, vector<1x2x8xf32>
    %193 = vector.shape_cast %192 : vector<1x2x8xf32> to vector<2x8xf32>
    %194 = vector.shape_cast %148 : vector<2x8xf32> to vector<1x2x8xf32>
    tpu.vector_store %arg19[%c1_97, %c0_98, %c0_99], %194 {strides = array<i32>} : memref<8x2x8xf32, #tpu.memory_space<vmem>>, vector<1x2x8xf32>,
    %c1_100 = arith.constant 1 : index
    %c0_101 = arith.constant 0 : index
    %c0_102 = arith.constant 0 : index
    %195 = vector.load %arg20[%c1_100, %c0_101, %c0_102] : memref<8x2x8xf32, #tpu.memory_space<vmem>>, vector<1x2x8xf32>
    %196 = vector.shape_cast %195 : vector<1x2x8xf32> to vector<2x8xf32>
    %197 = vector.shape_cast %179 : vector<2x8xf32> to vector<1x2x8xf32>
    tpu.vector_store %arg20[%c1_100, %c0_101, %c0_102], %197 {strides = array<i32>} : memref<8x2x8xf32, #tpu.memory_space<vmem>>, vector<1x2x8xf32>,
    %c2 = arith.constant 2 : index
    %c0_103 = arith.constant 0 : index
    %c0_104 = arith.constant 0 : index
    %198 = vector.load %arg1[%c2, %c0_103, %c0_104] : memref<8x2x16xf32, #tpu.memory_space<vmem>>, vector<1x2x16xf32>
    %199 = vector.shape_cast %198 : vector<1x2x16xf32> to vector<2x16xf32>
    %200 = tpu.concatenate %199, %179, %136 in 1 : vector<2x16xf32>, vector<2x8xf32>, vector<2x16xf32> -> vector<2x40xf32>
    %cst_105 = arith.constant dense<0.000000e+00> : vector<2x48xf32>
    %201 = tpu.matmul %200, %0, %cst_105 {dimension_numbers = #tpu.dot_dimension_numbers<[1], [0], [0], [1], [0, 0, 1, 1], [], []>} : vector<2x40xf32>, vector<40x48xf32>, vector<2x48xf32> -> vector<2x48xf32>
    %202 = vector.broadcast %1 : vector<1x48xf32> to vector<2x48xf32>
    %203 = arith.addf %201, %202 : vector<2x48xf32>
    %204 = vector.extract_strided_slice %203 {offsets = [0, 0], sizes = [2, 16], strides = [1, 1]} : vector<2x48xf32> to vector<2x16xf32>
    %205 = arith.negf %204 : vector<2x16xf32>
    %206 = math.exp %205 : vector<2x16xf32>
    %cst_106 = arith.constant 1.000000e+00 : f32
    %207 = vector.broadcast %cst_106 : f32 to vector<2x16xf32>
    %208 = arith.addf %207, %206 : vector<2x16xf32>
    %209 = arith.divf %207, %208 : vector<2x16xf32>
    %210 = vector.extract_strided_slice %203 {offsets = [0, 16], sizes = [2, 16], strides = [1, 1]} : vector<2x48xf32> to vector<2x16xf32>
    %211 = arith.negf %210 : vector<2x16xf32>
    %212 = math.exp %211 : vector<2x16xf32>
    %cst_107 = arith.constant 1.000000e+00 : f32
    %213 = vector.broadcast %cst_107 : f32 to vector<2x16xf32>
    %214 = arith.addf %213, %212 : vector<2x16xf32>
    %215 = arith.divf %213, %214 : vector<2x16xf32>
    %216 = arith.mulf %215, %136 : vector<2x16xf32>
    %cst_108 = arith.constant dense<0.000000e+00> : vector<2x16xf32>
    %217 = tpu.matmul %216, %2, %cst_108 {dimension_numbers = #tpu.dot_dimension_numbers<[1], [0], [0], [1], [0, 0, 1, 1], [], []>} : vector<2x16xf32>, vector<16x16xf32>, vector<2x16xf32> -> vector<2x16xf32>
    %218 = vector.extract_strided_slice %203 {offsets = [0, 32], sizes = [2, 16], strides = [1, 1]} : vector<2x48xf32> to vector<2x16xf32>
    %219 = arith.addf %218, %217 : vector<2x16xf32>
    %220 = math.tanh %219 : vector<2x16xf32>
    %221 = arith.mulf %209, %136 : vector<2x16xf32>
    %cst_109 = arith.constant 1.000000e+00 : f32
    %222 = vector.broadcast %cst_109 : f32 to vector<2x16xf32>
    %223 = arith.subf %222, %209 : vector<2x16xf32>
    %224 = arith.mulf %223, %220 : vector<2x16xf32>
    %225 = arith.addf %221, %224 : vector<2x16xf32>
    %cst_110 = arith.constant -5.000000e+00 : f32
    %cst_111 = arith.constant 5.000000e+00 : f32
    %226 = vector.broadcast %cst_110 : f32 to vector<2x16xf32>
    %227 = arith.maximumf %226, %225 : vector<2x16xf32>
    %228 = vector.broadcast %cst_111 : f32 to vector<2x16xf32>
    %229 = arith.minimumf %228, %227 : vector<2x16xf32>
    %cst_112 = arith.constant dense<0.000000e+00> : vector<2x16xf32>
    %230 = tpu.matmul %229, %6, %cst_112 {dimension_numbers = #tpu.dot_dimension_numbers<[1], [0], [0], [1], [0, 0, 1, 1], [], []>} : vector<2x16xf32>, vector<16x16xf32>, vector<2x16xf32> -> vector<2x16xf32>
    %231 = vector.broadcast %7 : vector<1x16xf32> to vector<2x16xf32>
    %232 = arith.addf %230, %231 : vector<2x16xf32>
    %233 = vector.extract_strided_slice %232 {offsets = [0, 0], sizes = [2, 8], strides = [1, 1]} : vector<2x16xf32> to vector<2x8xf32>
    %234 = vector.extract_strided_slice %232 {offsets = [0, 8], sizes = [2, 8], strides = [1, 1]} : vector<2x16xf32> to vector<2x8xf32>
    %cst_113 = arith.constant 5.000000e-01 : f32
    %235 = vector.broadcast %cst_113 : f32 to vector<2x8xf32>
    %236 = arith.mulf %235, %234 : vector<2x8xf32>
    %237 = math.exp %236 : vector<2x8xf32>
    %c2_114 = arith.constant 2 : index
    %c0_115 = arith.constant 0 : index
    %c0_116 = arith.constant 0 : index
    %238 = vector.load %arg2[%c2_114, %c0_115, %c0_116] : memref<8x2x8xf32, #tpu.memory_space<vmem>>, vector<1x2x8xf32>
    %239 = vector.shape_cast %238 : vector<1x2x8xf32> to vector<2x8xf32>
    %240 = arith.mulf %237, %239 : vector<2x8xf32>
    %241 = arith.addf %233, %240 : vector<2x8xf32>
    %242 = tpu.concatenate %241, %178 in 1 : vector<2x8xf32>, vector<2x32xf32> -> vector<2x40xf32>
    %cst_117 = arith.constant dense<0.000000e+00> : vector<2x96xf32>
    %243 = tpu.matmul %242, %3, %cst_117 {dimension_numbers = #tpu.dot_dimension_numbers<[1], [0], [0], [1], [0, 0, 1, 1], [], []>} : vector<2x40xf32>, vector<40x96xf32>, vector<2x96xf32> -> vector<2x96xf32>
    %244 = vector.broadcast %4 : vector<1x96xf32> to vector<2x96xf32>
    %245 = arith.addf %243, %244 : vector<2x96xf32>
    %246 = vector.extract_strided_slice %245 {offsets = [0, 0], sizes = [2, 32], strides = [1, 1]} : vector<2x96xf32> to vector<2x32xf32>
    %247 = arith.negf %246 : vector<2x32xf32>
    %248 = math.exp %247 : vector<2x32xf32>
    %cst_118 = arith.constant 1.000000e+00 : f32
    %249 = vector.broadcast %cst_118 : f32 to vector<2x32xf32>
    %250 = arith.addf %249, %248 : vector<2x32xf32>
    %251 = arith.divf %249, %250 : vector<2x32xf32>
    %252 = vector.extract_strided_slice %245 {offsets = [0, 32], sizes = [2, 32], strides = [1, 1]} : vector<2x96xf32> to vector<2x32xf32>
    %253 = arith.negf %252 : vector<2x32xf32>
    %254 = math.exp %253 : vector<2x32xf32>
    %cst_119 = arith.constant 1.000000e+00 : f32
    %255 = vector.broadcast %cst_119 : f32 to vector<2x32xf32>
    %256 = arith.addf %255, %254 : vector<2x32xf32>
    %257 = arith.divf %255, %256 : vector<2x32xf32>
    %258 = arith.mulf %257, %178 : vector<2x32xf32>
    %cst_120 = arith.constant dense<0.000000e+00> : vector<2x32xf32>
    %259 = tpu.matmul %258, %5, %cst_120 {dimension_numbers = #tpu.dot_dimension_numbers<[1], [0], [0], [1], [0, 0, 1, 1], [], []>} : vector<2x32xf32>, vector<32x32xf32>, vector<2x32xf32> -> vector<2x32xf32>
    %260 = vector.extract_strided_slice %245 {offsets = [0, 64], sizes = [2, 32], strides = [1, 1]} : vector<2x96xf32> to vector<2x32xf32>
    %261 = arith.addf %260, %259 : vector<2x32xf32>
    %262 = math.tanh %261 : vector<2x32xf32>
    %263 = arith.mulf %251, %178 : vector<2x32xf32>
    %cst_121 = arith.constant 1.000000e+00 : f32
    %264 = vector.broadcast %cst_121 : f32 to vector<2x32xf32>
    %265 = arith.subf %264, %251 : vector<2x32xf32>
    %266 = arith.mulf %265, %262 : vector<2x32xf32>
    %267 = arith.addf %263, %266 : vector<2x32xf32>
    %cst_122 = arith.constant -5.000000e+00 : f32
    %cst_123 = arith.constant 5.000000e+00 : f32
    %268 = vector.broadcast %cst_122 : f32 to vector<2x32xf32>
    %269 = arith.maximumf %268, %267 : vector<2x32xf32>
    %270 = vector.broadcast %cst_123 : f32 to vector<2x32xf32>
    %271 = arith.minimumf %270, %269 : vector<2x32xf32>
    %cst_124 = arith.constant dense<0.000000e+00> : vector<2x8xf32>
    %272 = tpu.matmul %271, %8, %cst_124 {dimension_numbers = #tpu.dot_dimension_numbers<[1], [0], [0], [1], [0, 0, 1, 1], [], []>} : vector<2x32xf32>, vector<32x8xf32>, vector<2x8xf32> -> vector<2x8xf32>
    %c2_125 = arith.constant 2 : index
    %c0_126 = arith.constant 0 : index
    %c0_127 = arith.constant 0 : index
    %273 = vector.load %arg15[%c2_125, %c0_126, %c0_127] : memref<8x2x32xf32, #tpu.memory_space<vmem>>, vector<1x2x32xf32>
    %274 = vector.shape_cast %273 : vector<1x2x32xf32> to vector<2x32xf32>
    %275 = vector.shape_cast %271 : vector<2x32xf32> to vector<1x2x32xf32>
    tpu.vector_store %arg15[%c2_125, %c0_126, %c0_127], %275 {strides = array<i32>} : memref<8x2x32xf32, #tpu.memory_space<vmem>>, vector<1x2x32xf32>,
    %c2_128 = arith.constant 2 : index
    %c0_129 = arith.constant 0 : index
    %c0_130 = arith.constant 0 : index
    %276 = vector.load %arg16[%c2_128, %c0_129, %c0_130] : memref<8x2x16xf32, #tpu.memory_space<vmem>>, vector<1x2x16xf32>
    %277 = vector.shape_cast %276 : vector<1x2x16xf32> to vector<2x16xf32>
    %278 = vector.shape_cast %229 : vector<2x16xf32> to vector<1x2x16xf32>
    tpu.vector_store %arg16[%c2_128, %c0_129, %c0_130], %278 {strides = array<i32>} : memref<8x2x16xf32, #tpu.memory_space<vmem>>, vector<1x2x16xf32>,
    %c2_131 = arith.constant 2 : index
    %c0_132 = arith.constant 0 : index
    %c0_133 = arith.constant 0 : index
    %279 = vector.load %arg17[%c2_131, %c0_132, %c0_133] : memref<8x2x8xf32, #tpu.memory_space<vmem>>, vector<1x2x8xf32>
    %280 = vector.shape_cast %279 : vector<1x2x8xf32> to vector<2x8xf32>
    %281 = vector.shape_cast %233 : vector<2x8xf32> to vector<1x2x8xf32>
    tpu.vector_store %arg17[%c2_131, %c0_132, %c0_133], %281 {strides = array<i32>} : memref<8x2x8xf32, #tpu.memory_space<vmem>>, vector<1x2x8xf32>,
    %c2_134 = arith.constant 2 : index
    %c0_135 = arith.constant 0 : index
    %c0_136 = arith.constant 0 : index
    %282 = vector.load %arg18[%c2_134, %c0_135, %c0_136] : memref<8x2x8xf32, #tpu.memory_space<vmem>>, vector<1x2x8xf32>
    %283 = vector.shape_cast %282 : vector<1x2x8xf32> to vector<2x8xf32>
    %284 = vector.shape_cast %237 : vector<2x8xf32> to vector<1x2x8xf32>
    tpu.vector_store %arg18[%c2_134, %c0_135, %c0_136], %284 {strides = array<i32>} : memref<8x2x8xf32, #tpu.memory_space<vmem>>, vector<1x2x8xf32>,
    %c2_137 = arith.constant 2 : index
    %c0_138 = arith.constant 0 : index
    %c0_139 = arith.constant 0 : index
    %285 = vector.load %arg19[%c2_137, %c0_138, %c0_139] : memref<8x2x8xf32, #tpu.memory_space<vmem>>, vector<1x2x8xf32>
    %286 = vector.shape_cast %285 : vector<1x2x8xf32> to vector<2x8xf32>
    %287 = vector.shape_cast %241 : vector<2x8xf32> to vector<1x2x8xf32>
    tpu.vector_store %arg19[%c2_137, %c0_138, %c0_139], %287 {strides = array<i32>} : memref<8x2x8xf32, #tpu.memory_space<vmem>>, vector<1x2x8xf32>,
    %c2_140 = arith.constant 2 : index
    %c0_141 = arith.constant 0 : index
    %c0_142 = arith.constant 0 : index
    %288 = vector.load %arg20[%c2_140, %c0_141, %c0_142] : memref<8x2x8xf32, #tpu.memory_space<vmem>>, vector<1x2x8xf32>
    %289 = vector.shape_cast %288 : vector<1x2x8xf32> to vector<2x8xf32>
    %290 = vector.shape_cast %272 : vector<2x8xf32> to vector<1x2x8xf32>
    tpu.vector_store %arg20[%c2_140, %c0_141, %c0_142], %290 {strides = array<i32>} : memref<8x2x8xf32, #tpu.memory_space<vmem>>, vector<1x2x8xf32>,
    %c3 = arith.constant 3 : index
    %c0_143 = arith.constant 0 : index
    %c0_144 = arith.constant 0 : index
    %291 = vector.load %arg1[%c3, %c0_143, %c0_144] : memref<8x2x16xf32, #tpu.memory_space<vmem>>, vector<1x2x16xf32>
    %292 = vector.shape_cast %291 : vector<1x2x16xf32> to vector<2x16xf32>
    %293 = tpu.concatenate %292, %272, %229 in 1 : vector<2x16xf32>, vector<2x8xf32>, vector<2x16xf32> -> vector<2x40xf32>
    %cst_145 = arith.constant dense<0.000000e+00> : vector<2x48xf32>
    %294 = tpu.matmul %293, %0, %cst_145 {dimension_numbers = #tpu.dot_dimension_numbers<[1], [0], [0], [1], [0, 0, 1, 1], [], []>} : vector<2x40xf32>, vector<40x48xf32>, vector<2x48xf32> -> vector<2x48xf32>
    %295 = vector.broadcast %1 : vector<1x48xf32> to vector<2x48xf32>
    %296 = arith.addf %294, %295 : vector<2x48xf32>
    %297 = vector.extract_strided_slice %296 {offsets = [0, 0], sizes = [2, 16], strides = [1, 1]} : vector<2x48xf32> to vector<2x16xf32>
    %298 = arith.negf %297 : vector<2x16xf32>
    %299 = math.exp %298 : vector<2x16xf32>
    %cst_146 = arith.constant 1.000000e+00 : f32
    %300 = vector.broadcast %cst_146 : f32 to vector<2x16xf32>
    %301 = arith.addf %300, %299 : vector<2x16xf32>
    %302 = arith.divf %300, %301 : vector<2x16xf32>
    %303 = vector.extract_strided_slice %296 {offsets = [0, 16], sizes = [2, 16], strides = [1, 1]} : vector<2x48xf32> to vector<2x16xf32>
    %304 = arith.negf %303 : vector<2x16xf32>
    %305 = math.exp %304 : vector<2x16xf32>
    %cst_147 = arith.constant 1.000000e+00 : f32
    %306 = vector.broadcast %cst_147 : f32 to vector<2x16xf32>
    %307 = arith.addf %306, %305 : vector<2x16xf32>
    %308 = arith.divf %306, %307 : vector<2x16xf32>
    %309 = arith.mulf %308, %229 : vector<2x16xf32>
    %cst_148 = arith.constant dense<0.000000e+00> : vector<2x16xf32>
    %310 = tpu.matmul %309, %2, %cst_148 {dimension_numbers = #tpu.dot_dimension_numbers<[1], [0], [0], [1], [0, 0, 1, 1], [], []>} : vector<2x16xf32>, vector<16x16xf32>, vector<2x16xf32> -> vector<2x16xf32>
    %311 = vector.extract_strided_slice %296 {offsets = [0, 32], sizes = [2, 16], strides = [1, 1]} : vector<2x48xf32> to vector<2x16xf32>
    %312 = arith.addf %311, %310 : vector<2x16xf32>
    %313 = math.tanh %312 : vector<2x16xf32>
    %314 = arith.mulf %302, %229 : vector<2x16xf32>
    %cst_149 = arith.constant 1.000000e+00 : f32
    %315 = vector.broadcast %cst_149 : f32 to vector<2x16xf32>
    %316 = arith.subf %315, %302 : vector<2x16xf32>
    %317 = arith.mulf %316, %313 : vector<2x16xf32>
    %318 = arith.addf %314, %317 : vector<2x16xf32>
    %cst_150 = arith.constant -5.000000e+00 : f32
    %cst_151 = arith.constant 5.000000e+00 : f32
    %319 = vector.broadcast %cst_150 : f32 to vector<2x16xf32>
    %320 = arith.maximumf %319, %318 : vector<2x16xf32>
    %321 = vector.broadcast %cst_151 : f32 to vector<2x16xf32>
    %322 = arith.minimumf %321, %320 : vector<2x16xf32>
    %cst_152 = arith.constant dense<0.000000e+00> : vector<2x16xf32>
    %323 = tpu.matmul %322, %6, %cst_152 {dimension_numbers = #tpu.dot_dimension_numbers<[1], [0], [0], [1], [0, 0, 1, 1], [], []>} : vector<2x16xf32>, vector<16x16xf32>, vector<2x16xf32> -> vector<2x16xf32>
    %324 = vector.broadcast %7 : vector<1x16xf32> to vector<2x16xf32>
    %325 = arith.addf %323, %324 : vector<2x16xf32>
    %326 = vector.extract_strided_slice %325 {offsets = [0, 0], sizes = [2, 8], strides = [1, 1]} : vector<2x16xf32> to vector<2x8xf32>
    %327 = vector.extract_strided_slice %325 {offsets = [0, 8], sizes = [2, 8], strides = [1, 1]} : vector<2x16xf32> to vector<2x8xf32>
    %cst_153 = arith.constant 5.000000e-01 : f32
    %328 = vector.broadcast %cst_153 : f32 to vector<2x8xf32>
    %329 = arith.mulf %328, %327 : vector<2x8xf32>
    %330 = math.exp %329 : vector<2x8xf32>
    %c3_154 = arith.constant 3 : index
    %c0_155 = arith.constant 0 : index
    %c0_156 = arith.constant 0 : index
    %331 = vector.load %arg2[%c3_154, %c0_155, %c0_156] : memref<8x2x8xf32, #tpu.memory_space<vmem>>, vector<1x2x8xf32>
    %332 = vector.shape_cast %331 : vector<1x2x8xf32> to vector<2x8xf32>
    %333 = arith.mulf %330, %332 : vector<2x8xf32>
    %334 = arith.addf %326, %333 : vector<2x8xf32>
    %335 = tpu.concatenate %334, %271 in 1 : vector<2x8xf32>, vector<2x32xf32> -> vector<2x40xf32>
    %cst_157 = arith.constant dense<0.000000e+00> : vector<2x96xf32>
    %336 = tpu.matmul %335, %3, %cst_157 {dimension_numbers = #tpu.dot_dimension_numbers<[1], [0], [0], [1], [0, 0, 1, 1], [], []>} : vector<2x40xf32>, vector<40x96xf32>, vector<2x96xf32> -> vector<2x96xf32>
    %337 = vector.broadcast %4 : vector<1x96xf32> to vector<2x96xf32>
    %338 = arith.addf %336, %337 : vector<2x96xf32>
    %339 = vector.extract_strided_slice %338 {offsets = [0, 0], sizes = [2, 32], strides = [1, 1]} : vector<2x96xf32> to vector<2x32xf32>
    %340 = arith.negf %339 : vector<2x32xf32>
    %341 = math.exp %340 : vector<2x32xf32>
    %cst_158 = arith.constant 1.000000e+00 : f32
    %342 = vector.broadcast %cst_158 : f32 to vector<2x32xf32>
    %343 = arith.addf %342, %341 : vector<2x32xf32>
    %344 = arith.divf %342, %343 : vector<2x32xf32>
    %345 = vector.extract_strided_slice %338 {offsets = [0, 32], sizes = [2, 32], strides = [1, 1]} : vector<2x96xf32> to vector<2x32xf32>
    %346 = arith.negf %345 : vector<2x32xf32>
    %347 = math.exp %346 : vector<2x32xf32>
    %cst_159 = arith.constant 1.000000e+00 : f32
    %348 = vector.broadcast %cst_159 : f32 to vector<2x32xf32>
    %349 = arith.addf %348, %347 : vector<2x32xf32>
    %350 = arith.divf %348, %349 : vector<2x32xf32>
    %351 = arith.mulf %350, %271 : vector<2x32xf32>
    %cst_160 = arith.constant dense<0.000000e+00> : vector<2x32xf32>
    %352 = tpu.matmul %351, %5, %cst_160 {dimension_numbers = #tpu.dot_dimension_numbers<[1], [0], [0], [1], [0, 0, 1, 1], [], []>} : vector<2x32xf32>, vector<32x32xf32>, vector<2x32xf32> -> vector<2x32xf32>
    %353 = vector.extract_strided_slice %338 {offsets = [0, 64], sizes = [2, 32], strides = [1, 1]} : vector<2x96xf32> to vector<2x32xf32>
    %354 = arith.addf %353, %352 : vector<2x32xf32>
    %355 = math.tanh %354 : vector<2x32xf32>
    %356 = arith.mulf %344, %271 : vector<2x32xf32>
    %cst_161 = arith.constant 1.000000e+00 : f32
    %357 = vector.broadcast %cst_161 : f32 to vector<2x32xf32>
    %358 = arith.subf %357, %344 : vector<2x32xf32>
    %359 = arith.mulf %358, %355 : vector<2x32xf32>
    %360 = arith.addf %356, %359 : vector<2x32xf32>
    %cst_162 = arith.constant -5.000000e+00 : f32
    %cst_163 = arith.constant 5.000000e+00 : f32
    %361 = vector.broadcast %cst_162 : f32 to vector<2x32xf32>
    %362 = arith.maximumf %361, %360 : vector<2x32xf32>
    %363 = vector.broadcast %cst_163 : f32 to vector<2x32xf32>
    %364 = arith.minimumf %363, %362 : vector<2x32xf32>
    %cst_164 = arith.constant dense<0.000000e+00> : vector<2x8xf32>
    %365 = tpu.matmul %364, %8, %cst_164 {dimension_numbers = #tpu.dot_dimension_numbers<[1], [0], [0], [1], [0, 0, 1, 1], [], []>} : vector<2x32xf32>, vector<32x8xf32>, vector<2x8xf32> -> vector<2x8xf32>
    %c3_165 = arith.constant 3 : index
    %c0_166 = arith.constant 0 : index
    %c0_167 = arith.constant 0 : index
    %366 = vector.load %arg15[%c3_165, %c0_166, %c0_167] : memref<8x2x32xf32, #tpu.memory_space<vmem>>, vector<1x2x32xf32>
    %367 = vector.shape_cast %366 : vector<1x2x32xf32> to vector<2x32xf32>
    %368 = vector.shape_cast %364 : vector<2x32xf32> to vector<1x2x32xf32>
    tpu.vector_store %arg15[%c3_165, %c0_166, %c0_167], %368 {strides = array<i32>} : memref<8x2x32xf32, #tpu.memory_space<vmem>>, vector<1x2x32xf32>,
    %c3_168 = arith.constant 3 : index
    %c0_169 = arith.constant 0 : index
    %c0_170 = arith.constant 0 : index
    %369 = vector.load %arg16[%c3_168, %c0_169, %c0_170] : memref<8x2x16xf32, #tpu.memory_space<vmem>>, vector<1x2x16xf32>
    %370 = vector.shape_cast %369 : vector<1x2x16xf32> to vector<2x16xf32>
    %371 = vector.shape_cast %322 : vector<2x16xf32> to vector<1x2x16xf32>
    tpu.vector_store %arg16[%c3_168, %c0_169, %c0_170], %371 {strides = array<i32>} : memref<8x2x16xf32, #tpu.memory_space<vmem>>, vector<1x2x16xf32>,
    %c3_171 = arith.constant 3 : index
    %c0_172 = arith.constant 0 : index
    %c0_173 = arith.constant 0 : index
    %372 = vector.load %arg17[%c3_171, %c0_172, %c0_173] : memref<8x2x8xf32, #tpu.memory_space<vmem>>, vector<1x2x8xf32>
    %373 = vector.shape_cast %372 : vector<1x2x8xf32> to vector<2x8xf32>
    %374 = vector.shape_cast %326 : vector<2x8xf32> to vector<1x2x8xf32>
    tpu.vector_store %arg17[%c3_171, %c0_172, %c0_173], %374 {strides = array<i32>} : memref<8x2x8xf32, #tpu.memory_space<vmem>>, vector<1x2x8xf32>,
    %c3_174 = arith.constant 3 : index
    %c0_175 = arith.constant 0 : index
    %c0_176 = arith.constant 0 : index
    %375 = vector.load %arg18[%c3_174, %c0_175, %c0_176] : memref<8x2x8xf32, #tpu.memory_space<vmem>>, vector<1x2x8xf32>
    %376 = vector.shape_cast %375 : vector<1x2x8xf32> to vector<2x8xf32>
    %377 = vector.shape_cast %330 : vector<2x8xf32> to vector<1x2x8xf32>
    tpu.vector_store %arg18[%c3_174, %c0_175, %c0_176], %377 {strides = array<i32>} : memref<8x2x8xf32, #tpu.memory_space<vmem>>, vector<1x2x8xf32>,
    %c3_177 = arith.constant 3 : index
    %c0_178 = arith.constant 0 : index
    %c0_179 = arith.constant 0 : index
    %378 = vector.load %arg19[%c3_177, %c0_178, %c0_179] : memref<8x2x8xf32, #tpu.memory_space<vmem>>, vector<1x2x8xf32>
    %379 = vector.shape_cast %378 : vector<1x2x8xf32> to vector<2x8xf32>
    %380 = vector.shape_cast %334 : vector<2x8xf32> to vector<1x2x8xf32>
    tpu.vector_store %arg19[%c3_177, %c0_178, %c0_179], %380 {strides = array<i32>} : memref<8x2x8xf32, #tpu.memory_space<vmem>>, vector<1x2x8xf32>,
    %c3_180 = arith.constant 3 : index
    %c0_181 = arith.constant 0 : index
    %c0_182 = arith.constant 0 : index
    %381 = vector.load %arg20[%c3_180, %c0_181, %c0_182] : memref<8x2x8xf32, #tpu.memory_space<vmem>>, vector<1x2x8xf32>
    %382 = vector.shape_cast %381 : vector<1x2x8xf32> to vector<2x8xf32>
    %383 = vector.shape_cast %365 : vector<2x8xf32> to vector<1x2x8xf32>
    tpu.vector_store %arg20[%c3_180, %c0_181, %c0_182], %383 {strides = array<i32>} : memref<8x2x8xf32, #tpu.memory_space<vmem>>, vector<1x2x8xf32>,
    %c4 = arith.constant 4 : index
    %c0_183 = arith.constant 0 : index
    %c0_184 = arith.constant 0 : index
    %384 = vector.load %arg1[%c4, %c0_183, %c0_184] : memref<8x2x16xf32, #tpu.memory_space<vmem>>, vector<1x2x16xf32>
    %385 = vector.shape_cast %384 : vector<1x2x16xf32> to vector<2x16xf32>
    %386 = tpu.concatenate %385, %365, %322 in 1 : vector<2x16xf32>, vector<2x8xf32>, vector<2x16xf32> -> vector<2x40xf32>
    %cst_185 = arith.constant dense<0.000000e+00> : vector<2x48xf32>
    %387 = tpu.matmul %386, %0, %cst_185 {dimension_numbers = #tpu.dot_dimension_numbers<[1], [0], [0], [1], [0, 0, 1, 1], [], []>} : vector<2x40xf32>, vector<40x48xf32>, vector<2x48xf32> -> vector<2x48xf32>
    %388 = vector.broadcast %1 : vector<1x48xf32> to vector<2x48xf32>
    %389 = arith.addf %387, %388 : vector<2x48xf32>
    %390 = vector.extract_strided_slice %389 {offsets = [0, 0], sizes = [2, 16], strides = [1, 1]} : vector<2x48xf32> to vector<2x16xf32>
    %391 = arith.negf %390 : vector<2x16xf32>
    %392 = math.exp %391 : vector<2x16xf32>
    %cst_186 = arith.constant 1.000000e+00 : f32
    %393 = vector.broadcast %cst_186 : f32 to vector<2x16xf32>
    %394 = arith.addf %393, %392 : vector<2x16xf32>
    %395 = arith.divf %393, %394 : vector<2x16xf32>
    %396 = vector.extract_strided_slice %389 {offsets = [0, 16], sizes = [2, 16], strides = [1, 1]} : vector<2x48xf32> to vector<2x16xf32>
    %397 = arith.negf %396 : vector<2x16xf32>
    %398 = math.exp %397 : vector<2x16xf32>
    %cst_187 = arith.constant 1.000000e+00 : f32
    %399 = vector.broadcast %cst_187 : f32 to vector<2x16xf32>
    %400 = arith.addf %399, %398 : vector<2x16xf32>
    %401 = arith.divf %399, %400 : vector<2x16xf32>
    %402 = arith.mulf %401, %322 : vector<2x16xf32>
    %cst_188 = arith.constant dense<0.000000e+00> : vector<2x16xf32>
    %403 = tpu.matmul %402, %2, %cst_188 {dimension_numbers = #tpu.dot_dimension_numbers<[1], [0], [0], [1], [0, 0, 1, 1], [], []>} : vector<2x16xf32>, vector<16x16xf32>, vector<2x16xf32> -> vector<2x16xf32>
    %404 = vector.extract_strided_slice %389 {offsets = [0, 32], sizes = [2, 16], strides = [1, 1]} : vector<2x48xf32> to vector<2x16xf32>
    %405 = arith.addf %404, %403 : vector<2x16xf32>
    %406 = math.tanh %405 : vector<2x16xf32>
    %407 = arith.mulf %395, %322 : vector<2x16xf32>
    %cst_189 = arith.constant 1.000000e+00 : f32
    %408 = vector.broadcast %cst_189 : f32 to vector<2x16xf32>
    %409 = arith.subf %408, %395 : vector<2x16xf32>
    %410 = arith.mulf %409, %406 : vector<2x16xf32>
    %411 = arith.addf %407, %410 : vector<2x16xf32>
    %cst_190 = arith.constant -5.000000e+00 : f32
    %cst_191 = arith.constant 5.000000e+00 : f32
    %412 = vector.broadcast %cst_190 : f32 to vector<2x16xf32>
    %413 = arith.maximumf %412, %411 : vector<2x16xf32>
    %414 = vector.broadcast %cst_191 : f32 to vector<2x16xf32>
    %415 = arith.minimumf %414, %413 : vector<2x16xf32>
    %cst_192 = arith.constant dense<0.000000e+00> : vector<2x16xf32>
    %416 = tpu.matmul %415, %6, %cst_192 {dimension_numbers = #tpu.dot_dimension_numbers<[1], [0], [0], [1], [0, 0, 1, 1], [], []>} : vector<2x16xf32>, vector<16x16xf32>, vector<2x16xf32> -> vector<2x16xf32>
    %417 = vector.broadcast %7 : vector<1x16xf32> to vector<2x16xf32>
    %418 = arith.addf %416, %417 : vector<2x16xf32>
    %419 = vector.extract_strided_slice %418 {offsets = [0, 0], sizes = [2, 8], strides = [1, 1]} : vector<2x16xf32> to vector<2x8xf32>
    %420 = vector.extract_strided_slice %418 {offsets = [0, 8], sizes = [2, 8], strides = [1, 1]} : vector<2x16xf32> to vector<2x8xf32>
    %cst_193 = arith.constant 5.000000e-01 : f32
    %421 = vector.broadcast %cst_193 : f32 to vector<2x8xf32>
    %422 = arith.mulf %421, %420 : vector<2x8xf32>
    %423 = math.exp %422 : vector<2x8xf32>
    %c4_194 = arith.constant 4 : index
    %c0_195 = arith.constant 0 : index
    %c0_196 = arith.constant 0 : index
    %424 = vector.load %arg2[%c4_194, %c0_195, %c0_196] : memref<8x2x8xf32, #tpu.memory_space<vmem>>, vector<1x2x8xf32>
    %425 = vector.shape_cast %424 : vector<1x2x8xf32> to vector<2x8xf32>
    %426 = arith.mulf %423, %425 : vector<2x8xf32>
    %427 = arith.addf %419, %426 : vector<2x8xf32>
    %428 = tpu.concatenate %427, %364 in 1 : vector<2x8xf32>, vector<2x32xf32> -> vector<2x40xf32>
    %cst_197 = arith.constant dense<0.000000e+00> : vector<2x96xf32>
    %429 = tpu.matmul %428, %3, %cst_197 {dimension_numbers = #tpu.dot_dimension_numbers<[1], [0], [0], [1], [0, 0, 1, 1], [], []>} : vector<2x40xf32>, vector<40x96xf32>, vector<2x96xf32> -> vector<2x96xf32>
    %430 = vector.broadcast %4 : vector<1x96xf32> to vector<2x96xf32>
    %431 = arith.addf %429, %430 : vector<2x96xf32>
    %432 = vector.extract_strided_slice %431 {offsets = [0, 0], sizes = [2, 32], strides = [1, 1]} : vector<2x96xf32> to vector<2x32xf32>
    %433 = arith.negf %432 : vector<2x32xf32>
    %434 = math.exp %433 : vector<2x32xf32>
    %cst_198 = arith.constant 1.000000e+00 : f32
    %435 = vector.broadcast %cst_198 : f32 to vector<2x32xf32>
    %436 = arith.addf %435, %434 : vector<2x32xf32>
    %437 = arith.divf %435, %436 : vector<2x32xf32>
    %438 = vector.extract_strided_slice %431 {offsets = [0, 32], sizes = [2, 32], strides = [1, 1]} : vector<2x96xf32> to vector<2x32xf32>
    %439 = arith.negf %438 : vector<2x32xf32>
    %440 = math.exp %439 : vector<2x32xf32>
    %cst_199 = arith.constant 1.000000e+00 : f32
    %441 = vector.broadcast %cst_199 : f32 to vector<2x32xf32>
    %442 = arith.addf %441, %440 : vector<2x32xf32>
    %443 = arith.divf %441, %442 : vector<2x32xf32>
    %444 = arith.mulf %443, %364 : vector<2x32xf32>
    %cst_200 = arith.constant dense<0.000000e+00> : vector<2x32xf32>
    %445 = tpu.matmul %444, %5, %cst_200 {dimension_numbers = #tpu.dot_dimension_numbers<[1], [0], [0], [1], [0, 0, 1, 1], [], []>} : vector<2x32xf32>, vector<32x32xf32>, vector<2x32xf32> -> vector<2x32xf32>
    %446 = vector.extract_strided_slice %431 {offsets = [0, 64], sizes = [2, 32], strides = [1, 1]} : vector<2x96xf32> to vector<2x32xf32>
    %447 = arith.addf %446, %445 : vector<2x32xf32>
    %448 = math.tanh %447 : vector<2x32xf32>
    %449 = arith.mulf %437, %364 : vector<2x32xf32>
    %cst_201 = arith.constant 1.000000e+00 : f32
    %450 = vector.broadcast %cst_201 : f32 to vector<2x32xf32>
    %451 = arith.subf %450, %437 : vector<2x32xf32>
    %452 = arith.mulf %451, %448 : vector<2x32xf32>
    %453 = arith.addf %449, %452 : vector<2x32xf32>
    %cst_202 = arith.constant -5.000000e+00 : f32
    %cst_203 = arith.constant 5.000000e+00 : f32
    %454 = vector.broadcast %cst_202 : f32 to vector<2x32xf32>
    %455 = arith.maximumf %454, %453 : vector<2x32xf32>
    %456 = vector.broadcast %cst_203 : f32 to vector<2x32xf32>
    %457 = arith.minimumf %456, %455 : vector<2x32xf32>
    %cst_204 = arith.constant dense<0.000000e+00> : vector<2x8xf32>
    %458 = tpu.matmul %457, %8, %cst_204 {dimension_numbers = #tpu.dot_dimension_numbers<[1], [0], [0], [1], [0, 0, 1, 1], [], []>} : vector<2x32xf32>, vector<32x8xf32>, vector<2x8xf32> -> vector<2x8xf32>
    %c4_205 = arith.constant 4 : index
    %c0_206 = arith.constant 0 : index
    %c0_207 = arith.constant 0 : index
    %459 = vector.load %arg15[%c4_205, %c0_206, %c0_207] : memref<8x2x32xf32, #tpu.memory_space<vmem>>, vector<1x2x32xf32>
    %460 = vector.shape_cast %459 : vector<1x2x32xf32> to vector<2x32xf32>
    %461 = vector.shape_cast %457 : vector<2x32xf32> to vector<1x2x32xf32>
    tpu.vector_store %arg15[%c4_205, %c0_206, %c0_207], %461 {strides = array<i32>} : memref<8x2x32xf32, #tpu.memory_space<vmem>>, vector<1x2x32xf32>,
    %c4_208 = arith.constant 4 : index
    %c0_209 = arith.constant 0 : index
    %c0_210 = arith.constant 0 : index
    %462 = vector.load %arg16[%c4_208, %c0_209, %c0_210] : memref<8x2x16xf32, #tpu.memory_space<vmem>>, vector<1x2x16xf32>
    %463 = vector.shape_cast %462 : vector<1x2x16xf32> to vector<2x16xf32>
    %464 = vector.shape_cast %415 : vector<2x16xf32> to vector<1x2x16xf32>
    tpu.vector_store %arg16[%c4_208, %c0_209, %c0_210], %464 {strides = array<i32>} : memref<8x2x16xf32, #tpu.memory_space<vmem>>, vector<1x2x16xf32>,
    %c4_211 = arith.constant 4 : index
    %c0_212 = arith.constant 0 : index
    %c0_213 = arith.constant 0 : index
    %465 = vector.load %arg17[%c4_211, %c0_212, %c0_213] : memref<8x2x8xf32, #tpu.memory_space<vmem>>, vector<1x2x8xf32>
    %466 = vector.shape_cast %465 : vector<1x2x8xf32> to vector<2x8xf32>
    %467 = vector.shape_cast %419 : vector<2x8xf32> to vector<1x2x8xf32>
    tpu.vector_store %arg17[%c4_211, %c0_212, %c0_213], %467 {strides = array<i32>} : memref<8x2x8xf32, #tpu.memory_space<vmem>>, vector<1x2x8xf32>,
    %c4_214 = arith.constant 4 : index
    %c0_215 = arith.constant 0 : index
    %c0_216 = arith.constant 0 : index
    %468 = vector.load %arg18[%c4_214, %c0_215, %c0_216] : memref<8x2x8xf32, #tpu.memory_space<vmem>>, vector<1x2x8xf32>
    %469 = vector.shape_cast %468 : vector<1x2x8xf32> to vector<2x8xf32>
    %470 = vector.shape_cast %423 : vector<2x8xf32> to vector<1x2x8xf32>
    tpu.vector_store %arg18[%c4_214, %c0_215, %c0_216], %470 {strides = array<i32>} : memref<8x2x8xf32, #tpu.memory_space<vmem>>, vector<1x2x8xf32>,
    %c4_217 = arith.constant 4 : index
    %c0_218 = arith.constant 0 : index
    %c0_219 = arith.constant 0 : index
    %471 = vector.load %arg19[%c4_217, %c0_218, %c0_219] : memref<8x2x8xf32, #tpu.memory_space<vmem>>, vector<1x2x8xf32>
    %472 = vector.shape_cast %471 : vector<1x2x8xf32> to vector<2x8xf32>
    %473 = vector.shape_cast %427 : vector<2x8xf32> to vector<1x2x8xf32>
    tpu.vector_store %arg19[%c4_217, %c0_218, %c0_219], %473 {strides = array<i32>} : memref<8x2x8xf32, #tpu.memory_space<vmem>>, vector<1x2x8xf32>,
    %c4_220 = arith.constant 4 : index
    %c0_221 = arith.constant 0 : index
    %c0_222 = arith.constant 0 : index
    %474 = vector.load %arg20[%c4_220, %c0_221, %c0_222] : memref<8x2x8xf32, #tpu.memory_space<vmem>>, vector<1x2x8xf32>
    %475 = vector.shape_cast %474 : vector<1x2x8xf32> to vector<2x8xf32>
    %476 = vector.shape_cast %458 : vector<2x8xf32> to vector<1x2x8xf32>
    tpu.vector_store %arg20[%c4_220, %c0_221, %c0_222], %476 {strides = array<i32>} : memref<8x2x8xf32, #tpu.memory_space<vmem>>, vector<1x2x8xf32>,
    %c5 = arith.constant 5 : index
    %c0_223 = arith.constant 0 : index
    %c0_224 = arith.constant 0 : index
    %477 = vector.load %arg1[%c5, %c0_223, %c0_224] : memref<8x2x16xf32, #tpu.memory_space<vmem>>, vector<1x2x16xf32>
    %478 = vector.shape_cast %477 : vector<1x2x16xf32> to vector<2x16xf32>
    %479 = tpu.concatenate %478, %458, %415 in 1 : vector<2x16xf32>, vector<2x8xf32>, vector<2x16xf32> -> vector<2x40xf32>
    %cst_225 = arith.constant dense<0.000000e+00> : vector<2x48xf32>
    %480 = tpu.matmul %479, %0, %cst_225 {dimension_numbers = #tpu.dot_dimension_numbers<[1], [0], [0], [1], [0, 0, 1, 1], [], []>} : vector<2x40xf32>, vector<40x48xf32>, vector<2x48xf32> -> vector<2x48xf32>
    %481 = vector.broadcast %1 : vector<1x48xf32> to vector<2x48xf32>
    %482 = arith.addf %480, %481 : vector<2x48xf32>
    %483 = vector.extract_strided_slice %482 {offsets = [0, 0], sizes = [2, 16], strides = [1, 1]} : vector<2x48xf32> to vector<2x16xf32>
    %484 = arith.negf %483 : vector<2x16xf32>
    %485 = math.exp %484 : vector<2x16xf32>
    %cst_226 = arith.constant 1.000000e+00 : f32
    %486 = vector.broadcast %cst_226 : f32 to vector<2x16xf32>
    %487 = arith.addf %486, %485 : vector<2x16xf32>
    %488 = arith.divf %486, %487 : vector<2x16xf32>
    %489 = vector.extract_strided_slice %482 {offsets = [0, 16], sizes = [2, 16], strides = [1, 1]} : vector<2x48xf32> to vector<2x16xf32>
    %490 = arith.negf %489 : vector<2x16xf32>
    %491 = math.exp %490 : vector<2x16xf32>
    %cst_227 = arith.constant 1.000000e+00 : f32
    %492 = vector.broadcast %cst_227 : f32 to vector<2x16xf32>
    %493 = arith.addf %492, %491 : vector<2x16xf32>
    %494 = arith.divf %492, %493 : vector<2x16xf32>
    %495 = arith.mulf %494, %415 : vector<2x16xf32>
    %cst_228 = arith.constant dense<0.000000e+00> : vector<2x16xf32>
    %496 = tpu.matmul %495, %2, %cst_228 {dimension_numbers = #tpu.dot_dimension_numbers<[1], [0], [0], [1], [0, 0, 1, 1], [], []>} : vector<2x16xf32>, vector<16x16xf32>, vector<2x16xf32> -> vector<2x16xf32>
    %497 = vector.extract_strided_slice %482 {offsets = [0, 32], sizes = [2, 16], strides = [1, 1]} : vector<2x48xf32> to vector<2x16xf32>
    %498 = arith.addf %497, %496 : vector<2x16xf32>
    %499 = math.tanh %498 : vector<2x16xf32>
    %500 = arith.mulf %488, %415 : vector<2x16xf32>
    %cst_229 = arith.constant 1.000000e+00 : f32
    %501 = vector.broadcast %cst_229 : f32 to vector<2x16xf32>
    %502 = arith.subf %501, %488 : vector<2x16xf32>
    %503 = arith.mulf %502, %499 : vector<2x16xf32>
    %504 = arith.addf %500, %503 : vector<2x16xf32>
    %cst_230 = arith.constant -5.000000e+00 : f32
    %cst_231 = arith.constant 5.000000e+00 : f32
    %505 = vector.broadcast %cst_230 : f32 to vector<2x16xf32>
    %506 = arith.maximumf %505, %504 : vector<2x16xf32>
    %507 = vector.broadcast %cst_231 : f32 to vector<2x16xf32>
    %508 = arith.minimumf %507, %506 : vector<2x16xf32>
    %cst_232 = arith.constant dense<0.000000e+00> : vector<2x16xf32>
    %509 = tpu.matmul %508, %6, %cst_232 {dimension_numbers = #tpu.dot_dimension_numbers<[1], [0], [0], [1], [0, 0, 1, 1], [], []>} : vector<2x16xf32>, vector<16x16xf32>, vector<2x16xf32> -> vector<2x16xf32>
    %510 = vector.broadcast %7 : vector<1x16xf32> to vector<2x16xf32>
    %511 = arith.addf %509, %510 : vector<2x16xf32>
    %512 = vector.extract_strided_slice %511 {offsets = [0, 0], sizes = [2, 8], strides = [1, 1]} : vector<2x16xf32> to vector<2x8xf32>
    %513 = vector.extract_strided_slice %511 {offsets = [0, 8], sizes = [2, 8], strides = [1, 1]} : vector<2x16xf32> to vector<2x8xf32>
    %cst_233 = arith.constant 5.000000e-01 : f32
    %514 = vector.broadcast %cst_233 : f32 to vector<2x8xf32>
    %515 = arith.mulf %514, %513 : vector<2x8xf32>
    %516 = math.exp %515 : vector<2x8xf32>
    %c5_234 = arith.constant 5 : index
    %c0_235 = arith.constant 0 : index
    %c0_236 = arith.constant 0 : index
    %517 = vector.load %arg2[%c5_234, %c0_235, %c0_236] : memref<8x2x8xf32, #tpu.memory_space<vmem>>, vector<1x2x8xf32>
    %518 = vector.shape_cast %517 : vector<1x2x8xf32> to vector<2x8xf32>
    %519 = arith.mulf %516, %518 : vector<2x8xf32>
    %520 = arith.addf %512, %519 : vector<2x8xf32>
    %521 = tpu.concatenate %520, %457 in 1 : vector<2x8xf32>, vector<2x32xf32> -> vector<2x40xf32>
    %cst_237 = arith.constant dense<0.000000e+00> : vector<2x96xf32>
    %522 = tpu.matmul %521, %3, %cst_237 {dimension_numbers = #tpu.dot_dimension_numbers<[1], [0], [0], [1], [0, 0, 1, 1], [], []>} : vector<2x40xf32>, vector<40x96xf32>, vector<2x96xf32> -> vector<2x96xf32>
    %523 = vector.broadcast %4 : vector<1x96xf32> to vector<2x96xf32>
    %524 = arith.addf %522, %523 : vector<2x96xf32>
    %525 = vector.extract_strided_slice %524 {offsets = [0, 0], sizes = [2, 32], strides = [1, 1]} : vector<2x96xf32> to vector<2x32xf32>
    %526 = arith.negf %525 : vector<2x32xf32>
    %527 = math.exp %526 : vector<2x32xf32>
    %cst_238 = arith.constant 1.000000e+00 : f32
    %528 = vector.broadcast %cst_238 : f32 to vector<2x32xf32>
    %529 = arith.addf %528, %527 : vector<2x32xf32>
    %530 = arith.divf %528, %529 : vector<2x32xf32>
    %531 = vector.extract_strided_slice %524 {offsets = [0, 32], sizes = [2, 32], strides = [1, 1]} : vector<2x96xf32> to vector<2x32xf32>
    %532 = arith.negf %531 : vector<2x32xf32>
    %533 = math.exp %532 : vector<2x32xf32>
    %cst_239 = arith.constant 1.000000e+00 : f32
    %534 = vector.broadcast %cst_239 : f32 to vector<2x32xf32>
    %535 = arith.addf %534, %533 : vector<2x32xf32>
    %536 = arith.divf %534, %535 : vector<2x32xf32>
    %537 = arith.mulf %536, %457 : vector<2x32xf32>
    %cst_240 = arith.constant dense<0.000000e+00> : vector<2x32xf32>
    %538 = tpu.matmul %537, %5, %cst_240 {dimension_numbers = #tpu.dot_dimension_numbers<[1], [0], [0], [1], [0, 0, 1, 1], [], []>} : vector<2x32xf32>, vector<32x32xf32>, vector<2x32xf32> -> vector<2x32xf32>
    %539 = vector.extract_strided_slice %524 {offsets = [0, 64], sizes = [2, 32], strides = [1, 1]} : vector<2x96xf32> to vector<2x32xf32>
    %540 = arith.addf %539, %538 : vector<2x32xf32>
    %541 = math.tanh %540 : vector<2x32xf32>
    %542 = arith.mulf %530, %457 : vector<2x32xf32>
    %cst_241 = arith.constant 1.000000e+00 : f32
    %543 = vector.broadcast %cst_241 : f32 to vector<2x32xf32>
    %544 = arith.subf %543, %530 : vector<2x32xf32>
    %545 = arith.mulf %544, %541 : vector<2x32xf32>
    %546 = arith.addf %542, %545 : vector<2x32xf32>
    %cst_242 = arith.constant -5.000000e+00 : f32
    %cst_243 = arith.constant 5.000000e+00 : f32
    %547 = vector.broadcast %cst_242 : f32 to vector<2x32xf32>
    %548 = arith.maximumf %547, %546 : vector<2x32xf32>
    %549 = vector.broadcast %cst_243 : f32 to vector<2x32xf32>
    %550 = arith.minimumf %549, %548 : vector<2x32xf32>
    %cst_244 = arith.constant dense<0.000000e+00> : vector<2x8xf32>
    %551 = tpu.matmul %550, %8, %cst_244 {dimension_numbers = #tpu.dot_dimension_numbers<[1], [0], [0], [1], [0, 0, 1, 1], [], []>} : vector<2x32xf32>, vector<32x8xf32>, vector<2x8xf32> -> vector<2x8xf32>
    %c5_245 = arith.constant 5 : index
    %c0_246 = arith.constant 0 : index
    %c0_247 = arith.constant 0 : index
    %552 = vector.load %arg15[%c5_245, %c0_246, %c0_247] : memref<8x2x32xf32, #tpu.memory_space<vmem>>, vector<1x2x32xf32>
    %553 = vector.shape_cast %552 : vector<1x2x32xf32> to vector<2x32xf32>
    %554 = vector.shape_cast %550 : vector<2x32xf32> to vector<1x2x32xf32>
    tpu.vector_store %arg15[%c5_245, %c0_246, %c0_247], %554 {strides = array<i32>} : memref<8x2x32xf32, #tpu.memory_space<vmem>>, vector<1x2x32xf32>,
    %c5_248 = arith.constant 5 : index
    %c0_249 = arith.constant 0 : index
    %c0_250 = arith.constant 0 : index
    %555 = vector.load %arg16[%c5_248, %c0_249, %c0_250] : memref<8x2x16xf32, #tpu.memory_space<vmem>>, vector<1x2x16xf32>
    %556 = vector.shape_cast %555 : vector<1x2x16xf32> to vector<2x16xf32>
    %557 = vector.shape_cast %508 : vector<2x16xf32> to vector<1x2x16xf32>
    tpu.vector_store %arg16[%c5_248, %c0_249, %c0_250], %557 {strides = array<i32>} : memref<8x2x16xf32, #tpu.memory_space<vmem>>, vector<1x2x16xf32>,
    %c5_251 = arith.constant 5 : index
    %c0_252 = arith.constant 0 : index
    %c0_253 = arith.constant 0 : index
    %558 = vector.load %arg17[%c5_251, %c0_252, %c0_253] : memref<8x2x8xf32, #tpu.memory_space<vmem>>, vector<1x2x8xf32>
    %559 = vector.shape_cast %558 : vector<1x2x8xf32> to vector<2x8xf32>
    %560 = vector.shape_cast %512 : vector<2x8xf32> to vector<1x2x8xf32>
    tpu.vector_store %arg17[%c5_251, %c0_252, %c0_253], %560 {strides = array<i32>} : memref<8x2x8xf32, #tpu.memory_space<vmem>>, vector<1x2x8xf32>,
    %c5_254 = arith.constant 5 : index
    %c0_255 = arith.constant 0 : index
    %c0_256 = arith.constant 0 : index
    %561 = vector.load %arg18[%c5_254, %c0_255, %c0_256] : memref<8x2x8xf32, #tpu.memory_space<vmem>>, vector<1x2x8xf32>
    %562 = vector.shape_cast %561 : vector<1x2x8xf32> to vector<2x8xf32>
    %563 = vector.shape_cast %516 : vector<2x8xf32> to vector<1x2x8xf32>
    tpu.vector_store %arg18[%c5_254, %c0_255, %c0_256], %563 {strides = array<i32>} : memref<8x2x8xf32, #tpu.memory_space<vmem>>, vector<1x2x8xf32>,
    %c5_257 = arith.constant 5 : index
    %c0_258 = arith.constant 0 : index
    %c0_259 = arith.constant 0 : index
    %564 = vector.load %arg19[%c5_257, %c0_258, %c0_259] : memref<8x2x8xf32, #tpu.memory_space<vmem>>, vector<1x2x8xf32>
    %565 = vector.shape_cast %564 : vector<1x2x8xf32> to vector<2x8xf32>
    %566 = vector.shape_cast %520 : vector<2x8xf32> to vector<1x2x8xf32>
    tpu.vector_store %arg19[%c5_257, %c0_258, %c0_259], %566 {strides = array<i32>} : memref<8x2x8xf32, #tpu.memory_space<vmem>>, vector<1x2x8xf32>,
    %c5_260 = arith.constant 5 : index
    %c0_261 = arith.constant 0 : index
    %c0_262 = arith.constant 0 : index
    %567 = vector.load %arg20[%c5_260, %c0_261, %c0_262] : memref<8x2x8xf32, #tpu.memory_space<vmem>>, vector<1x2x8xf32>
    %568 = vector.shape_cast %567 : vector<1x2x8xf32> to vector<2x8xf32>
    %569 = vector.shape_cast %551 : vector<2x8xf32> to vector<1x2x8xf32>
    tpu.vector_store %arg20[%c5_260, %c0_261, %c0_262], %569 {strides = array<i32>} : memref<8x2x8xf32, #tpu.memory_space<vmem>>, vector<1x2x8xf32>,
    %c6 = arith.constant 6 : index
    %c0_263 = arith.constant 0 : index
    %c0_264 = arith.constant 0 : index
    %570 = vector.load %arg1[%c6, %c0_263, %c0_264] : memref<8x2x16xf32, #tpu.memory_space<vmem>>, vector<1x2x16xf32>
    %571 = vector.shape_cast %570 : vector<1x2x16xf32> to vector<2x16xf32>
    %572 = tpu.concatenate %571, %551, %508 in 1 : vector<2x16xf32>, vector<2x8xf32>, vector<2x16xf32> -> vector<2x40xf32>
    %cst_265 = arith.constant dense<0.000000e+00> : vector<2x48xf32>
    %573 = tpu.matmul %572, %0, %cst_265 {dimension_numbers = #tpu.dot_dimension_numbers<[1], [0], [0], [1], [0, 0, 1, 1], [], []>} : vector<2x40xf32>, vector<40x48xf32>, vector<2x48xf32> -> vector<2x48xf32>
    %574 = vector.broadcast %1 : vector<1x48xf32> to vector<2x48xf32>
    %575 = arith.addf %573, %574 : vector<2x48xf32>
    %576 = vector.extract_strided_slice %575 {offsets = [0, 0], sizes = [2, 16], strides = [1, 1]} : vector<2x48xf32> to vector<2x16xf32>
    %577 = arith.negf %576 : vector<2x16xf32>
    %578 = math.exp %577 : vector<2x16xf32>
    %cst_266 = arith.constant 1.000000e+00 : f32
    %579 = vector.broadcast %cst_266 : f32 to vector<2x16xf32>
    %580 = arith.addf %579, %578 : vector<2x16xf32>
    %581 = arith.divf %579, %580 : vector<2x16xf32>
    %582 = vector.extract_strided_slice %575 {offsets = [0, 16], sizes = [2, 16], strides = [1, 1]} : vector<2x48xf32> to vector<2x16xf32>
    %583 = arith.negf %582 : vector<2x16xf32>
    %584 = math.exp %583 : vector<2x16xf32>
    %cst_267 = arith.constant 1.000000e+00 : f32
    %585 = vector.broadcast %cst_267 : f32 to vector<2x16xf32>
    %586 = arith.addf %585, %584 : vector<2x16xf32>
    %587 = arith.divf %585, %586 : vector<2x16xf32>
    %588 = arith.mulf %587, %508 : vector<2x16xf32>
    %cst_268 = arith.constant dense<0.000000e+00> : vector<2x16xf32>
    %589 = tpu.matmul %588, %2, %cst_268 {dimension_numbers = #tpu.dot_dimension_numbers<[1], [0], [0], [1], [0, 0, 1, 1], [], []>} : vector<2x16xf32>, vector<16x16xf32>, vector<2x16xf32> -> vector<2x16xf32>
    %590 = vector.extract_strided_slice %575 {offsets = [0, 32], sizes = [2, 16], strides = [1, 1]} : vector<2x48xf32> to vector<2x16xf32>
    %591 = arith.addf %590, %589 : vector<2x16xf32>
    %592 = math.tanh %591 : vector<2x16xf32>
    %593 = arith.mulf %581, %508 : vector<2x16xf32>
    %cst_269 = arith.constant 1.000000e+00 : f32
    %594 = vector.broadcast %cst_269 : f32 to vector<2x16xf32>
    %595 = arith.subf %594, %581 : vector<2x16xf32>
    %596 = arith.mulf %595, %592 : vector<2x16xf32>
    %597 = arith.addf %593, %596 : vector<2x16xf32>
    %cst_270 = arith.constant -5.000000e+00 : f32
    %cst_271 = arith.constant 5.000000e+00 : f32
    %598 = vector.broadcast %cst_270 : f32 to vector<2x16xf32>
    %599 = arith.maximumf %598, %597 : vector<2x16xf32>
    %600 = vector.broadcast %cst_271 : f32 to vector<2x16xf32>
    %601 = arith.minimumf %600, %599 : vector<2x16xf32>
    %cst_272 = arith.constant dense<0.000000e+00> : vector<2x16xf32>
    %602 = tpu.matmul %601, %6, %cst_272 {dimension_numbers = #tpu.dot_dimension_numbers<[1], [0], [0], [1], [0, 0, 1, 1], [], []>} : vector<2x16xf32>, vector<16x16xf32>, vector<2x16xf32> -> vector<2x16xf32>
    %603 = vector.broadcast %7 : vector<1x16xf32> to vector<2x16xf32>
    %604 = arith.addf %602, %603 : vector<2x16xf32>
    %605 = vector.extract_strided_slice %604 {offsets = [0, 0], sizes = [2, 8], strides = [1, 1]} : vector<2x16xf32> to vector<2x8xf32>
    %606 = vector.extract_strided_slice %604 {offsets = [0, 8], sizes = [2, 8], strides = [1, 1]} : vector<2x16xf32> to vector<2x8xf32>
    %cst_273 = arith.constant 5.000000e-01 : f32
    %607 = vector.broadcast %cst_273 : f32 to vector<2x8xf32>
    %608 = arith.mulf %607, %606 : vector<2x8xf32>
    %609 = math.exp %608 : vector<2x8xf32>
    %c6_274 = arith.constant 6 : index
    %c0_275 = arith.constant 0 : index
    %c0_276 = arith.constant 0 : index
    %610 = vector.load %arg2[%c6_274, %c0_275, %c0_276] : memref<8x2x8xf32, #tpu.memory_space<vmem>>, vector<1x2x8xf32>
    %611 = vector.shape_cast %610 : vector<1x2x8xf32> to vector<2x8xf32>
    %612 = arith.mulf %609, %611 : vector<2x8xf32>
    %613 = arith.addf %605, %612 : vector<2x8xf32>
    %614 = tpu.concatenate %613, %550 in 1 : vector<2x8xf32>, vector<2x32xf32> -> vector<2x40xf32>
    %cst_277 = arith.constant dense<0.000000e+00> : vector<2x96xf32>
    %615 = tpu.matmul %614, %3, %cst_277 {dimension_numbers = #tpu.dot_dimension_numbers<[1], [0], [0], [1], [0, 0, 1, 1], [], []>} : vector<2x40xf32>, vector<40x96xf32>, vector<2x96xf32> -> vector<2x96xf32>
    %616 = vector.broadcast %4 : vector<1x96xf32> to vector<2x96xf32>
    %617 = arith.addf %615, %616 : vector<2x96xf32>
    %618 = vector.extract_strided_slice %617 {offsets = [0, 0], sizes = [2, 32], strides = [1, 1]} : vector<2x96xf32> to vector<2x32xf32>
    %619 = arith.negf %618 : vector<2x32xf32>
    %620 = math.exp %619 : vector<2x32xf32>
    %cst_278 = arith.constant 1.000000e+00 : f32
    %621 = vector.broadcast %cst_278 : f32 to vector<2x32xf32>
    %622 = arith.addf %621, %620 : vector<2x32xf32>
    %623 = arith.divf %621, %622 : vector<2x32xf32>
    %624 = vector.extract_strided_slice %617 {offsets = [0, 32], sizes = [2, 32], strides = [1, 1]} : vector<2x96xf32> to vector<2x32xf32>
    %625 = arith.negf %624 : vector<2x32xf32>
    %626 = math.exp %625 : vector<2x32xf32>
    %cst_279 = arith.constant 1.000000e+00 : f32
    %627 = vector.broadcast %cst_279 : f32 to vector<2x32xf32>
    %628 = arith.addf %627, %626 : vector<2x32xf32>
    %629 = arith.divf %627, %628 : vector<2x32xf32>
    %630 = arith.mulf %629, %550 : vector<2x32xf32>
    %cst_280 = arith.constant dense<0.000000e+00> : vector<2x32xf32>
    %631 = tpu.matmul %630, %5, %cst_280 {dimension_numbers = #tpu.dot_dimension_numbers<[1], [0], [0], [1], [0, 0, 1, 1], [], []>} : vector<2x32xf32>, vector<32x32xf32>, vector<2x32xf32> -> vector<2x32xf32>
    %632 = vector.extract_strided_slice %617 {offsets = [0, 64], sizes = [2, 32], strides = [1, 1]} : vector<2x96xf32> to vector<2x32xf32>
    %633 = arith.addf %632, %631 : vector<2x32xf32>
    %634 = math.tanh %633 : vector<2x32xf32>
    %635 = arith.mulf %623, %550 : vector<2x32xf32>
    %cst_281 = arith.constant 1.000000e+00 : f32
    %636 = vector.broadcast %cst_281 : f32 to vector<2x32xf32>
    %637 = arith.subf %636, %623 : vector<2x32xf32>
    %638 = arith.mulf %637, %634 : vector<2x32xf32>
    %639 = arith.addf %635, %638 : vector<2x32xf32>
    %cst_282 = arith.constant -5.000000e+00 : f32
    %cst_283 = arith.constant 5.000000e+00 : f32
    %640 = vector.broadcast %cst_282 : f32 to vector<2x32xf32>
    %641 = arith.maximumf %640, %639 : vector<2x32xf32>
    %642 = vector.broadcast %cst_283 : f32 to vector<2x32xf32>
    %643 = arith.minimumf %642, %641 : vector<2x32xf32>
    %cst_284 = arith.constant dense<0.000000e+00> : vector<2x8xf32>
    %644 = tpu.matmul %643, %8, %cst_284 {dimension_numbers = #tpu.dot_dimension_numbers<[1], [0], [0], [1], [0, 0, 1, 1], [], []>} : vector<2x32xf32>, vector<32x8xf32>, vector<2x8xf32> -> vector<2x8xf32>
    %c6_285 = arith.constant 6 : index
    %c0_286 = arith.constant 0 : index
    %c0_287 = arith.constant 0 : index
    %645 = vector.load %arg15[%c6_285, %c0_286, %c0_287] : memref<8x2x32xf32, #tpu.memory_space<vmem>>, vector<1x2x32xf32>
    %646 = vector.shape_cast %645 : vector<1x2x32xf32> to vector<2x32xf32>
    %647 = vector.shape_cast %643 : vector<2x32xf32> to vector<1x2x32xf32>
    tpu.vector_store %arg15[%c6_285, %c0_286, %c0_287], %647 {strides = array<i32>} : memref<8x2x32xf32, #tpu.memory_space<vmem>>, vector<1x2x32xf32>,
    %c6_288 = arith.constant 6 : index
    %c0_289 = arith.constant 0 : index
    %c0_290 = arith.constant 0 : index
    %648 = vector.load %arg16[%c6_288, %c0_289, %c0_290] : memref<8x2x16xf32, #tpu.memory_space<vmem>>, vector<1x2x16xf32>
    %649 = vector.shape_cast %648 : vector<1x2x16xf32> to vector<2x16xf32>
    %650 = vector.shape_cast %601 : vector<2x16xf32> to vector<1x2x16xf32>
    tpu.vector_store %arg16[%c6_288, %c0_289, %c0_290], %650 {strides = array<i32>} : memref<8x2x16xf32, #tpu.memory_space<vmem>>, vector<1x2x16xf32>,
    %c6_291 = arith.constant 6 : index
    %c0_292 = arith.constant 0 : index
    %c0_293 = arith.constant 0 : index
    %651 = vector.load %arg17[%c6_291, %c0_292, %c0_293] : memref<8x2x8xf32, #tpu.memory_space<vmem>>, vector<1x2x8xf32>
    %652 = vector.shape_cast %651 : vector<1x2x8xf32> to vector<2x8xf32>
    %653 = vector.shape_cast %605 : vector<2x8xf32> to vector<1x2x8xf32>
    tpu.vector_store %arg17[%c6_291, %c0_292, %c0_293], %653 {strides = array<i32>} : memref<8x2x8xf32, #tpu.memory_space<vmem>>, vector<1x2x8xf32>,
    %c6_294 = arith.constant 6 : index
    %c0_295 = arith.constant 0 : index
    %c0_296 = arith.constant 0 : index
    %654 = vector.load %arg18[%c6_294, %c0_295, %c0_296] : memref<8x2x8xf32, #tpu.memory_space<vmem>>, vector<1x2x8xf32>
    %655 = vector.shape_cast %654 : vector<1x2x8xf32> to vector<2x8xf32>
    %656 = vector.shape_cast %609 : vector<2x8xf32> to vector<1x2x8xf32>
    tpu.vector_store %arg18[%c6_294, %c0_295, %c0_296], %656 {strides = array<i32>} : memref<8x2x8xf32, #tpu.memory_space<vmem>>, vector<1x2x8xf32>,
    %c6_297 = arith.constant 6 : index
    %c0_298 = arith.constant 0 : index
    %c0_299 = arith.constant 0 : index
    %657 = vector.load %arg19[%c6_297, %c0_298, %c0_299] : memref<8x2x8xf32, #tpu.memory_space<vmem>>, vector<1x2x8xf32>
    %658 = vector.shape_cast %657 : vector<1x2x8xf32> to vector<2x8xf32>
    %659 = vector.shape_cast %613 : vector<2x8xf32> to vector<1x2x8xf32>
    tpu.vector_store %arg19[%c6_297, %c0_298, %c0_299], %659 {strides = array<i32>} : memref<8x2x8xf32, #tpu.memory_space<vmem>>, vector<1x2x8xf32>,
    %c6_300 = arith.constant 6 : index
    %c0_301 = arith.constant 0 : index
    %c0_302 = arith.constant 0 : index
    %660 = vector.load %arg20[%c6_300, %c0_301, %c0_302] : memref<8x2x8xf32, #tpu.memory_space<vmem>>, vector<1x2x8xf32>
    %661 = vector.shape_cast %660 : vector<1x2x8xf32> to vector<2x8xf32>
    %662 = vector.shape_cast %644 : vector<2x8xf32> to vector<1x2x8xf32>
    tpu.vector_store %arg20[%c6_300, %c0_301, %c0_302], %662 {strides = array<i32>} : memref<8x2x8xf32, #tpu.memory_space<vmem>>, vector<1x2x8xf32>,
    %c7 = arith.constant 7 : index
    %c0_303 = arith.constant 0 : index
    %c0_304 = arith.constant 0 : index
    %663 = vector.load %arg1[%c7, %c0_303, %c0_304] : memref<8x2x16xf32, #tpu.memory_space<vmem>>, vector<1x2x16xf32>
    %664 = vector.shape_cast %663 : vector<1x2x16xf32> to vector<2x16xf32>
    %665 = tpu.concatenate %664, %644, %601 in 1 : vector<2x16xf32>, vector<2x8xf32>, vector<2x16xf32> -> vector<2x40xf32>
    %cst_305 = arith.constant dense<0.000000e+00> : vector<2x48xf32>
    %666 = tpu.matmul %665, %0, %cst_305 {dimension_numbers = #tpu.dot_dimension_numbers<[1], [0], [0], [1], [0, 0, 1, 1], [], []>} : vector<2x40xf32>, vector<40x48xf32>, vector<2x48xf32> -> vector<2x48xf32>
    %667 = vector.broadcast %1 : vector<1x48xf32> to vector<2x48xf32>
    %668 = arith.addf %666, %667 : vector<2x48xf32>
    %669 = vector.extract_strided_slice %668 {offsets = [0, 0], sizes = [2, 16], strides = [1, 1]} : vector<2x48xf32> to vector<2x16xf32>
    %670 = arith.negf %669 : vector<2x16xf32>
    %671 = math.exp %670 : vector<2x16xf32>
    %cst_306 = arith.constant 1.000000e+00 : f32
    %672 = vector.broadcast %cst_306 : f32 to vector<2x16xf32>
    %673 = arith.addf %672, %671 : vector<2x16xf32>
    %674 = arith.divf %672, %673 : vector<2x16xf32>
    %675 = vector.extract_strided_slice %668 {offsets = [0, 16], sizes = [2, 16], strides = [1, 1]} : vector<2x48xf32> to vector<2x16xf32>
    %676 = arith.negf %675 : vector<2x16xf32>
    %677 = math.exp %676 : vector<2x16xf32>
    %cst_307 = arith.constant 1.000000e+00 : f32
    %678 = vector.broadcast %cst_307 : f32 to vector<2x16xf32>
    %679 = arith.addf %678, %677 : vector<2x16xf32>
    %680 = arith.divf %678, %679 : vector<2x16xf32>
    %681 = arith.mulf %680, %601 : vector<2x16xf32>
    %cst_308 = arith.constant dense<0.000000e+00> : vector<2x16xf32>
    %682 = tpu.matmul %681, %2, %cst_308 {dimension_numbers = #tpu.dot_dimension_numbers<[1], [0], [0], [1], [0, 0, 1, 1], [], []>} : vector<2x16xf32>, vector<16x16xf32>, vector<2x16xf32> -> vector<2x16xf32>
    %683 = vector.extract_strided_slice %668 {offsets = [0, 32], sizes = [2, 16], strides = [1, 1]} : vector<2x48xf32> to vector<2x16xf32>
    %684 = arith.addf %683, %682 : vector<2x16xf32>
    %685 = math.tanh %684 : vector<2x16xf32>
    %686 = arith.mulf %674, %601 : vector<2x16xf32>
    %cst_309 = arith.constant 1.000000e+00 : f32
    %687 = vector.broadcast %cst_309 : f32 to vector<2x16xf32>
    %688 = arith.subf %687, %674 : vector<2x16xf32>
    %689 = arith.mulf %688, %685 : vector<2x16xf32>
    %690 = arith.addf %686, %689 : vector<2x16xf32>
    %cst_310 = arith.constant -5.000000e+00 : f32
    %cst_311 = arith.constant 5.000000e+00 : f32
    %691 = vector.broadcast %cst_310 : f32 to vector<2x16xf32>
    %692 = arith.maximumf %691, %690 : vector<2x16xf32>
    %693 = vector.broadcast %cst_311 : f32 to vector<2x16xf32>
    %694 = arith.minimumf %693, %692 : vector<2x16xf32>
    %cst_312 = arith.constant dense<0.000000e+00> : vector<2x16xf32>
    %695 = tpu.matmul %694, %6, %cst_312 {dimension_numbers = #tpu.dot_dimension_numbers<[1], [0], [0], [1], [0, 0, 1, 1], [], []>} : vector<2x16xf32>, vector<16x16xf32>, vector<2x16xf32> -> vector<2x16xf32>
    %696 = vector.broadcast %7 : vector<1x16xf32> to vector<2x16xf32>
    %697 = arith.addf %695, %696 : vector<2x16xf32>
    %698 = vector.extract_strided_slice %697 {offsets = [0, 0], sizes = [2, 8], strides = [1, 1]} : vector<2x16xf32> to vector<2x8xf32>
    %699 = vector.extract_strided_slice %697 {offsets = [0, 8], sizes = [2, 8], strides = [1, 1]} : vector<2x16xf32> to vector<2x8xf32>
    %cst_313 = arith.constant 5.000000e-01 : f32
    %700 = vector.broadcast %cst_313 : f32 to vector<2x8xf32>
    %701 = arith.mulf %700, %699 : vector<2x8xf32>
    %702 = math.exp %701 : vector<2x8xf32>
    %c7_314 = arith.constant 7 : index
    %c0_315 = arith.constant 0 : index
    %c0_316 = arith.constant 0 : index
    %703 = vector.load %arg2[%c7_314, %c0_315, %c0_316] : memref<8x2x8xf32, #tpu.memory_space<vmem>>, vector<1x2x8xf32>
    %704 = vector.shape_cast %703 : vector<1x2x8xf32> to vector<2x8xf32>
    %705 = arith.mulf %702, %704 : vector<2x8xf32>
    %706 = arith.addf %698, %705 : vector<2x8xf32>
    %707 = tpu.concatenate %706, %643 in 1 : vector<2x8xf32>, vector<2x32xf32> -> vector<2x40xf32>
    %cst_317 = arith.constant dense<0.000000e+00> : vector<2x96xf32>
    %708 = tpu.matmul %707, %3, %cst_317 {dimension_numbers = #tpu.dot_dimension_numbers<[1], [0], [0], [1], [0, 0, 1, 1], [], []>} : vector<2x40xf32>, vector<40x96xf32>, vector<2x96xf32> -> vector<2x96xf32>
    %709 = vector.broadcast %4 : vector<1x96xf32> to vector<2x96xf32>
    %710 = arith.addf %708, %709 : vector<2x96xf32>
    %711 = vector.extract_strided_slice %710 {offsets = [0, 0], sizes = [2, 32], strides = [1, 1]} : vector<2x96xf32> to vector<2x32xf32>
    %712 = arith.negf %711 : vector<2x32xf32>
    %713 = math.exp %712 : vector<2x32xf32>
    %cst_318 = arith.constant 1.000000e+00 : f32
    %714 = vector.broadcast %cst_318 : f32 to vector<2x32xf32>
    %715 = arith.addf %714, %713 : vector<2x32xf32>
    %716 = arith.divf %714, %715 : vector<2x32xf32>
    %717 = vector.extract_strided_slice %710 {offsets = [0, 32], sizes = [2, 32], strides = [1, 1]} : vector<2x96xf32> to vector<2x32xf32>
    %718 = arith.negf %717 : vector<2x32xf32>
    %719 = math.exp %718 : vector<2x32xf32>
    %cst_319 = arith.constant 1.000000e+00 : f32
    %720 = vector.broadcast %cst_319 : f32 to vector<2x32xf32>
    %721 = arith.addf %720, %719 : vector<2x32xf32>
    %722 = arith.divf %720, %721 : vector<2x32xf32>
    %723 = arith.mulf %722, %643 : vector<2x32xf32>
    %cst_320 = arith.constant dense<0.000000e+00> : vector<2x32xf32>
    %724 = tpu.matmul %723, %5, %cst_320 {dimension_numbers = #tpu.dot_dimension_numbers<[1], [0], [0], [1], [0, 0, 1, 1], [], []>} : vector<2x32xf32>, vector<32x32xf32>, vector<2x32xf32> -> vector<2x32xf32>
    %725 = vector.extract_strided_slice %710 {offsets = [0, 64], sizes = [2, 32], strides = [1, 1]} : vector<2x96xf32> to vector<2x32xf32>
    %726 = arith.addf %725, %724 : vector<2x32xf32>
    %727 = math.tanh %726 : vector<2x32xf32>
    %728 = arith.mulf %716, %643 : vector<2x32xf32>
    %cst_321 = arith.constant 1.000000e+00 : f32
    %729 = vector.broadcast %cst_321 : f32 to vector<2x32xf32>
    %730 = arith.subf %729, %716 : vector<2x32xf32>
    %731 = arith.mulf %730, %727 : vector<2x32xf32>
    %732 = arith.addf %728, %731 : vector<2x32xf32>
    %cst_322 = arith.constant -5.000000e+00 : f32
    %cst_323 = arith.constant 5.000000e+00 : f32
    %733 = vector.broadcast %cst_322 : f32 to vector<2x32xf32>
    %734 = arith.maximumf %733, %732 : vector<2x32xf32>
    %735 = vector.broadcast %cst_323 : f32 to vector<2x32xf32>
    %736 = arith.minimumf %735, %734 : vector<2x32xf32>
    %cst_324 = arith.constant dense<0.000000e+00> : vector<2x8xf32>
    %737 = tpu.matmul %736, %8, %cst_324 {dimension_numbers = #tpu.dot_dimension_numbers<[1], [0], [0], [1], [0, 0, 1, 1], [], []>} : vector<2x32xf32>, vector<32x8xf32>, vector<2x8xf32> -> vector<2x8xf32>
    %c7_325 = arith.constant 7 : index
    %c0_326 = arith.constant 0 : index
    %c0_327 = arith.constant 0 : index
    %738 = vector.load %arg15[%c7_325, %c0_326, %c0_327] : memref<8x2x32xf32, #tpu.memory_space<vmem>>, vector<1x2x32xf32>
    %739 = vector.shape_cast %738 : vector<1x2x32xf32> to vector<2x32xf32>
    %740 = vector.shape_cast %736 : vector<2x32xf32> to vector<1x2x32xf32>
    tpu.vector_store %arg15[%c7_325, %c0_326, %c0_327], %740 {strides = array<i32>} : memref<8x2x32xf32, #tpu.memory_space<vmem>>, vector<1x2x32xf32>,
    %c7_328 = arith.constant 7 : index
    %c0_329 = arith.constant 0 : index
    %c0_330 = arith.constant 0 : index
    %741 = vector.load %arg16[%c7_328, %c0_329, %c0_330] : memref<8x2x16xf32, #tpu.memory_space<vmem>>, vector<1x2x16xf32>
    %742 = vector.shape_cast %741 : vector<1x2x16xf32> to vector<2x16xf32>
    %743 = vector.shape_cast %694 : vector<2x16xf32> to vector<1x2x16xf32>
    tpu.vector_store %arg16[%c7_328, %c0_329, %c0_330], %743 {strides = array<i32>} : memref<8x2x16xf32, #tpu.memory_space<vmem>>, vector<1x2x16xf32>,
    %c7_331 = arith.constant 7 : index
    %c0_332 = arith.constant 0 : index
    %c0_333 = arith.constant 0 : index
    %744 = vector.load %arg17[%c7_331, %c0_332, %c0_333] : memref<8x2x8xf32, #tpu.memory_space<vmem>>, vector<1x2x8xf32>
    %745 = vector.shape_cast %744 : vector<1x2x8xf32> to vector<2x8xf32>
    %746 = vector.shape_cast %698 : vector<2x8xf32> to vector<1x2x8xf32>
    tpu.vector_store %arg17[%c7_331, %c0_332, %c0_333], %746 {strides = array<i32>} : memref<8x2x8xf32, #tpu.memory_space<vmem>>, vector<1x2x8xf32>,
    %c7_334 = arith.constant 7 : index
    %c0_335 = arith.constant 0 : index
    %c0_336 = arith.constant 0 : index
    %747 = vector.load %arg18[%c7_334, %c0_335, %c0_336] : memref<8x2x8xf32, #tpu.memory_space<vmem>>, vector<1x2x8xf32>
    %748 = vector.shape_cast %747 : vector<1x2x8xf32> to vector<2x8xf32>
    %749 = vector.shape_cast %702 : vector<2x8xf32> to vector<1x2x8xf32>
    tpu.vector_store %arg18[%c7_334, %c0_335, %c0_336], %749 {strides = array<i32>} : memref<8x2x8xf32, #tpu.memory_space<vmem>>, vector<1x2x8xf32>,
    %c7_337 = arith.constant 7 : index
    %c0_338 = arith.constant 0 : index
    %c0_339 = arith.constant 0 : index
    %750 = vector.load %arg19[%c7_337, %c0_338, %c0_339] : memref<8x2x8xf32, #tpu.memory_space<vmem>>, vector<1x2x8xf32>
    %751 = vector.shape_cast %750 : vector<1x2x8xf32> to vector<2x8xf32>
    %752 = vector.shape_cast %706 : vector<2x8xf32> to vector<1x2x8xf32>
    tpu.vector_store %arg19[%c7_337, %c0_338, %c0_339], %752 {strides = array<i32>} : memref<8x2x8xf32, #tpu.memory_space<vmem>>, vector<1x2x8xf32>,
    %c7_340 = arith.constant 7 : index
    %c0_341 = arith.constant 0 : index
    %c0_342 = arith.constant 0 : index
    %753 = vector.load %arg20[%c7_340, %c0_341, %c0_342] : memref<8x2x8xf32, #tpu.memory_space<vmem>>, vector<1x2x8xf32>
    %754 = vector.shape_cast %753 : vector<1x2x8xf32> to vector<2x8xf32>
    %755 = vector.shape_cast %737 : vector<2x8xf32> to vector<1x2x8xf32>
    tpu.vector_store %arg20[%c7_340, %c0_341, %c0_342], %755 {strides = array<i32>} : memref<8x2x8xf32, #tpu.memory_space<vmem>>, vector<1x2x8xf32>,
    return
  }
  func.func @transform_0(%arg0: i32) -> (i32, i32, i32) {
    %c0_i32 = arith.constant 0 : i32
    %c0_i32_0 = arith.constant 0 : i32
    %c0_i32_1 = arith.constant 0 : i32
    %c0_i32_2 = arith.constant 0 : i32
    return %c0_i32, %c0_i32_0, %c0_i32_1 : i32, i32, i32
  }
  func.func @transform_1(%arg0: i32) -> (i32, i32, i32) {
    %c0_i32 = arith.constant 0 : i32
    %c0_i32_0 = arith.constant 0 : i32
    %c0_i32_1 = arith.constant 0 : i32
    %c0_i32_2 = arith.constant 0 : i32
    return %c0_i32, %c0_i32_0, %c0_i32_1 : i32, i32, i32
  }
  func.func @transform_2(%arg0: i32) -> (i32, i32) {
    %c0_i32 = arith.constant 0 : i32
    %c0_i32_0 = arith.constant 0 : i32
    %c0_i32_1 = arith.constant 0 : i32
    return %c0_i32, %c0_i32_0 : i32, i32
  }
  func.func @transform_3(%arg0: i32) -> (i32, i32) {
    %c0_i32 = arith.constant 0 : i32
    %c0_i32_0 = arith.constant 0 : i32
    %c0_i32_1 = arith.constant 0 : i32
    return %c0_i32, %c0_i32_0 : i32, i32
  }
  func.func @transform_4(%arg0: i32) -> (i32, i32) {
    %c0_i32 = arith.constant 0 : i32
    %c0_i32_0 = arith.constant 0 : i32
    %c0_i32_1 = arith.constant 0 : i32
    return %c0_i32, %c0_i32_0 : i32, i32
  }
  func.func @transform_5(%arg0: i32) -> (i32, i32) {
    %c0_i32 = arith.constant 0 : i32
    %c0_i32_0 = arith.constant 0 : i32
    %c0_i32_1 = arith.constant 0 : i32
    return %c0_i32, %c0_i32_0 : i32, i32
  }
  func.func @transform_6(%arg0: i32) -> (i32, i32) {
    %c0_i32 = arith.constant 0 : i32
    %c0_i32_0 = arith.constant 0 : i32
    %c0_i32_1 = arith.constant 0 : i32
    return %c0_i32, %c0_i32_0 : i32, i32
  }
  func.func @transform_7(%arg0: i32) -> (i32, i32) {
    %c0_i32 = arith.constant 0 : i32
    %c0_i32_0 = arith.constant 0 : i32
    %c0_i32_1 = arith.constant 0 : i32
    return %c0_i32, %c0_i32_0 : i32, i32
  }
  func.func @transform_8(%arg0: i32) -> (i32, i32) {
    %c0_i32 = arith.constant 0 : i32
    %c0_i32_0 = arith.constant 0 : i32
    %c0_i32_1 = arith.constant 0 : i32
    return %c0_i32, %c0_i32_0 : i32, i32
  }
  func.func @transform_9(%arg0: i32) -> (i32, i32) {
    %c0_i32 = arith.constant 0 : i32
    %c0_i32_0 = arith.constant 0 : i32
    %c0_i32_1 = arith.constant 0 : i32
    return %c0_i32, %c0_i32_0 : i32, i32
  }
  func.func @transform_10(%arg0: i32) -> (i32, i32) {
    %c0_i32 = arith.constant 0 : i32
    %c0_i32_0 = arith.constant 0 : i32
    %c0_i32_1 = arith.constant 0 : i32
    return %c0_i32, %c0_i32_0 : i32, i32
  }
  func.func @transform_11(%arg0: i32) -> (i32, i32) {
    %c0_i32 = arith.constant 0 : i32
    %c0_i32_0 = arith.constant 0 : i32
    %c0_i32_1 = arith.constant 0 : i32
    return %c0_i32, %c0_i32_0 : i32, i32
  }
  func.func @transform_12(%arg0: i32) -> (i32, i32) {
    %c0_i32 = arith.constant 0 : i32
    %c0_i32_0 = arith.constant 0 : i32
    %c0_i32_1 = arith.constant 0 : i32
    return %c0_i32, %c0_i32_0 : i32, i32
  }
  func.func @transform_13(%arg0: i32) -> (i32, i32) {
    %c0_i32 = arith.constant 0 : i32
    %c0_i32_0 = arith.constant 0 : i32
    %c0_i32_1 = arith.constant 0 : i32
    return %c0_i32, %c0_i32_0 : i32, i32
  }
  func.func @transform_14(%arg0: i32) -> (i32, i32, i32) {
    %c0_i32 = arith.constant 0 : i32
    %c0_i32_0 = arith.constant 0 : i32
    %c0_i32_1 = arith.constant 0 : i32
    %c0_i32_2 = arith.constant 0 : i32
    return %c0_i32, %c0_i32_0, %c0_i32_1 : i32, i32, i32
  }
  func.func @transform_15(%arg0: i32) -> (i32, i32, i32) {
    %c0_i32 = arith.constant 0 : i32
    %c0_i32_0 = arith.constant 0 : i32
    %c0_i32_1 = arith.constant 0 : i32
    %c0_i32_2 = arith.constant 0 : i32
    return %c0_i32, %c0_i32_0, %c0_i32_1 : i32, i32, i32
  }
  func.func @transform_16(%arg0: i32) -> (i32, i32, i32) {
    %c0_i32 = arith.constant 0 : i32
    %c0_i32_0 = arith.constant 0 : i32
    %c0_i32_1 = arith.constant 0 : i32
    %c0_i32_2 = arith.constant 0 : i32
    return %c0_i32, %c0_i32_0, %c0_i32_1 : i32, i32, i32
  }
  func.func @transform_17(%arg0: i32) -> (i32, i32, i32) {
    %c0_i32 = arith.constant 0 : i32
    %c0_i32_0 = arith.constant 0 : i32
    %c0_i32_1 = arith.constant 0 : i32
    %c0_i32_2 = arith.constant 0 : i32
    return %c0_i32, %c0_i32_0, %c0_i32_1 : i32, i32, i32
  }
  func.func @transform_18(%arg0: i32) -> (i32, i32, i32) {
    %c0_i32 = arith.constant 0 : i32
    %c0_i32_0 = arith.constant 0 : i32
    %c0_i32_1 = arith.constant 0 : i32
    %c0_i32_2 = arith.constant 0 : i32
    return %c0_i32, %c0_i32_0, %c0_i32_1 : i32, i32, i32
  }
  func.func @transform_19(%arg0: i32) -> (i32, i32, i32) {
    %c0_i32 = arith.constant 0 : i32
    %c0_i32_0 = arith.constant 0 : i32
    %c0_i32_1 = arith.constant 0 : i32
    %c0_i32_2 = arith.constant 0 : i32
    return %c0_i32, %c0_i32_0, %c0_i32_1 : i32, i32, i32
  }
}

</mosaic_0001>

<bundles_post_ra>
// kernel: tpu_custom_call.1
= control target key start
LH: loop header
LB: loop body
LE: loop exit
PB: predicated region body
PF: predicated region fallthrough
CT: control target
= control target key end

     0   :  { %s7303_s0 = inlined_call_operand.hbm [shape: f32[8,2,16], index: 0, kind: input, shape index: {}]   ;;  %s7304_s1 = inlined_call_operand.hbm [shape: f32[8,2,8], index: 1, kind: input, shape index: {}]   ;;  %s7305_s2 = inlined_call_operand.hbm [shape: f32[2,32], index: 2, kind: input, shape index: {}]   ;;  %s7306_s3 = inlined_call_operand.hbm [shape: f32[2,16], index: 3, kind: input, shape index: {}]   ;;  %s7307_s4 = inlined_call_operand.hbm [shape: f32[2,8], index: 4, kind: input, shape index: {}]   ;;  %s7308_s5 = inlined_call_operand.vmem [shape: f32[40,48], index: 5, kind: input, shape index: {}]   ;;  %s7309_s6 = inlined_call_operand.vmem [shape: f32[1,48], index: 6, kind: input, shape index: {}]   ;;  %s7310_s7 = inlined_call_operand.hbm [shape: f32[16,16], index: 7, kind: input, shape index: {}]   ;;  %s7311_s8 = inlined_call_operand.hbm [shape: f32[40,96], index: 8, kind: input, shape index: {}]   ;;  %s7312_s9 = inlined_call_operand.hbm [shape: f32[1,96], index: 9, kind: input, shape index: {}]   ;;  %s7313_s10 = inlined_call_operand.vmem [shape: f32[32,32], index: 10, kind: input, shape index: {}]   ;;  %s7314_s11 = inlined_call_operand.hbm [shape: f32[16,16], index: 11, kind: input, shape index: {}]   ;;  %s7315_s12 = inlined_call_operand.vmem [shape: f32[1,16], index: 12, kind: input, shape index: {}]   ;;  %s7316_s13 = inlined_call_operand.vmem [shape: f32[32,8], index: 13, kind: input, shape index: {}]   ;;  %s7317_s14 = inlined_call_operand.hbm [shape: f32[8,2,32], index: 14, kind: output, shape index: {0}]   ;;  %s7318_s15 = inlined_call_operand.hbm [shape: f32[8,2,16], index: 15, kind: output, shape index: {1}]   ;;  %s7319_s16 = inlined_call_operand.hbm [shape: f32[8,2,8], index: 16, kind: output, shape index: {2}]   ;;  %s7320_s17 = inlined_call_operand.hbm [shape: f32[8,2,8], index: 17, kind: output, shape index: {3}]   ;;  %s7321_s18 = inlined_call_operand.hbm [shape: f32[8,2,8], index: 18, kind: output, shape index: {4}]   ;;  %s7322_s19 = inlined_call_operand.hbm [shape: f32[8,2,8], index: 19, kind: output, shape index: {5}]  }
   0x1   :  { %7336 = sst [smem:[#allocation35_spill]] %s7303_s0 }
   0x2   :  { %7337 = sst [smem:[#allocation36_spill]] %s7304_s1 }
   0x3   :  { %7338 = sst [smem:[#allocation37_spill]] %s7305_s2 }
   0x4   :  { %7339 = sst [smem:[#allocation38_spill]] %s7306_s3 }
   0x5   :  { %7340 = sst [smem:[#allocation39_spill]] %s7322_s19 }
   0x6   :  { %25 = vsyncpa [#allocation3], 0 }
   0x7   :  { %26 = vsyncpa [#allocation6], 0 }
   0x8   :  { %27 = vsyncpa [#allocation9], 0 }
   0x9   :  { %28 = vsyncpa [#allocation12], 0 }
   0xa   :  { %29 = vsyncpa [#allocation15], 0 }
   0xb   :  { %30 = vsyncpa [#allocation4], 0 }
   0xc   :  { %31 = vsyncpa [#allocation19], 0 }
   0xd   :  { %32 = vsyncpa [#allocation22], 0 }
   0xe   :  { %33 = vsyncpa [#allocation25], 0  ;;  %s6174_s0 = smov [#allocation5]   ;;  %s6175_s20 = smov [#allocation8]  }
   0xf   :  { %s51_s30 = sshll.u32 %s6174_s0, 4  ;;  %s74_s21 = sshll.u32 %s6175_s20, 4  ;;  %s52_s30 = int_to_ptr.vmem [resolvable:$true] %s51_s30  ;;  %s75_s21 = int_to_ptr.vmem [resolvable:$true] %s74_s21 }
  0x10   :  { %s7341_s2 = sld [smem:[#allocation36_spill]] }
  0x16   :  { %s5826_s23 = scalar_lea.hbm %s7341_s2, 256 }
  0x17   :  { %p5827_p0 = scmp.ne.s32.totalorder %s7341_s2, %s5826_s23  ;;  %p5830_p1 = scmp.lt.u32.totalorder %s5826_s23, %s7341_s2 }
  0x19   :  { %p5832_p2 = pnand %p5830_p1, %p5827_p0 }
  0x1b   :  { %5835 = shalt.err (!%p5832_p2)
}
  0x1c   :  { %s5836_s27 = scalar_lea.vmem %s52_s30, 256  ;;  %p5841_p4 = scmp.lt.s32.totalorder %s52_s30, %s52_s30 }
  0x1d   :  { %p5837_p3 = scmp.ne.s32.totalorder %s52_s30, %s5836_s27  ;;  %p5842_p5 = scmp.lt.s32.totalorder %s5836_s27, %s5836_s27 }
  0x1f   :  { %p5843_p6 = por %p5842_p5, %p5841_p4 }
  0x21   :  { %p5844_p7 = pnand %p5843_p6, %p5837_p3 }
  0x23   :  { %5847 = shalt.err (!%p5844_p7)
}
  0x24   :  { %s7328_s28 = smov 32   ;;  %s7330_s29 = smov 2  }
  0x25   :  { %57 = dma.hbm_to_vmem [thread:$0]  %s7341_s2, 256, %s52_s30, [#allocation6], %s7328_s28, %s7328_s28, %s7330_s29  }
  0x26   :  { %s7342_s23 = sld [smem:[#allocation38_spill]] }
  0x2c   :  { %s5848_s24 = scalar_lea.hbm %s7342_s23, 32 }
  0x2d   :  { %p5849_p8 = scmp.ne.s32.totalorder %s7342_s23, %s5848_s24  ;;  %p5852_p9 = scmp.lt.u32.totalorder %s5848_s24, %s7342_s23 }
  0x2f   :  { %p5854_p10 = pnand %p5852_p9, %p5849_p8 }
  0x31   :  { %5857 = shalt.err (!%p5854_p10)
}
  0x32   :  { %s5858_s19 = scalar_lea.vmem %s75_s21, 32  ;;  %p5863_p12 = scmp.lt.s32.totalorder %s75_s21, %s75_s21 }
  0x33   :  { %p5859_p11 = scmp.ne.s32.totalorder %s75_s21, %s5858_s19  ;;  %p5864_p13 = scmp.lt.s32.totalorder %s5858_s19, %s5858_s19 }
  0x35   :  { %p5865_p0 = por %p5864_p13, %p5863_p12 }
  0x37   :  { %p5866_p1 = pnand %p5865_p0, %p5859_p11 }
  0x39   :  { %5869 = shalt.err (!%p5866_p1)
}
  0x3a   :  { %77 = dma.hbm_to_vmem [thread:$0]  %s7342_s23, 32, %s75_s21, [#allocation9]  }
  0x3b   :  { %s6178_s0 = smov [#allocation11]   ;;  %s5870_s24 = scalar_lea.hbm %s7310_s7, 256 }
  0x3c   :  { %s97_s20 = sshll.u32 %s6178_s0, 4  ;;  %p5871_p2 = scmp.ne.s32.totalorder %s7310_s7, %s5870_s24  ;;  %s98_s20 = int_to_ptr.vmem [resolvable:$true] %s97_s20 }
  0x3d   :  { %p5874_p3 = scmp.lt.u32.totalorder %s5870_s24, %s7310_s7 }
  0x3f   :  { %p5876_p4 = pnand %p5874_p3, %p5871_p2 }
  0x41   :  { %5879 = shalt.err (!%p5876_p4)
}
  0x42   :  { %s5880_s27 = scalar_lea.vmem %s98_s20, 256  ;;  %p5885_p6 = scmp.lt.s32.totalorder %s98_s20, %s98_s20 }
  0x43   :  { %p5881_p5 = scmp.ne.s32.totalorder %s98_s20, %s5880_s27  ;;  %p5886_p7 = scmp.lt.s32.totalorder %s5880_s27, %s5880_s27 }
  0x45   :  { %p5887_p8 = por %p5886_p7, %p5885_p6 }
  0x47   :  { %p5888_p9 = pnand %p5887_p8, %p5881_p5 }
  0x49   :  { %5891 = shalt.err (!%p5888_p9)
}
  0x4a   :  { %s7332_s21 = smov 128   ;;  %s7334_s23 = smov 8  }
  0x4b   :  { %103 = dma.hbm_to_vmem [thread:$0]  %s7310_s7, 256, %s98_s20, [#allocation12], %s7332_s21, %s7332_s21, %s7334_s23  }
  0x4c   :  { %s6181_s0 = smov [#allocation14]   ;;  %s6182_s22 = smov [#allocation2]  }
  0x4d   :  { %s122_s1 = sshll.u32 %s6181_s0, 4  ;;  %s39_s24 = sshll.u32 %s6182_s22, 4  ;;  %s123_s1 = int_to_ptr.vmem [resolvable:$true] %s122_s1  ;;  %s40_s24 = int_to_ptr.vmem [resolvable:$true] %s39_s24 }
  0x4e   :  { %s5892_s26 = scalar_lea.hbm %s7312_s9, 16 }
  0x4f   :  { %p5893_p10 = scmp.ne.s32.totalorder %s7312_s9, %s5892_s26  ;;  %p5896_p11 = scmp.lt.u32.totalorder %s5892_s26, %s7312_s9 }
  0x51   :  { %p5898_p12 = pnand %p5896_p11, %p5893_p10 }
  0x53   :  { %5901 = shalt.err (!%p5898_p12)
}
  0x54   :  { %s5902_s7 = scalar_lea.vmem %s123_s1, 16  ;;  %s5906_s20 = scalar_lea.vmem %s123_s1, 32 }
  0x55   :  { %p5903_p13 = scmp.ne.s32.totalorder %s123_s1, %s5902_s7  ;;  %p5907_p0 = scmp.lt.s32.totalorder %s123_s1, %s123_s1 }
  0x56   :  { %p5908_p1 = scmp.lt.s32.totalorder %s5906_s20, %s5902_s7 }
  0x58   :  { %p5909_p2 = por %p5908_p1, %p5907_p0 }
  0x5a   :  { %p5910_p3 = pnand %p5909_p2, %p5903_p13 }
  0x5c   :  { %5913 = shalt.err (!%p5910_p3)
}
  0x5d   :  { %125 = dma.hbm_to_vmem [thread:$0]  %s7312_s9, 16, %s123_s1, [#allocation15]  }
  0x5e   :  { %s7343_s25 = sld [smem:[#allocation35_spill]] }
  0x64   :  { %s5914_s28 = scalar_lea.hbm %s7343_s25, 256 }
  0x65   :  { %p5915_p4 = scmp.ne.s32.totalorder %s7343_s25, %s5914_s28  ;;  %p5918_p5 = scmp.lt.u32.totalorder %s5914_s28, %s7343_s25 }
  0x67   :  { %p5920_p6 = pnand %p5918_p5, %p5915_p4 }
  0x69   :  { %5923 = shalt.err (!%p5920_p6)
}
  0x6a   :  { %s5924_s27 = scalar_lea.vmem %s40_s24, 256  ;;  %p5929_p8 = scmp.lt.s32.totalorder %s40_s24, %s40_s24 }
  0x6b   :  { %p5925_p7 = scmp.ne.s32.totalorder %s40_s24, %s5924_s27  ;;  %p5930_p9 = scmp.lt.s32.totalorder %s5924_s27, %s5924_s27 }
  0x6d   :  { %p5931_p10 = por %p5930_p9, %p5929_p8 }
  0x6f   :  { %p5932_p11 = pnand %p5931_p10, %p5925_p7 }
  0x71   :  { %5935 = shalt.err (!%p5932_p11)
}
  0x72   :  { %s7344_s9 = smov 2   ;;  %s7345_s1 = smov 32  }
  0x73   :  { %45 = dma.hbm_to_vmem [thread:$0]  %s7343_s25, 256, %s40_s24, [#allocation3], %s7345_s1, %s7345_s1, %s7344_s9  }
  0x74   :  { %s6183_s30 = smov [#allocation7]   ;;  %s6184_s0 = smov [#allocation10]  }
  0x75   :  { %s64_s2 = sshll.u32 %s6183_s30, 4  ;;  %s84_s22 = sshll.u32 %s6184_s0, 4  ;;  %s65_s2 = int_to_ptr.vmem [resolvable:$true] %s64_s2  ;;  %s85_s22 = int_to_ptr.vmem [resolvable:$true] %s84_s22 }
  0x76   :  { %s7346_s3 = sld [smem:[#allocation37_spill]] }
  0x7c   :  { %s5936_s26 = scalar_lea.hbm %s7346_s3, 32 }
  0x7d   :  { %p5937_p12 = scmp.ne.s32.totalorder %s7346_s3, %s5936_s26  ;;  %p5940_p13 = scmp.lt.u32.totalorder %s5936_s26, %s7346_s3 }
  0x7f   :  { %p5942_p0 = pnand %p5940_p13, %p5937_p12 }
  0x81   :  { %5945 = shalt.err (!%p5942_p0)
}
  0x82   :  { %s5946_s24 = scalar_lea.vmem %s65_s2, 32  ;;  %p5951_p2 = scmp.lt.s32.totalorder %s65_s2, %s65_s2 }
  0x83   :  { %p5947_p1 = scmp.ne.s32.totalorder %s65_s2, %s5946_s24  ;;  %p5952_p3 = scmp.lt.s32.totalorder %s5946_s24, %s5946_s24 }
  0x85   :  { %p5953_p4 = por %p5952_p3, %p5951_p2 }
  0x87   :  { %p5954_p5 = pnand %p5953_p4, %p5947_p1 }
  0x89   :  { %5957 = shalt.err (!%p5954_p5)
}
  0x8a   :  { %67 = dma.hbm_to_vmem [thread:$0]  %s7346_s3, 32, %s65_s2, [#allocation6]  }
  0x8b   :  { %s5958_s0 = scalar_lea.hbm %s7307_s4, 32 }
  0x8c   :  { %p5959_p6 = scmp.ne.s32.totalorder %s7307_s4, %s5958_s0  ;;  %p5962_p7 = scmp.lt.u32.totalorder %s5958_s0, %s7307_s4 }
  0x8e   :  { %p5964_p8 = pnand %p5962_p7, %p5959_p6 }
  0x90   :  { %5967 = shalt.err (!%p5964_p8)
}
  0x91   :  { %s5968_s26 = scalar_lea.vmem %s85_s22, 32  ;;  %p5973_p10 = scmp.lt.s32.totalorder %s85_s22, %s85_s22 }
  0x92   :  { %p5969_p9 = scmp.ne.s32.totalorder %s85_s22, %s5968_s26  ;;  %p5974_p11 = scmp.lt.s32.totalorder %s5968_s26, %s5968_s26 }
  0x94   :  { %p5975_p12 = por %p5974_p11, %p5973_p10 }
  0x96   :  { %p5976_p13 = pnand %p5975_p12, %p5969_p9 }
  0x98   :  { %5979 = shalt.err (!%p5976_p13)
}
  0x99   :  { %87 = dma.hbm_to_vmem [thread:$0]  %s7307_s4, 32, %s85_s22, [#allocation9]  }
  0x9a   :  { %s6185_s19 = smov [#allocation13]   ;;  %s6186_s24 = smov [#allocation16]  }
  0x9b   :  { %s109_s27 = sshll.u32 %s6185_s19, 4  ;;  %s133_s25 = sshll.u32 %s6186_s24, 4  ;;  %s110_s27 = int_to_ptr.vmem [resolvable:$true] %s109_s27  ;;  %s134_s25 = int_to_ptr.vmem [resolvable:$true] %s133_s25 }
  0x9c   :  { %s5980_s30 = scalar_lea.hbm %s7311_s8, 640 }
  0x9d   :  { %p5981_p0 = scmp.ne.s32.totalorder %s7311_s8, %s5980_s30  ;;  %p5984_p1 = scmp.lt.u32.totalorder %s5980_s30, %s7311_s8 }
  0x9f   :  { %p5986_p2 = pnand %p5984_p1, %p5981_p0 }
  0xa1   :  { %5989 = shalt.err (!%p5986_p2)
}
  0xa2   :  { %s5990_s4 = scalar_lea.vmem %s110_s27, 640  ;;  %p5995_p4 = scmp.lt.s32.totalorder %s110_s27, %s110_s27 }
  0xa3   :  { %p5991_p3 = scmp.ne.s32.totalorder %s110_s27, %s5990_s4  ;;  %p5996_p5 = scmp.lt.s32.totalorder %s5990_s4, %s5990_s4 }
  0xa5   :  { %p5997_p6 = por %p5996_p5, %p5995_p4 }
  0xa7   :  { %p5998_p7 = pnand %p5997_p6, %p5991_p3 }
  0xa9   :  { %6001 = shalt.err (!%p5998_p7)
}
  0xaa   :  { %s7347_s22 = smov 8   ;;  %s7348_s29 = smov 128  }
  0xab   :  { %115 = dma.hbm_to_vmem [thread:$0]  %s7311_s8, 640, %s110_s27, [#allocation12], %s7348_s29, %s7348_s29, %s7347_s22  }
  0xac   :  { %s6002_s24 = scalar_lea.hbm %s7314_s11, 256 }
  0xad   :  { %p6003_p8 = scmp.ne.s32.totalorder %s7314_s11, %s6002_s24  ;;  %p6006_p9 = scmp.lt.u32.totalorder %s6002_s24, %s7314_s11 }
  0xaf   :  { %p6008_p10 = pnand %p6006_p9, %p6003_p8 }
  0xb1   :  { %6011 = shalt.err (!%p6008_p10)
}
  0xb2   :  { %s6012_s21 = scalar_lea.vmem %s134_s25, 256  ;;  %p6017_p12 = scmp.lt.s32.totalorder %s134_s25, %s134_s25 }
  0xb3   :  { %p6013_p11 = scmp.ne.s32.totalorder %s134_s25, %s6012_s21  ;;  %p6018_p13 = scmp.lt.s32.totalorder %s6012_s21, %s6012_s21 }
  0xb5   :  { %p6019_p0 = por %p6018_p13, %p6017_p12 }
  0xb7   :  { %p6020_p1 = pnand %p6019_p0, %p6013_p11 }
  0xb9   :  { %6023 = shalt.err (!%p6020_p1)
}
  0xba   :  { %139 = dma.hbm_to_vmem [thread:$0]  %s7314_s11, 256, %s134_s25, [#allocation15], %s7348_s29, %s7348_s29, %s7347_s22  }
  0xbb   :  { %6156 = dma.done.wait [#allocation3], 256  }
  0xbc   :  { %6157 = vsyncadd [#allocation3], 4294967040 }
  0xbd   :  { %6158 = dma.done.wait [#allocation6], 288  }
  0xbe   :  { %6159 = vsyncadd [#allocation6], 4294967008 }
  0xbf   :  { %6160 = dma.done.wait [#allocation9], 64  }
  0xc0   :  { %6161 = vsyncadd [#allocation9], 4294967232 }
  0xc1   :  { %6162 = dma.done.wait [#allocation12], 896  }
  0xc2   :  { %6163 = vsyncadd [#allocation12], 4294966400 }
  0xc3   :  { %6164 = dma.done.wait [#allocation15], 272  }
  0xc4   :  { %6165 = vsyncadd [#allocation15], 4294967024  ;;  %v6187_v0 = vmov 0.0|0.0   ;;  %vm6188_vm0 = vmmov 0   ;;  %v6189_v1 = vmov 0.0   ;;  %v171_v4 = vld [vmem:[%s7308_s5] sm:$0xff] }
  0xc5   :  { %5441 = vmatprep.subr.bf16.mxu0 %v6187_v0  ;;  %5447 = vmatprep.subr.bf16.mxu1 %v6187_v0  ;;  %v198_v2 = vld [vmem:[#allocation10] sm:$0x3]  ;;  %v6431_v3 = vld [vmem:[#allocation8] sm:$0x3]  ;;  %s6190_s23 = smov 16   ;;  %v172_v5 = vld [vmem:[%s7308_s5 + $0x8] sm:$0xff] }
  0xc6   :  { %4955 = vmatprep.mubr.msk.f32.mxu0 %vm6188_vm0, %v6189_v1  ;;  %4962 = vmatprep.mubr.msk.f32.mxu1 %vm6188_vm0, %v6189_v1  ;;  %v173_v6 = vld [vmem:[%s7308_s5 + $0x10] sm:$0xff]  ;;  %v6445_v7 = vpack.c.bf16 %v172_v5, %v171_v4  ;;  %v174_v8 = vld [vmem:[%s7308_s5 + $0x18] sm:$0xff]  ;;  %s6191_s19 = smov 24   ;;  %v6461_v10 = vld [vmem:[%s7308_s5 + $0x20] sm:$0xff]  ;;  %vm208_vm1 = vcmask 130048   ;;  %vm210_vm2 = vcmask 195584  }
  0xc7   :  { %201 = vrot.lane.b32.xlu0 %v198_v2, %s6190_s23  ;;  %298 = vrot.lane.b32.xlu1 %v6431_v3, %s6190_s23  ;;  %v6451_v9 = vpack.c.bf16 %v174_v8, %v173_v6  ;;  %v199_v12 = vld [vmem:[#allocation2] sm:$0x3]  ;;  %vm218_vm3 = vcmask 326656   ;;  %v177_v16 = vld [vmem:[#allocation11] sm:$0xff]  ;;  %v178_v17 = vld [vmem:[#allocation11 + $0x8] sm:$0xff]  ;;  %s6192_s0 = smov 112  }
  0xc8   :  { %5443 = vmatpush3.bf16.msra.mxu0 %v6445_v7  ;;  %v6470_v18 = vpack.c.bf16 %v178_v17, %v177_v16  ;;  %v6477_v19 = vld [vmem:[%s7309_s6] ss:$0 sm:$0xff]  ;;  %v190_v35 = vld [vmem:[#allocation16 + $0x8] sm:$0xff]  ;;  %v475_v37 = vld [vmem:[#allocation5] sm:$0x3]  ;;  %s6193_s21 = smov 96  }
  0xc9   :  { %5444 = vmatprep.subr.bf16.mxu0 %v6187_v0  ;;  %v189_v34 = vld [vmem:[#allocation16] sm:$0xff]  ;;  %vm748_vm4 = vcmask 123904   ;;  %v179_v46 = vld [vmem:[#allocation13] sm:$0xff]  ;;  %v182_v50 = vld [vmem:[#allocation13 + $0x18] sm:$0xff]  ;;  %vm750_vm5 = vcmask 58368   ;;  %s6194_s11 = smov 120  }
  0xca   :  { %5449 = vmatpush3.bf16.msra.mxu1 %v6470_v18  ;;  %v6485_v36 = vpack.c.bf16 %v190_v35, %v189_v34  ;;  %v6500_v45 = vld [vmem:[#allocation7] sm:$0x3]  ;;  %v181_v49 = vld [vmem:[#allocation13 + $0x10] sm:$0xff]  ;;  %v6519_v58 = vld [vmem:[#allocation13 + $0x20] sm:$0xff]  ;;  %vm490_vm6 = vcmask 64512   ;;  %vm584_vm7 = vcmask 261120  }
  0xcb   :  { %205 = vrot.lane.b32.xlu0 %v6431_v3, %s6191_s19  ;;  %5450 = vmatprep.subr.bf16.mxu1 %v6187_v0  ;;  %v180_v47 = vld [vmem:[#allocation13 + $0x8] sm:$0xff]  ;;  %v6507_v51 = vpack.c.bf16 %v182_v50, %v181_v49  ;;  %v186_v5 = vld [vmem:[%s7313_s10 + $0x8] sm:$0xff]  ;;  %v187_v6 = vld [vmem:[%s7313_s10 + $0x10] sm:$0xff]  ;;  %vm746_vm8 = vcmask 254976  }
  0xcc   :  { %5446 = vmatpush3.bf16.msra.mxu0 %v6451_v9  ;;  %v6504_v48 = vpack.c.bf16 %v180_v47, %v179_v46  ;;  %v6515_v52 = vld [vmem:[%s7315_s12] ss:$0 sm:$0xff]  ;;  %v195_v34 = vld [vmem:[%s7316_s13 + $0x18] sm:$0xff]  ;;  %v760_v47 = vld [vmem:[#allocation2 + $0x2] sm:$0x3] }
  0xcd   :  { %4953 = vmatprep.subr.mxu0 %v6189_v1  ;;  %v185_v4 = vld [vmem:[%s7313_s10] sm:$0xff] }
  0xce   :  { %v6549_v8 = vpack.c.bf16 %v186_v5, %v185_v4 }
  0xd0   :  { %4954 = vmatpush3.msra.mxu0 %v6461_v10 }
  0xd1   :  { %5459 = vmatprep.subr.bf16.mxu0 %v6187_v0 }
 0x139   :  { %v202_v11 = vpop.permute.xlu0 %201  ;;  %v299_v26 = vpop.permute.xlu1 %298 }
 0x13a   :  { %v209_v13 = vsel %vm208_vm1, %v199_v12, %v202_v11  ;;  %v188_v11 = vld [vmem:[%s7313_s10 + $0x18] sm:$0xff]  ;;  %s6195_s10 = smov 64  }
 0x13b   :  { %v6555_v12 = vpack.c.bf16 %v188_v11, %v187_v6  ;;  %v1021_v11 = vld [vmem:[#allocation5 + $0x2] sm:$0x3] }
 0x13d   :  { %v206_v14 = vpop.permute.xlu0 %205 }
 0x13e   :  { %v211_v15 = vsel %vm210_vm2, %v209_v13, %v206_v14  ;;  %v6560_v13 = vld [vmem:[#allocation14] ss:$0 sm:$0xff] }
 0x13f   :  { %4956 = vmatmul.mubr.msk.f32.vlgmr.msra.gmra.mrb[0].mxu0 %vm218_vm3, %v211_v15 }
 0x140   :  { %4993 = vmatprep.mubr.msk.f32.mxu0 %vm6188_vm0, %v6189_v1  ;;  %5461 = vmatpush3.bf16.msra.mxu0 %v6549_v8 }
 0x141   :  { %5462 = vmatprep.subr.bf16.mxu0 %v6187_v0 }
 0x144   :  { %5464 = vmatpush3.bf16.msra.mxu0 %v6555_v12 }
 0x145   :  { %5465 = vmatprep.subr.bf16.mxu0 %v6187_v0 }
 0x212   :  { %v288_v20 = vpop.f32.mrb[0].mxu0 }
 0x213   :  { %v289_v21 = vadd.f32 %v6477_v19, %v288_v20  ;;  %v4957_v22 = vpop.f32.mrb[1].mxu0 }
 0x215   :  { %v4640_v23 = vmul.f32 -1.442695, %v289_v21 }
 0x217   :  { %5709 = vpow2.f32 %v4640_v23 }
 0x221   :  { %v5710_v24 = vpop.eup %5709 }
 0x222   :  { %v295_v25 = vadd.f32 1.0, %v5710_v24 }
 0x224   :  { %5711 = vrcp.f32 %v295_v25 }
 0x22e   :  { %v5712_v27 = vpop.eup %5711 }
 0x22f   :  { %v301_v28 = vmul.f32 %v5712_v27, %v299_v26  ;;  %v384_v39 = vsub.f32 1.0, %v5712_v27  ;;  %v383_v41 = vmul.f32 %v5712_v27, %v6431_v3 }
 0x231   :  { %303 = vrot.lane.b32.xlu1 %v301_v28, %s6192_s0  ;;  %v192_v28 = vld [vmem:[%s7316_s13] sm:$0xff] }
 0x2a3   :  { %v304_v29 = vpop.permute.xlu1 %303 }
 0x2a4   :  { %4963 = vmatmul.mubr.msk.f32.vlgmr.msra.gmra.mrb[0].mxu1 %vm208_vm1, %v304_v29  ;;  %v193_v29 = vld [vmem:[%s7316_s13 + $0x8] sm:$0xff] }
 0x2a5   :  { %4969 = vmatprep.mubr.msk.f32.mxu1 %vm6188_vm0, %v6189_v1  ;;  %5452 = vmatpush3.bf16.msra.mxu1 %v6485_v36 }
 0x2a6   :  { %5453 = vmatprep.subr.bf16.mxu1 %v6187_v0 }
 0x377   :  { %v373_v30 = vpop.f32.mrb[0].mxu1 }
 0x378   :  { %378 = vrot.lane.b32.xlu0 %v373_v30, %s7345_s1  ;;  %v4964_v31 = vpop.f32.mrb[1].mxu1  ;;  %v6574_v30 = vpack.c.bf16 %v193_v29, %v192_v28 }
 0x37c   :  { %477 = vrot.lane.b32.xlu0 %v475_v37, %s7347_s22 }
 0x380   :  { %487 = vrot.lane.b32.xlu0 %v6500_v45, %s7347_s22 }
 0x3ea   :  { %v379_v32 = vpop.permute.xlu0 %378 }
 0x3eb   :  { %v381_v33 = vadd.f32 %v379_v32, %v289_v21 }
 0x3ed   :  { %5713 = vtanh.f32 %v381_v33  ;;  %v194_v33 = vld [vmem:[%s7316_s13 + $0x10] sm:$0xff] }
 0x3ee   :  { %v478_v59 = vpop.permute.xlu0 %477  ;;  %v6584_v35 = vpack.c.bf16 %v195_v34, %v194_v33 }
 0x3f2   :  { %v488_v63 = vpop.permute.xlu0 %487 }
 0x3f7   :  { %v5714_v38 = vpop.eup %5713 }
 0x3f8   :  { %386 = vrot.lane.b32.xlu1 %v5714_v38, %s6193_s21 }
 0x46a   :  { %v387_v40 = vpop.permute.xlu1 %386 }
 0x46b   :  { %v389_v42 = vmul.f32 %v387_v40, %v384_v39 }
 0x46d   :  { %v390_v43 = vadd.f32 %v389_v42, %v383_v41 }
 0x46f   :  { %v6492_v44 = vclamps-f32 %v390_v43, 5.0 }
 0x471   :  { %749 = vst.msk [vmem:[#allocation18] sm:$0x3] %vm748_vm4, %v6492_v44  ;;  %4970 = vmatmul.mubr.msk.f32.vlgmr.msra.gmra.mrb[2].mxu1 %vm208_vm1, %v6492_v44 }
 0x472   :  { %4982 = vmatprep.mubr.msk.f32.mxu1 %vm6188_vm0, %v6189_v1  ;;  %5455 = vmatpush3.bf16.msra.mxu1 %v6504_v48 }
 0x473   :  { %5456 = vmatprep.subr.bf16.mxu1 %v6187_v0 }
 0x476   :  { %5458 = vmatpush3.bf16.msra.mxu1 %v6507_v51 }
 0x477   :  { %4980 = vmatprep.subr.mxu1 %v6189_v1 }
 0x47a   :  { %4981 = vmatpush3.msra.mxu1 %v6519_v58 }
 0x47b   :  { %5471 = vmatprep.subr.bf16.mxu1 %v6187_v0 }
 0x544   :  { %v468_v53 = vpop.f32.mrb[2].mxu1 }
 0x545   :  { %v469_v54 = vadd.f32 %v6515_v52, %v468_v53  ;;  %v4971_v55 = vpop.f32.mrb[3].mxu1 }
 0x547   :  { %v472_v56 = vmul.f32 0.5, %v469_v54  ;;  %751 = vst.msk [vmem:[#allocation20] sm:$0x3] %vm750_vm5, %v469_v54 }
 0x549   :  { %v473_v57 = vmul.f32 1.442695, %v472_v56 }
 0x54b   :  { %5715 = vpow2.f32 %v473_v57 }
 0x555   :  { %v6523_v60 = vpop.eup %5715 }
 0x556   :  { %v480_v61 = vmul.f32 %v6523_v60, %v478_v59 }
 0x558   :  { %482 = vrot.lane.b32.xlu1 %v480_v61, %s6194_s11 }
 0x55c   :  { %577 = vrot.lane.b32.xlu1 %v6500_v45, %s7345_s1 }
 0x5ca   :  { %v483_v62 = vpop.permute.xlu1 %482 }
 0x5cb   :  { %v485_v2 = vadd.f32 %v483_v62, %v469_v54 }
 0x5cd   :  { %757 = vst.msk [vmem:[#allocation23] sm:$0x3] %vm750_vm5, %v485_v2  ;;  %v491_v3 = vsel %vm490_vm6, %v485_v2, %v488_v63 }
 0x5ce   :  { %4983 = vmatmul.mubr.msk.f32.vlgmr.msra.gmra.mrb[4].mxu1 %vm218_vm3, %v491_v3  ;;  %v578_v22 = vpop.permute.xlu1 %577 }
 0x5cf   :  { %5473 = vmatpush3.bf16.msra.mxu1 %v6445_v7  ;;  %5017 = vmatprep.mubr.msk.f32.mxu1 %vm6188_vm0, %v6189_v1 }
 0x5d0   :  { %5474 = vmatprep.subr.bf16.mxu1 %v6187_v0 }
 0x5d3   :  { %5476 = vmatpush3.bf16.msra.mxu1 %v6451_v9 }
 0x5d4   :  { %5015 = vmatprep.subr.mxu1 %v6189_v1 }
 0x5d7   :  { %5016 = vmatpush3.msra.mxu1 %v6461_v10 }
 0x5d8   :  { %5477 = vmatprep.subr.bf16.mxu1 %v6187_v0 }
 0x6a1   :  { %v567_v14 = vpop.f32.mrb[4].mxu1 }
 0x6a2   :  { %v568_v15 = vadd.f32 %v6560_v13, %v567_v14  ;;  %v4984_v16 = vpop.f32.mrb[5].mxu1 }
 0x6a4   :  { %v4647_v17 = vmul.f32 -1.442695, %v568_v15 }
 0x6a6   :  { %5717 = vpow2.f32 %v4647_v17 }
 0x6b0   :  { %v5718_v20 = vpop.eup %5717 }
 0x6b1   :  { %v574_v21 = vadd.f32 1.0, %v5718_v20 }
 0x6b3   :  { %5719 = vrcp.f32 %v574_v21 }
 0x6bd   :  { %v5720_v23 = vpop.eup %5719 }
 0x6be   :  { %v580_v24 = vmul.f32 %v5720_v23, %v578_v22  ;;  %v664_v38 = vsub.f32 1.0, %v5720_v23  ;;  %v663_v40 = vmul.f32 %v5720_v23, %v6500_v45 }
 0x6c0   :  { %582 = vrot.lane.b32.xlu0 %v580_v24, %s6193_s21 }
 0x732   :  { %v583_v25 = vpop.permute.xlu0 %582 }
 0x733   :  { %4994 = vmatmul.mubr.msk.f32.vlgmr.msra.gmra.mrb[2].mxu0 %vm584_vm7, %v583_v25 }
 0x734   :  { %5004 = vmatprep.mubr.msk.f32.mxu0 %vm6188_vm0, %v6189_v1  ;;  %5467 = vmatpush3.bf16.msra.mxu0 %v6574_v30 }
 0x735   :  { %5468 = vmatprep.subr.bf16.mxu0 %v6187_v0 }
 0x738   :  { %5470 = vmatpush3.bf16.msra.mxu0 %v6584_v35 }
 0x739   :  { %5483 = vmatprep.subr.bf16.mxu0 %v6187_v0 }
 0x806   :  { %v653_v26 = vpop.f32.mrb[2].mxu0 }
 0x807   :  { %658 = vrot.lane.b32.xlu1 %v653_v26, %s6195_s10  ;;  %v4995_v27 = vpop.f32.mrb[3].mxu0 }
 0x879   :  { %v659_v31 = vpop.permute.xlu1 %658 }
 0x87a   :  { %v661_v32 = vadd.f32 %v659_v31, %v568_v15 }
 0x87c   :  { %5721 = vtanh.f32 %v661_v32 }
 0x886   :  { %v5722_v37 = vpop.eup %5721 }
 0x887   :  { %666 = vrot.lane.b32.xlu0 %v5722_v37, %s6195_s10 }
 0x88b   :  { %765 = vrot.lane.b32.xlu0 %v6492_v44, %s6191_s19 }
 0x8f9   :  { %v667_v39 = vpop.permute.xlu0 %666 }
 0x8fa   :  { %v669_v41 = vmul.f32 %v667_v39, %v664_v38 }
 0x8fc   :  { %v670_v42 = vadd.f32 %v669_v41, %v663_v40 }
 0x8fd   :  { %v766_v50 = vpop.permute.xlu0 %765 }
 0x8fe   :  { %v6592_v43 = vclamps-f32 %v670_v42, 5.0 }
 0x900   :  { %747 = vst.msk [vmem:[#allocation17] sm:$0x3] %vm746_vm8, %v6592_v43  ;;  %5005 = vmatmul.mubr.msk.f32.vlgmr.msra.gmra.mrb[4].mxu0 %vm584_vm7, %v6592_v43 }
 0x901   :  { %5485 = vmatpush3.bf16.msra.mxu0 %v6504_v48  ;;  %5044 = vmatprep.mubr.msk.f32.mxu0 %vm6188_vm0, %v6189_v1 }
 0x902   :  { %5486 = vmatprep.subr.bf16.mxu0 %v6187_v0 }
 0x905   :  { %5488 = vmatpush3.bf16.msra.mxu0 %v6507_v51 }
 0x906   :  { %5042 = vmatprep.subr.mxu0 %v6189_v1 }
 0x909   :  { %5043 = vmatpush3.msra.mxu0 %v6519_v58 }
 0x90a   :  { %5495 = vmatprep.subr.bf16.mxu0 %v6187_v0 }
 0x9d3   :  { %v742_v45 = vpop.f32.mrb[4].mxu0 }
 0x9d4   :  { %758 = vst.msk [vmem:[#allocation24] sm:$0x3] %vm750_vm5, %v742_v45  ;;  %762 = vrot.lane.b32.xlu1 %v742_v45, %s6190_s23  ;;  %v5006_v46 = vpop.f32.mrb[5].mxu0 }
 0x9d8   :  { %849 = vrot.lane.b32.xlu1 %v6492_v44, %s6190_s23 }
 0xa46   :  { %v763_v49 = vpop.permute.xlu1 %762 }
 0xa47   :  { %v768_v53 = vsel %vm208_vm1, %v760_v47, %v763_v49 }
 0xa48   :  { %v769_v54 = vsel %vm210_vm2, %v768_v53, %v766_v50 }
 0xa49   :  { %5018 = vmatmul.mubr.msk.f32.vlgmr.msra.gmra.mrb[6].mxu1 %vm218_vm3, %v769_v54 }
 0xa4a   :  { %5479 = vmatpush3.bf16.msra.mxu1 %v6470_v18  ;;  %5024 = vmatprep.mubr.msk.f32.mxu1 %vm6188_vm0, %v6189_v1  ;;  %v850_v2 = vpop.permute.xlu1 %849 }
 0xa4b   :  { %5480 = vmatprep.subr.bf16.mxu1 %v6187_v0 }
 0xb1c   :  { %v839_v55 = vpop.f32.mrb[6].mxu1 }
 0xb1d   :  { %v840_v56 = vadd.f32 %v6477_v19, %v839_v55  ;;  %v5019_v57 = vpop.f32.mrb[7].mxu1 }
 0xb1f   :  { %v4652_v59 = vmul.f32 -1.442695, %v840_v56 }
 0xb21   :  { %5723 = vpow2.f32 %v4652_v59 }
 0xb2b   :  { %v5724_v61 = vpop.eup %5723 }
 0xb2c   :  { %v846_v62 = vadd.f32 1.0, %v5724_v61 }
 0xb2e   :  { %5725 = vrcp.f32 %v846_v62 }
 0xb38   :  { %v5726_v63 = vpop.eup %5725 }
 0xb39   :  { %v852_v3 = vmul.f32 %v5726_v63, %v850_v2  ;;  %v935_v17 = vsub.f32 1.0, %v5726_v63  ;;  %v934_v21 = vmul.f32 %v5726_v63, %v6492_v44 }
 0xb3b   :  { %854 = vrot.lane.b32.xlu0 %v852_v3, %s6192_s0 }
 0xbad   :  { %v855_v4 = vpop.permute.xlu0 %854 }
 0xbae   :  { %5025 = vmatmul.mubr.msk.f32.vlgmr.msra.gmra.mrb[8].mxu1 %vm208_vm1, %v855_v4 }
 0xbaf   :  { %5482 = vmatpush3.bf16.msra.mxu1 %v6485_v36  ;;  %5031 = vmatprep.mubr.msk.f32.mxu1 %vm6188_vm0, %v6189_v1 }
 0xbb0   :  { %5489 = vmatprep.subr.bf16.mxu1 %v6187_v0 }
 0xc81   :  { %v924_v5 = vpop.f32.mrb[8].mxu1 }
 0xc82   :  { %929 = vrot.lane.b32.xlu1 %v924_v5, %s7345_s1  ;;  %v5026_v6 = vpop.f32.mrb[9].mxu1 }
 0xc83   :  { %v1300_v6 = vld [vmem:[#allocation2 + $0x4] sm:$0x3] }
 0xc86   :  { %1023 = vrot.lane.b32.xlu1 %v1021_v11, %s7347_s22 }
 0xc8a   :  { %1032 = vrot.lane.b32.xlu1 %v6592_v43, %s7347_s22 }
 0xcf4   :  { %v930_v14 = vpop.permute.xlu1 %929 }
 0xcf5   :  { %v932_v15 = vadd.f32 %v930_v14, %v840_v56 }
 0xcf7   :  { %5727 = vtanh.f32 %v932_v15 }
 0xcf8   :  { %v1024_v31 = vpop.permute.xlu1 %1023 }
 0xcfc   :  { %v1033_v37 = vpop.permute.xlu1 %1032 }
 0xd01   :  { %v5728_v16 = vpop.eup %5727 }
 0xd02   :  { %937 = vrot.lane.b32.xlu0 %v5728_v16, %s6193_s21 }
 0xd74   :  { %v938_v20 = vpop.permute.xlu0 %937 }
 0xd75   :  { %v940_v22 = vmul.f32 %v938_v20, %v935_v17 }
 0xd77   :  { %v941_v23 = vadd.f32 %v940_v22, %v934_v21 }
 0xd79   :  { %v6630_v24 = vclamps-f32 %v941_v23, 5.0 }
 0xd7b   :  { %1286 = vst.msk [vmem:[#allocation18 + $0x2] sm:$0x3] %vm748_vm4, %v6630_v24  ;;  %5032 = vmatmul.mubr.msk.f32.vlgmr.msra.gmra.mrb[10].mxu1 %vm208_vm1, %v6630_v24 }
 0xd7c   :  { %5491 = vmatpush3.bf16.msra.mxu1 %v6549_v8  ;;  %5055 = vmatprep.mubr.msk.f32.mxu1 %vm6188_vm0, %v6189_v1 }
 0xd7d   :  { %5492 = vmatprep.subr.bf16.mxu1 %v6187_v0 }
 0xd80   :  { %5494 = vmatpush3.bf16.msra.mxu1 %v6555_v12 }
 0xd81   :  { %5501 = vmatprep.subr.bf16.mxu1 %v6187_v0 }
 0xe4e   :  { %v1013_v44 = vpop.f32.mrb[10].mxu1 }
 0xe4f   :  { %v1014_v25 = vadd.f32 %v6515_v52, %v1013_v44  ;;  %v5033_v26 = vpop.f32.mrb[11].mxu1 }
 0xe51   :  { %v1017_v27 = vmul.f32 0.5, %v1014_v25  ;;  %1288 = vst.msk [vmem:[#allocation20 + $0x2] sm:$0x3] %vm750_vm5, %v1014_v25 }
 0xe53   :  { %v1018_v28 = vmul.f32 1.442695, %v1017_v27 }
 0xe55   :  { %5729 = vpow2.f32 %v1018_v28 }
 0xe5f   :  { %v6644_v29 = vpop.eup %5729 }
 0xe60   :  { %v1026_v32 = vmul.f32 %v6644_v29, %v1024_v31 }
 0xe62   :  { %1028 = vrot.lane.b32.xlu0 %v1026_v32, %s6194_s11 }
 0xe66   :  { %1115 = vrot.lane.b32.xlu0 %v6592_v43, %s7345_s1 }
 0xed4   :  { %v1029_v33 = vpop.permute.xlu0 %1028 }
 0xed5   :  { %v1031_v34 = vadd.f32 %v1029_v33, %v1014_v25  ;;  %v1561_v33 = vld [vmem:[#allocation5 + $0x4] sm:$0x3] }
 0xed7   :  { %v1035_v38 = vsel %vm490_vm6, %v1031_v34, %v1033_v37  ;;  %1296 = vst.msk [vmem:[#allocation23 + $0x2] sm:$0x3] %vm750_vm5, %v1031_v34 }
 0xed8   :  { %5045 = vmatmul.mubr.msk.f32.vlgmr.msra.gmra.mrb[6].mxu0 %vm218_vm3, %v1035_v38  ;;  %v1116_v49 = vpop.permute.xlu0 %1115 }
 0xed9   :  { %5497 = vmatpush3.bf16.msra.mxu0 %v6574_v30  ;;  %5066 = vmatprep.mubr.msk.f32.mxu0 %vm6188_vm0, %v6189_v1 }
 0xeda   :  { %5498 = vmatprep.subr.bf16.mxu0 %v6187_v0 }
 0xedd   :  { %5500 = vmatpush3.bf16.msra.mxu0 %v6584_v35 }
 0xede   :  { %5507 = vmatprep.subr.bf16.mxu0 %v6187_v0 }
 0xfab   :  { %v1105_v39 = vpop.f32.mrb[6].mxu0 }
 0xfac   :  { %v1106_v40 = vadd.f32 %v6560_v13, %v1105_v39  ;;  %v5046_v41 = vpop.f32.mrb[7].mxu0 }
 0xfae   :  { %v4657_v42 = vmul.f32 -1.442695, %v1106_v40 }
 0xfb0   :  { %5731 = vpow2.f32 %v4657_v42 }
 0xfba   :  { %v5732_v45 = vpop.eup %5731 }
 0xfbb   :  { %v1112_v46 = vadd.f32 1.0, %v5732_v45 }
 0xfbd   :  { %5733 = vrcp.f32 %v1112_v46 }
 0xfc7   :  { %v5734_v47 = vpop.eup %5733 }
 0xfc8   :  { %v1118_v50 = vmul.f32 %v5734_v47, %v1116_v49  ;;  %v1201_v61 = vsub.f32 1.0, %v5734_v47  ;;  %v1200_v63 = vmul.f32 %v5734_v47, %v6592_v43 }
 0xfca   :  { %1120 = vrot.lane.b32.xlu1 %v1118_v50, %s6193_s21 }
0x103c   :  { %v1121_v53 = vpop.permute.xlu1 %1120 }
0x103d   :  { %5056 = vmatmul.mubr.msk.f32.vlgmr.msra.gmra.mrb[12].mxu1 %vm584_vm7, %v1121_v53 }
0x103e   :  { %5503 = vmatpush3.bf16.msra.mxu1 %v6445_v7  ;;  %5079 = vmatprep.mubr.msk.f32.mxu1 %vm6188_vm0, %v6189_v1 }
0x103f   :  { %5504 = vmatprep.subr.bf16.mxu1 %v6187_v0 }
0x1042   :  { %5506 = vmatpush3.bf16.msra.mxu1 %v6451_v9 }
0x1043   :  { %5077 = vmatprep.subr.mxu1 %v6189_v1 }
0x1046   :  { %5078 = vmatpush3.msra.mxu1 %v6461_v10 }
0x1047   :  { %5510 = vmatprep.subr.bf16.mxu1 %v6187_v0 }
0x1110   :  { %v1190_v54 = vpop.f32.mrb[12].mxu1 }
0x1111   :  { %1195 = vrot.lane.b32.xlu0 %v1190_v54, %s6195_s10  ;;  %v5057_v55 = vpop.f32.mrb[13].mxu1 }
0x1183   :  { %v1196_v56 = vpop.permute.xlu0 %1195 }
0x1184   :  { %v1198_v57 = vadd.f32 %v1196_v56, %v1106_v40 }
0x1186   :  { %5735 = vtanh.f32 %v1198_v57 }
0x1190   :  { %v5736_v59 = vpop.eup %5735 }
0x1191   :  { %1203 = vrot.lane.b32.xlu1 %v5736_v59, %s6195_s10 }
0x1195   :  { %1305 = vrot.lane.b32.xlu1 %v6630_v24, %s6191_s19 }
0x1203   :  { %v1204_v62 = vpop.permute.xlu1 %1203 }
0x1204   :  { %v1206_v2 = vmul.f32 %v1204_v62, %v1201_v61 }
0x1206   :  { %v1207_v3 = vadd.f32 %v1206_v2, %v1200_v63 }
0x1207   :  { %v1306_v14 = vpop.permute.xlu1 %1305 }
0x1208   :  { %v6675_v4 = vclamps-f32 %v1207_v3, 5.0 }
0x120a   :  { %1284 = vst.msk [vmem:[#allocation17 + $0x2] sm:$0x3] %vm746_vm8, %v6675_v4  ;;  %5067 = vmatmul.mubr.msk.f32.vlgmr.msra.gmra.mrb[8].mxu0 %vm584_vm7, %v6675_v4 }
0x120b   :  { %5509 = vmatpush3.bf16.msra.mxu0 %v6470_v18  ;;  %5086 = vmatprep.mubr.msk.f32.mxu0 %vm6188_vm0, %v6189_v1 }
0x120c   :  { %5513 = vmatprep.subr.bf16.mxu0 %v6187_v0 }
0x12dd   :  { %v1279_v5 = vpop.f32.mrb[8].mxu0 }
0x12de   :  { %1298 = vst.msk [vmem:[#allocation24 + $0x2] sm:$0x3] %vm750_vm5, %v1279_v5  ;;  %1302 = vrot.lane.b32.xlu0 %v1279_v5, %s6190_s23  ;;  %v5068_v43 = vpop.f32.mrb[9].mxu0 }
0x12e2   :  { %1389 = vrot.lane.b32.xlu0 %v6630_v24, %s6190_s23 }
0x1350   :  { %v1303_v11 = vpop.permute.xlu0 %1302 }
0x1351   :  { %v1308_v15 = vsel %vm208_vm1, %v1300_v6, %v1303_v11 }
0x1352   :  { %v1309_v16 = vsel %vm210_vm2, %v1308_v15, %v1306_v14 }
0x1353   :  { %5080 = vmatmul.mubr.msk.f32.vlgmr.msra.gmra.mrb[14].mxu1 %vm218_vm3, %v1309_v16 }
0x1354   :  { %5512 = vmatpush3.bf16.msra.mxu1 %v6485_v36  ;;  %5093 = vmatprep.mubr.msk.f32.mxu1 %vm6188_vm0, %v6189_v1  ;;  %v1390_v26 = vpop.permute.xlu0 %1389 }
0x1355   :  { %5519 = vmatprep.subr.bf16.mxu1 %v6187_v0 }
0x1426   :  { %v1379_v17 = vpop.f32.mrb[14].mxu1 }
0x1427   :  { %v1380_v20 = vadd.f32 %v6477_v19, %v1379_v17  ;;  %v5081_v21 = vpop.f32.mrb[15].mxu1 }
0x1429   :  { %v4662_v22 = vmul.f32 -1.442695, %v1380_v20 }
0x142b   :  { %5737 = vpow2.f32 %v4662_v22 }
0x1435   :  { %v5738_v23 = vpop.eup %5737 }
0x1436   :  { %v1386_v44 = vadd.f32 1.0, %v5738_v23 }
0x1438   :  { %5739 = vrcp.f32 %v1386_v44 }
0x1442   :  { %v5740_v25 = vpop.eup %5739 }
0x1443   :  { %v1392_v27 = vmul.f32 %v5740_v25, %v1390_v26  ;;  %v1475_v39 = vsub.f32 1.0, %v5740_v25  ;;  %v1474_v41 = vmul.f32 %v5740_v25, %v6630_v24 }
0x1445   :  { %1394 = vrot.lane.b32.xlu1 %v1392_v27, %s6192_s0 }
0x14b7   :  { %v1395_v28 = vpop.permute.xlu1 %1394 }
0x14b8   :  { %5087 = vmatmul.mubr.msk.f32.vlgmr.msra.gmra.mrb[10].mxu0 %vm208_vm1, %v1395_v28 }
0x14b9   :  { %5515 = vmatpush3.bf16.msra.mxu0 %v6504_v48  ;;  %5106 = vmatprep.mubr.msk.f32.mxu0 %vm6188_vm0, %v6189_v1 }
0x14ba   :  { %5516 = vmatprep.subr.bf16.mxu0 %v6187_v0 }
0x14bd   :  { %5518 = vmatpush3.bf16.msra.mxu0 %v6507_v51 }
0x14be   :  { %5104 = vmatprep.subr.mxu0 %v6189_v1 }
0x14c1   :  { %5105 = vmatpush3.msra.mxu0 %v6519_v58 }
0x14c2   :  { %5525 = vmatprep.subr.bf16.mxu0 %v6187_v0 }
0x158b   :  { %v1464_v31 = vpop.f32.mrb[10].mxu0 }
0x158c   :  { %1469 = vrot.lane.b32.xlu0 %v1464_v31, %s7345_s1  ;;  %v5088_v32 = vpop.f32.mrb[11].mxu0 }
0x1590   :  { %1563 = vrot.lane.b32.xlu0 %v1561_v33, %s7347_s22  ;;  %v1840_v33 = vld [vmem:[#allocation2 + $0x6] sm:$0x3] }
0x1594   :  { %1572 = vrot.lane.b32.xlu0 %v6675_v4, %s7347_s22 }
0x15fe   :  { %v1470_v34 = vpop.permute.xlu0 %1469 }
0x15ff   :  { %v1472_v37 = vadd.f32 %v1470_v34, %v1380_v20 }
0x1601   :  { %5741 = vtanh.f32 %v1472_v37 }
0x1602   :  { %v1564_v55 = vpop.permute.xlu0 %1563 }
0x1606   :  { %v1573_v61 = vpop.permute.xlu0 %1572 }
0x160b   :  { %v5742_v38 = vpop.eup %5741 }
0x160c   :  { %1477 = vrot.lane.b32.xlu1 %v5742_v38, %s6193_s21 }
0x167e   :  { %v1478_v40 = vpop.permute.xlu1 %1477 }
0x167f   :  { %v1480_v42 = vmul.f32 %v1478_v40, %v1475_v39 }
0x1681   :  { %v1481_v45 = vadd.f32 %v1480_v42, %v1474_v41 }
0x1683   :  { %v6713_v46 = vclamps-f32 %v1481_v45, 5.0 }
0x1685   :  { %1826 = vst.msk [vmem:[#allocation18 + $0x4] sm:$0x3] %vm748_vm4, %v6713_v46  ;;  %5094 = vmatmul.mubr.msk.f32.vlgmr.msra.gmra.mrb[16].mxu1 %vm208_vm1, %v6713_v46 }
0x1686   :  { %5521 = vmatpush3.bf16.msra.mxu1 %v6549_v8  ;;  %5117 = vmatprep.mubr.msk.f32.mxu1 %vm6188_vm0, %v6189_v1 }
0x1687   :  { %5522 = vmatprep.subr.bf16.mxu1 %v6187_v0 }
0x168a   :  { %5524 = vmatpush3.bf16.msra.mxu1 %v6555_v12 }
0x168b   :  { %5531 = vmatprep.subr.bf16.mxu1 %v6187_v0 }
0x1758   :  { %v1553_v24 = vpop.f32.mrb[16].mxu1 }
0x1759   :  { %v1554_v47 = vadd.f32 %v6515_v52, %v1553_v24  ;;  %v5095_v49 = vpop.f32.mrb[17].mxu1 }
0x175b   :  { %v1557_v50 = vmul.f32 0.5, %v1554_v47  ;;  %1828 = vst.msk [vmem:[#allocation20 + $0x4] sm:$0x3] %vm750_vm5, %v1554_v47 }
0x175d   :  { %v1558_v53 = vmul.f32 1.442695, %v1557_v50 }
0x175f   :  { %5743 = vpow2.f32 %v1558_v53 }
0x1769   :  { %v6727_v54 = vpop.eup %5743 }
0x176a   :  { %v1566_v56 = vmul.f32 %v6727_v54, %v1564_v55 }
0x176c   :  { %1568 = vrot.lane.b32.xlu1 %v1566_v56, %s6194_s11 }
0x1770   :  { %1655 = vrot.lane.b32.xlu1 %v6675_v4, %s7345_s1 }
0x17de   :  { %v1569_v57 = vpop.permute.xlu1 %1568 }
0x17df   :  { %v1571_v59 = vadd.f32 %v1569_v57, %v1554_v47  ;;  %v2101_v57 = vld [vmem:[#allocation5 + $0x6] sm:$0x3] }
0x17e1   :  { %v1575_v62 = vsel %vm490_vm6, %v1571_v59, %v1573_v61  ;;  %1836 = vst.msk [vmem:[#allocation23 + $0x4] sm:$0x3] %vm750_vm5, %v1571_v59 }
0x17e2   :  { %5107 = vmatmul.mubr.msk.f32.vlgmr.msra.gmra.mrb[12].mxu0 %vm218_vm3, %v1575_v62  ;;  %v1656_v14 = vpop.permute.xlu1 %1655 }
0x17e3   :  { %5527 = vmatpush3.bf16.msra.mxu0 %v6574_v30  ;;  %5128 = vmatprep.mubr.msk.f32.mxu0 %vm6188_vm0, %v6189_v1 }
0x17e4   :  { %5528 = vmatprep.subr.bf16.mxu0 %v6187_v0 }
0x17e7   :  { %5530 = vmatpush3.bf16.msra.mxu0 %v6584_v35 }
0x17e8   :  { %5537 = vmatprep.subr.bf16.mxu0 %v6187_v0 }
0x18b5   :  { %v1645_v63 = vpop.f32.mrb[12].mxu0 }
0x18b6   :  { %v1646_v2 = vadd.f32 %v6560_v13, %v1645_v63  ;;  %v5108_v3 = vpop.f32.mrb[13].mxu0 }
0x18b8   :  { %v4667_v5 = vmul.f32 -1.442695, %v1646_v2 }
0x18ba   :  { %5745 = vpow2.f32 %v4667_v5 }
0x18c4   :  { %v5746_v43 = vpop.eup %5745 }
0x18c5   :  { %v1652_v6 = vadd.f32 1.0, %v5746_v43 }
0x18c7   :  { %5747 = vrcp.f32 %v1652_v6 }
0x18d1   :  { %v5748_v11 = vpop.eup %5747 }
0x18d2   :  { %v1658_v15 = vmul.f32 %v5748_v11, %v1656_v14  ;;  %v1741_v44 = vsub.f32 1.0, %v5748_v11  ;;  %v1740_v26 = vmul.f32 %v5748_v11, %v6675_v4 }
0x18d4   :  { %1660 = vrot.lane.b32.xlu0 %v1658_v15, %s6193_s21 }
0x1946   :  { %v1661_v16 = vpop.permute.xlu0 %1660 }
0x1947   :  { %5118 = vmatmul.mubr.msk.f32.vlgmr.msra.gmra.mrb[18].mxu1 %vm584_vm7, %v1661_v16 }
0x1948   :  { %5533 = vmatpush3.bf16.msra.mxu1 %v6445_v7  ;;  %5141 = vmatprep.mubr.msk.f32.mxu1 %vm6188_vm0, %v6189_v1 }
0x1949   :  { %5534 = vmatprep.subr.bf16.mxu1 %v6187_v0 }
0x194c   :  { %5536 = vmatpush3.bf16.msra.mxu1 %v6451_v9 }
0x194d   :  { %5139 = vmatprep.subr.mxu1 %v6189_v1 }
0x1950   :  { %5140 = vmatpush3.msra.mxu1 %v6461_v10 }
0x1951   :  { %5540 = vmatprep.subr.bf16.mxu1 %v6187_v0 }
0x1a1a   :  { %v1730_v17 = vpop.f32.mrb[18].mxu1 }
0x1a1b   :  { %1735 = vrot.lane.b32.xlu1 %v1730_v17, %s6195_s10  ;;  %v5119_v20 = vpop.f32.mrb[19].mxu1 }
0x1a8d   :  { %v1736_v21 = vpop.permute.xlu1 %1735 }
0x1a8e   :  { %v1738_v22 = vadd.f32 %v1736_v21, %v1646_v2 }
0x1a90   :  { %5749 = vtanh.f32 %v1738_v22 }
0x1a9a   :  { %v5750_v23 = vpop.eup %5749 }
0x1a9b   :  { %1743 = vrot.lane.b32.xlu0 %v5750_v23, %s6195_s10 }
0x1a9f   :  { %1845 = vrot.lane.b32.xlu0 %v6713_v46, %s6191_s19 }
0x1b0d   :  { %v1744_v25 = vpop.permute.xlu0 %1743 }
0x1b0e   :  { %v1746_v27 = vmul.f32 %v1744_v25, %v1741_v44 }
0x1b10   :  { %v1747_v28 = vadd.f32 %v1746_v27, %v1740_v26 }
0x1b11   :  { %v1846_v37 = vpop.permute.xlu0 %1845 }
0x1b12   :  { %v6758_v31 = vclamps-f32 %v1747_v28, 5.0 }
0x1b14   :  { %1824 = vst.msk [vmem:[#allocation17 + $0x4] sm:$0x3] %vm746_vm8, %v6758_v31  ;;  %5129 = vmatmul.mubr.msk.f32.vlgmr.msra.gmra.mrb[14].mxu0 %vm584_vm7, %v6758_v31 }
0x1b15   :  { %5539 = vmatpush3.bf16.msra.mxu0 %v6470_v18  ;;  %5148 = vmatprep.mubr.msk.f32.mxu0 %vm6188_vm0, %v6189_v1 }
0x1b16   :  { %5543 = vmatprep.subr.bf16.mxu0 %v6187_v0 }
0x1be7   :  { %v1819_v32 = vpop.f32.mrb[14].mxu0 }
0x1be8   :  { %1838 = vst.msk [vmem:[#allocation24 + $0x4] sm:$0x3] %vm750_vm5, %v1819_v32  ;;  %1842 = vrot.lane.b32.xlu1 %v1819_v32, %s6190_s23  ;;  %v5130_v4 = vpop.f32.mrb[15].mxu0 }
0x1bec   :  { %1929 = vrot.lane.b32.xlu1 %v6713_v46, %s6190_s23 }
0x1c5a   :  { %v1843_v34 = vpop.permute.xlu1 %1842 }
0x1c5b   :  { %v1848_v38 = vsel %vm208_vm1, %v1840_v33, %v1843_v34 }
0x1c5c   :  { %v1849_v39 = vsel %vm210_vm2, %v1848_v38, %v1846_v37 }
0x1c5d   :  { %5142 = vmatmul.mubr.msk.f32.vlgmr.msra.gmra.mrb[20].mxu1 %vm218_vm3, %v1849_v39 }
0x1c5e   :  { %5542 = vmatpush3.bf16.msra.mxu1 %v6485_v36  ;;  %5155 = vmatprep.mubr.msk.f32.mxu1 %vm6188_vm0, %v6189_v1  ;;  %v1930_v50 = vpop.permute.xlu1 %1929 }
0x1c5f   :  { %5549 = vmatprep.subr.bf16.mxu1 %v6187_v0 }
0x1d30   :  { %v1919_v40 = vpop.f32.mrb[20].mxu1 }
0x1d31   :  { %v1920_v41 = vadd.f32 %v6477_v19, %v1919_v40  ;;  %v5143_v42 = vpop.f32.mrb[21].mxu1 }
0x1d33   :  { %v4672_v45 = vmul.f32 -1.442695, %v1920_v41 }
0x1d35   :  { %5751 = vpow2.f32 %v4672_v45 }
0x1d3f   :  { %v5752_v24 = vpop.eup %5751 }
0x1d40   :  { %v1926_v47 = vadd.f32 1.0, %v5752_v24 }
0x1d42   :  { %5753 = vrcp.f32 %v1926_v47 }
0x1d4c   :  { %v5754_v49 = vpop.eup %5753 }
0x1d4d   :  { %v1932_v53 = vmul.f32 %v5754_v49, %v1930_v50  ;;  %v2015_v63 = vsub.f32 1.0, %v5754_v49  ;;  %v2014_v3 = vmul.f32 %v5754_v49, %v6713_v46 }
0x1d4f   :  { %1934 = vrot.lane.b32.xlu0 %v1932_v53, %s6192_s0 }
0x1dc1   :  { %v1935_v55 = vpop.permute.xlu0 %1934 }
0x1dc2   :  { %5149 = vmatmul.mubr.msk.f32.vlgmr.msra.gmra.mrb[16].mxu0 %vm208_vm1, %v1935_v55 }
0x1dc3   :  { %5545 = vmatpush3.bf16.msra.mxu0 %v6504_v48  ;;  %5168 = vmatprep.mubr.msk.f32.mxu0 %vm6188_vm0, %v6189_v1 }
0x1dc4   :  { %5546 = vmatprep.subr.bf16.mxu0 %v6187_v0 }
0x1dc7   :  { %5548 = vmatpush3.bf16.msra.mxu0 %v6507_v51 }
0x1dc8   :  { %5166 = vmatprep.subr.mxu0 %v6189_v1 }
0x1dcb   :  { %5167 = vmatpush3.msra.mxu0 %v6519_v58 }
0x1dcc   :  { %5555 = vmatprep.subr.bf16.mxu0 %v6187_v0 }
0x1e95   :  { %v2004_v19 = vpop.f32.mrb[16].mxu0 }
0x1e96   :  { %2009 = vrot.lane.b32.xlu1 %v2004_v19, %s7345_s1  ;;  %v5150_v56 = vpop.f32.mrb[17].mxu0  ;;  %v2380_v19 = vld [vmem:[#allocation2 + $0x8] sm:$0x3] }
0x1e9a   :  { %2103 = vrot.lane.b32.xlu1 %v2101_v57, %s7347_s22 }
0x1e9e   :  { %2112 = vrot.lane.b32.xlu1 %v6758_v31, %s7347_s22 }
0x1f08   :  { %v2010_v59 = vpop.permute.xlu1 %2009 }
0x1f09   :  { %v2012_v61 = vadd.f32 %v2010_v59, %v1920_v41 }
0x1f0b   :  { %5755 = vtanh.f32 %v2012_v61 }
0x1f0c   :  { %v2104_v20 = vpop.permute.xlu1 %2103 }
0x1f10   :  { %v2113_v44 = vpop.permute.xlu1 %2112 }
0x1f15   :  { %v5756_v62 = vpop.eup %5755 }
0x1f16   :  { %2017 = vrot.lane.b32.xlu0 %v5756_v62, %s6193_s21 }
0x1f88   :  { %v2018_v2 = vpop.permute.xlu0 %2017 }
0x1f89   :  { %v2020_v5 = vmul.f32 %v2018_v2, %v2015_v63  ;;  %v6865_v63 = vld [vmem:[%s7309_s6] ss:$0 sm:$0xff] }
0x1f8b   :  { %v2021_v43 = vadd.f32 %v2020_v5, %v2014_v3 }
0x1f8d   :  { %v6796_v6 = vclamps-f32 %v2021_v43, 5.0 }
0x1f8f   :  { %2366 = vst.msk [vmem:[#allocation18 + $0x6] sm:$0x3] %vm748_vm4, %v6796_v6  ;;  %5156 = vmatmul.mubr.msk.f32.vlgmr.msra.gmra.mrb[22].mxu1 %vm208_vm1, %v6796_v6 }
0x1f90   :  { %5551 = vmatpush3.bf16.msra.mxu1 %v6549_v8  ;;  %5179 = vmatprep.mubr.msk.f32.mxu1 %vm6188_vm0, %v6189_v1 }
0x1f91   :  { %5552 = vmatprep.subr.bf16.mxu1 %v6187_v0 }
0x1f94   :  { %5554 = vmatpush3.bf16.msra.mxu1 %v6555_v12 }
0x1f95   :  { %5561 = vmatprep.subr.bf16.mxu1 %v6187_v0 }
0x2062   :  { %v2093_v46 = vpop.f32.mrb[22].mxu1 }
0x2063   :  { %v2094_v11 = vadd.f32 %v6515_v52, %v2093_v46  ;;  %v5157_v14 = vpop.f32.mrb[23].mxu1 }
0x2065   :  { %v2097_v15 = vmul.f32 0.5, %v2094_v11  ;;  %2368 = vst.msk [vmem:[#allocation20 + $0x6] sm:$0x3] %vm750_vm5, %v2094_v11 }
0x2067   :  { %v2098_v16 = vmul.f32 1.442695, %v2097_v15 }
0x2069   :  { %5757 = vpow2.f32 %v2098_v16 }
0x2073   :  { %v6810_v17 = vpop.eup %5757 }
0x2074   :  { %v2106_v21 = vmul.f32 %v6810_v17, %v2104_v20 }
0x2076   :  { %2108 = vrot.lane.b32.xlu0 %v2106_v21, %s6194_s11 }
0x207a   :  { %2195 = vrot.lane.b32.xlu0 %v6758_v31, %s7345_s1 }
0x20e8   :  { %v2109_v22 = vpop.permute.xlu0 %2108 }
0x20e9   :  { %v2111_v23 = vadd.f32 %v2109_v22, %v2094_v11  ;;  %v2641_v22 = vld [vmem:[#allocation5 + $0x8] sm:$0x3] }
0x20eb   :  { %v2115_v52 = vsel %vm490_vm6, %v2111_v23, %v2113_v44  ;;  %2376 = vst.msk [vmem:[#allocation23 + $0x6] sm:$0x3] %vm750_vm5, %v2111_v23 }
0x20ec   :  { %5169 = vmatmul.mubr.msk.f32.vlgmr.msra.gmra.mrb[18].mxu0 %vm218_vm3, %v2115_v52  ;;  %v2196_v34 = vpop.permute.xlu0 %2195 }
0x20ed   :  { %5557 = vmatpush3.bf16.msra.mxu0 %v6574_v30  ;;  %5190 = vmatprep.mubr.msk.f32.mxu0 %vm6188_vm0, %v6189_v1 }
0x20ee   :  { %5558 = vmatprep.subr.bf16.mxu0 %v6187_v0 }
0x20f1   :  { %5560 = vmatpush3.bf16.msra.mxu0 %v6584_v35 }
0x20f2   :  { %5567 = vmatprep.subr.bf16.mxu0 %v6187_v0 }
0x21bf   :  { %v2185_v25 = vpop.f32.mrb[18].mxu0 }
0x21c0   :  { %v2186_v26 = vadd.f32 %v6560_v13, %v2185_v25  ;;  %v5170_v27 = vpop.f32.mrb[19].mxu0 }
0x21c2   :  { %v4677_v28 = vmul.f32 -1.442695, %v2186_v26 }
0x21c4   :  { %5759 = vpow2.f32 %v4677_v28 }
0x21ce   :  { %v5760_v32 = vpop.eup %5759 }
0x21cf   :  { %v2192_v4 = vadd.f32 1.0, %v5760_v32 }
0x21d1   :  { %5761 = vrcp.f32 %v2192_v4  ;;  %v6899_v4 = vld [vmem:[%s7315_s12] ss:$0 sm:$0xff] }
0x21db   :  { %v5762_v33 = vpop.eup %5761 }
0x21dc   :  { %v2198_v37 = vmul.f32 %v5762_v33, %v2196_v34  ;;  %v2281_v24 = vsub.f32 1.0, %v5762_v33  ;;  %v2280_v49 = vmul.f32 %v5762_v33, %v6758_v31 }
0x21de   :  { %2200 = vrot.lane.b32.xlu1 %v2198_v37, %s6193_s21 }
0x2250   :  { %v2201_v38 = vpop.permute.xlu1 %2200 }
0x2251   :  { %5180 = vmatmul.mubr.msk.f32.vlgmr.msra.gmra.mrb[24].mxu1 %vm584_vm7, %v2201_v38 }
0x2252   :  { %5563 = vmatpush3.bf16.msra.mxu1 %v6445_v7  ;;  %5203 = vmatprep.mubr.msk.f32.mxu1 %vm6188_vm0, %v6189_v1 }
0x2253   :  { %5564 = vmatprep.subr.bf16.mxu1 %v6187_v0 }
0x2256   :  { %5566 = vmatpush3.bf16.msra.mxu1 %v6451_v9 }
0x2257   :  { %5201 = vmatprep.subr.mxu1 %v6189_v1 }
0x225a   :  { %5202 = vmatpush3.msra.mxu1 %v6461_v10 }
0x225b   :  { %5570 = vmatprep.subr.bf16.mxu1 %v6187_v0 }
0x2324   :  { %v2270_v39 = vpop.f32.mrb[24].mxu1 }
0x2325   :  { %2275 = vrot.lane.b32.xlu0 %v2270_v39, %s6195_s10  ;;  %v5181_v40 = vpop.f32.mrb[25].mxu1 }
0x2397   :  { %v2276_v41 = vpop.permute.xlu0 %2275 }
0x2398   :  { %v2278_v42 = vadd.f32 %v2276_v41, %v2186_v26 }
0x239a   :  { %5763 = vtanh.f32 %v2278_v42 }
0x23a4   :  { %v5764_v45 = vpop.eup %5763 }
0x23a5   :  { %2283 = vrot.lane.b32.xlu1 %v5764_v45, %s6195_s10 }
0x23a9   :  { %2385 = vrot.lane.b32.xlu1 %v6796_v6, %s6191_s19 }
0x2417   :  { %v2284_v47 = vpop.permute.xlu1 %2283 }
0x2418   :  { %v2286_v10 = vmul.f32 %v2284_v47, %v2281_v24 }
0x241a   :  { %v2287_v50 = vadd.f32 %v2286_v10, %v2280_v49 }
0x241b   :  { %v2386_v57 = vpop.permute.xlu1 %2385 }
0x241c   :  { %v6841_v53 = vclamps-f32 %v2287_v50, 5.0 }
0x241e   :  { %2364 = vst.msk [vmem:[#allocation17 + $0x6] sm:$0x3] %vm746_vm8, %v6841_v53  ;;  %5191 = vmatmul.mubr.msk.f32.vlgmr.msra.gmra.mrb[20].mxu0 %vm584_vm7, %v6841_v53 }
0x241f   :  { %5569 = vmatpush3.bf16.msra.mxu0 %v6470_v18  ;;  %5210 = vmatprep.mubr.msk.f32.mxu0 %vm6188_vm0, %v6189_v1 }
0x2420   :  { %5573 = vmatprep.subr.bf16.mxu0 %v6187_v0 }
0x24f1   :  { %v2359_v55 = vpop.f32.mrb[20].mxu0 }
0x24f2   :  { %2378 = vst.msk [vmem:[#allocation24 + $0x6] sm:$0x3] %vm750_vm5, %v2359_v55  ;;  %2382 = vrot.lane.b32.xlu0 %v2359_v55, %s6190_s23  ;;  %v5192_v31 = vpop.f32.mrb[21].mxu0 }
0x24f6   :  { %2469 = vrot.lane.b32.xlu0 %v6796_v6, %s6190_s23 }
0x2564   :  { %v2383_v56 = vpop.permute.xlu0 %2382 }
0x2565   :  { %v2388_v59 = vsel %vm208_vm1, %v2380_v19, %v2383_v56 }
0x2566   :  { %v2389_v61 = vsel %vm210_vm2, %v2388_v59, %v2386_v57 }
0x2567   :  { %5204 = vmatmul.mubr.msk.f32.vlgmr.msra.gmra.mrb[26].mxu1 %vm218_vm3, %v2389_v61 }
0x2568   :  { %5572 = vmatpush3.bf16.msra.mxu1 %v6485_v36  ;;  %5217 = vmatprep.mubr.msk.f32.mxu1 %vm6188_vm0, %v6189_v1  ;;  %v2470_v14 = vpop.permute.xlu0 %2469 }
0x2569   :  { %5579 = vmatprep.subr.bf16.mxu1 %v6187_v0 }
0x263a   :  { %v2459_v62 = vpop.f32.mrb[26].mxu1 }
0x263b   :  { %v2460_v2 = vadd.f32 %v6865_v63, %v2459_v62  ;;  %v5205_v3 = vpop.f32.mrb[27].mxu1 }
0x263d   :  { %v4682_v5 = vmul.f32 -1.442695, %v2460_v2 }
0x263f   :  { %5765 = vpow2.f32 %v4682_v5 }
0x2649   :  { %v5766_v43 = vpop.eup %5765 }
0x264a   :  { %v2466_v46 = vadd.f32 1.0, %v5766_v43 }
0x264c   :  { %5767 = vrcp.f32 %v2466_v46 }
0x2656   :  { %v5768_v11 = vpop.eup %5767 }
0x2657   :  { %v2472_v15 = vmul.f32 %v5768_v11, %v2470_v14  ;;  %v2555_v25 = vsub.f32 1.0, %v5768_v11  ;;  %v2554_v26 = vmul.f32 %v5768_v11, %v6796_v6 }
0x2659   :  { %2474 = vrot.lane.b32.xlu1 %v2472_v15, %s6192_s0 }
0x26cb   :  { %v2475_v16 = vpop.permute.xlu1 %2474 }
0x26cc   :  { %5211 = vmatmul.mubr.msk.f32.vlgmr.msra.gmra.mrb[22].mxu0 %vm208_vm1, %v2475_v16 }
0x26cd   :  { %5575 = vmatpush3.bf16.msra.mxu0 %v6504_v48  ;;  %5230 = vmatprep.mubr.msk.f32.mxu0 %vm6188_vm0, %v6189_v1 }
0x26ce   :  { %5576 = vmatprep.subr.bf16.mxu0 %v6187_v0 }
0x26d1   :  { %5578 = vmatpush3.bf16.msra.mxu0 %v6507_v51 }
0x26d2   :  { %5228 = vmatprep.subr.mxu0 %v6189_v1 }
0x26d5   :  { %5229 = vmatpush3.msra.mxu0 %v6519_v58 }
0x26d6   :  { %5585 = vmatprep.subr.bf16.mxu0 %v6187_v0 }
0x279f   :  { %v2544_v20 = vpop.f32.mrb[22].mxu0 }
0x27a0   :  { %2549 = vrot.lane.b32.xlu0 %v2544_v20, %s7345_s1  ;;  %v5212_v21 = vpop.f32.mrb[23].mxu0 }
0x27a4   :  { %2643 = vrot.lane.b32.xlu0 %v2641_v22, %s7347_s22  ;;  %v2920_v22 = vld [vmem:[#allocation2 + $0xa] sm:$0x3] }
0x27a8   :  { %2652 = vrot.lane.b32.xlu0 %v6841_v53, %s7347_s22 }
0x2812   :  { %v2550_v23 = vpop.permute.xlu0 %2549 }
0x2813   :  { %v2552_v44 = vadd.f32 %v2550_v23, %v2460_v2 }
0x2815   :  { %5769 = vtanh.f32 %v2552_v44 }
0x2816   :  { %v2644_v40 = vpop.permute.xlu0 %2643 }
0x281a   :  { %v2653_v24 = vpop.permute.xlu0 %2652 }
0x281f   :  { %v5770_v52 = vpop.eup %5769 }
0x2820   :  { %2557 = vrot.lane.b32.xlu1 %v5770_v52, %s6193_s21 }
0x2892   :  { %v2558_v58 = vpop.permute.xlu1 %2557 }
0x2893   :  { %v2560_v27 = vmul.f32 %v2558_v58, %v2555_v25 }
0x2895   :  { %v2561_v28 = vadd.f32 %v2560_v27, %v2554_v26 }
0x2897   :  { %v6884_v32 = vclamps-f32 %v2561_v28, 5.0 }
0x2899   :  { %2906 = vst.msk [vmem:[#allocation18 + $0x8] sm:$0x3] %vm748_vm4, %v6884_v32  ;;  %5218 = vmatmul.mubr.msk.f32.vlgmr.msra.gmra.mrb[28].mxu1 %vm208_vm1, %v6884_v32 }
0x289a   :  { %5581 = vmatpush3.bf16.msra.mxu1 %v6549_v8  ;;  %5241 = vmatprep.mubr.msk.f32.mxu1 %vm6188_vm0, %v6189_v1 }
0x289b   :  { %5582 = vmatprep.subr.bf16.mxu1 %v6187_v0 }
0x289e   :  { %5584 = vmatpush3.bf16.msra.mxu1 %v6555_v12 }
0x289f   :  { %5591 = vmatprep.subr.bf16.mxu1 %v6187_v0 }
0x296c   :  { %v2633_v6 = vpop.f32.mrb[28].mxu1 }
0x296d   :  { %v2634_v33 = vadd.f32 %v6899_v4, %v2633_v6  ;;  %v5219_v34 = vpop.f32.mrb[29].mxu1 }
0x296f   :  { %v2637_v37 = vmul.f32 0.5, %v2634_v33  ;;  %2908 = vst.msk [vmem:[#allocation20 + $0x8] sm:$0x3] %vm750_vm5, %v2634_v33 }
0x2971   :  { %v2638_v38 = vmul.f32 1.442695, %v2637_v37 }
0x2973   :  { %5771 = vpow2.f32 %v2638_v38 }
0x297d   :  { %v6903_v39 = vpop.eup %5771 }
0x297e   :  { %v2646_v41 = vmul.f32 %v6903_v39, %v2644_v40 }
0x2980   :  { %2648 = vrot.lane.b32.xlu1 %v2646_v41, %s6194_s11  ;;  %v6969_v41 = vld [vmem:[#allocation13 + $0x20] sm:$0xff] }
0x2984   :  { %2735 = vrot.lane.b32.xlu1 %v6841_v53, %s7345_s1 }
0x29f2   :  { %v2649_v42 = vpop.permute.xlu1 %2648 }
0x29f3   :  { %v2651_v45 = vadd.f32 %v2649_v42, %v2634_v33 }
0x29f5   :  { %v2655_v47 = vsel %vm490_vm6, %v2651_v45, %v2653_v24  ;;  %2916 = vst.msk [vmem:[#allocation23 + $0x8] sm:$0x3] %vm750_vm5, %v2651_v45  ;;  %v3181_v24 = vld [vmem:[#allocation5 + $0xa] sm:$0x3] }
0x29f6   :  { %5231 = vmatmul.mubr.msk.f32.vlgmr.msra.gmra.mrb[24].mxu0 %vm218_vm3, %v2655_v47  ;;  %v2736_v57 = vpop.permute.xlu1 %2735 }
0x29f7   :  { %5587 = vmatpush3.bf16.msra.mxu0 %v6574_v30  ;;  %5252 = vmatprep.mubr.msk.f32.mxu0 %vm6188_vm0, %v6189_v1 }
0x29f8   :  { %5588 = vmatprep.subr.bf16.mxu0 %v6187_v0 }
0x29fb   :  { %5590 = vmatpush3.bf16.msra.mxu0 %v6584_v35 }
0x29fc   :  { %5597 = vmatprep.subr.bf16.mxu0 %v6187_v0 }
0x2ac9   :  { %v2725_v49 = vpop.f32.mrb[24].mxu0 }
0x2aca   :  { %v2726_v10 = vadd.f32 %v6560_v13, %v2725_v49  ;;  %v5232_v50 = vpop.f32.mrb[25].mxu0  ;;  %v6930_v13 = vld [vmem:[%s7308_s5 + $0x20] sm:$0xff]  ;;  %s6196_s5 = smov [#allocation18]  }
0x2acc   :  { %v4687_v55 = vmul.f32 -1.442695, %v2726_v10 }
0x2ace   :  { %5773 = vpow2.f32 %v4687_v55 }
0x2ad8   :  { %v5774_v31 = vpop.eup %5773 }
0x2ad9   :  { %v2732_v19 = vadd.f32 1.0, %v5774_v31 }
0x2adb   :  { %5775 = vrcp.f32 %v2732_v19 }
0x2ae5   :  { %v5776_v56 = vpop.eup %5775 }
0x2ae6   :  { %v2738_v59 = vmul.f32 %v5776_v56, %v2736_v57  ;;  %v2821_v46 = vsub.f32 1.0, %v5776_v56  ;;  %v2820_v14 = vmul.f32 %v5776_v56, %v6841_v53 }
0x2ae8   :  { %2740 = vrot.lane.b32.xlu0 %v2738_v59, %s6193_s21 }
0x2b5a   :  { %v2741_v61 = vpop.permute.xlu0 %2740 }
0x2b5b   :  { %5242 = vmatmul.mubr.msk.f32.vlgmr.msra.gmra.mrb[30].mxu1 %vm584_vm7, %v2741_v61 }
0x2b5c   :  { %5593 = vmatpush3.bf16.msra.mxu1 %v6445_v7  ;;  %5265 = vmatprep.mubr.msk.f32.mxu1 %vm6188_vm0, %v6189_v1 }
0x2b5d   :  { %5594 = vmatprep.subr.bf16.mxu1 %v6187_v0 }
0x2b60   :  { %5596 = vmatpush3.bf16.msra.mxu1 %v6451_v9 }
0x2b61   :  { %5263 = vmatprep.subr.mxu1 %v6189_v1 }
0x2b64   :  { %5264 = vmatpush3.msra.mxu1 %v6930_v13 }
0x2b65   :  { %5600 = vmatprep.subr.bf16.mxu1 %v6187_v0 }
0x2c2e   :  { %v2810_v62 = vpop.f32.mrb[30].mxu1 }
0x2c2f   :  { %2815 = vrot.lane.b32.xlu1 %v2810_v62, %s6195_s10  ;;  %v5243_v2 = vpop.f32.mrb[31].mxu1 }
0x2ca1   :  { %v2816_v3 = vpop.permute.xlu1 %2815 }
0x2ca2   :  { %v2818_v5 = vadd.f32 %v2816_v3, %v2726_v10 }
0x2ca4   :  { %5777 = vtanh.f32 %v2818_v5 }
0x2cae   :  { %v5778_v43 = vpop.eup %5777 }
0x2caf   :  { %2823 = vrot.lane.b32.xlu0 %v5778_v43, %s6195_s10 }
0x2cb3   :  { %2925 = vrot.lane.b32.xlu0 %v6884_v32, %s6191_s19 }
0x2d21   :  { %v2824_v11 = vpop.permute.xlu0 %2823 }
0x2d22   :  { %v2826_v15 = vmul.f32 %v2824_v11, %v2821_v46 }
0x2d24   :  { %v2827_v16 = vadd.f32 %v2826_v15, %v2820_v14 }
0x2d25   :  { %v2926_v44 = vpop.permute.xlu0 %2925 }
0x2d26   :  { %v6939_v20 = vclamps-f32 %v2827_v16, 5.0 }
0x2d28   :  { %2904 = vst.msk [vmem:[#allocation17 + $0x8] sm:$0x3] %vm746_vm8, %v6939_v20  ;;  %5253 = vmatmul.mubr.msk.f32.vlgmr.msra.gmra.mrb[26].mxu0 %vm584_vm7, %v6939_v20 }
0x2d29   :  { %5599 = vmatpush3.bf16.msra.mxu0 %v6470_v18  ;;  %5272 = vmatprep.mubr.msk.f32.mxu0 %vm6188_vm0, %v6189_v1 }
0x2d2a   :  { %5603 = vmatprep.subr.bf16.mxu0 %v6187_v0 }
0x2dfb   :  { %v2899_v21 = vpop.f32.mrb[26].mxu0 }
0x2dfc   :  { %2918 = vst.msk [vmem:[#allocation24 + $0x8] sm:$0x3] %vm750_vm5, %v2899_v21  ;;  %2922 = vrot.lane.b32.xlu1 %v2899_v21, %s6190_s23  ;;  %v5254_v53 = vpop.f32.mrb[27].mxu0  ;;  %v7008_v21 = vld [vmem:[#allocation14] ss:$0 sm:$0xff] }
0x2e00   :  { %3009 = vrot.lane.b32.xlu1 %v6884_v32, %s6190_s23 }
0x2e6e   :  { %v2923_v23 = vpop.permute.xlu1 %2922 }
0x2e6f   :  { %v2928_v52 = vsel %vm208_vm1, %v2920_v22, %v2923_v23 }
0x2e70   :  { %v2929_v25 = vsel %vm210_vm2, %v2928_v52, %v2926_v44 }
0x2e71   :  { %5266 = vmatmul.mubr.msk.f32.vlgmr.msra.gmra.mrb[32].mxu1 %vm218_vm3, %v2929_v25 }
0x2e72   :  { %5602 = vmatpush3.bf16.msra.mxu1 %v6485_v36  ;;  %5279 = vmatprep.mubr.msk.f32.mxu1 %vm6188_vm0, %v6189_v1  ;;  %v3010_v37 = vpop.permute.xlu1 %3009 }
0x2e73   :  { %5609 = vmatprep.subr.bf16.mxu1 %v6187_v0 }
0x2f44   :  { %v2999_v58 = vpop.f32.mrb[32].mxu1 }
0x2f45   :  { %v3000_v26 = vadd.f32 %v6865_v63, %v2999_v58  ;;  %v5267_v27 = vpop.f32.mrb[33].mxu1 }
0x2f47   :  { %v4692_v28 = vmul.f32 -1.442695, %v3000_v26 }
0x2f49   :  { %5779 = vpow2.f32 %v4692_v28 }
0x2f53   :  { %v5780_v6 = vpop.eup %5779 }
0x2f54   :  { %v3006_v33 = vadd.f32 1.0, %v5780_v6 }
0x2f56   :  { %5781 = vrcp.f32 %v3006_v33 }
0x2f60   :  { %v5782_v34 = vpop.eup %5781 }
0x2f61   :  { %v3012_v38 = vmul.f32 %v5782_v34, %v3010_v37  ;;  %v3095_v50 = vsub.f32 1.0, %v5782_v34  ;;  %v3094_v31 = vmul.f32 %v5782_v34, %v6884_v32 }
0x2f63   :  { %3014 = vrot.lane.b32.xlu0 %v3012_v38, %s6192_s0 }
0x2fd5   :  { %v3015_v40 = vpop.permute.xlu0 %3014 }
0x2fd6   :  { %5273 = vmatmul.mubr.msk.f32.vlgmr.msra.gmra.mrb[28].mxu0 %vm208_vm1, %v3015_v40 }
0x2fd7   :  { %5605 = vmatpush3.bf16.msra.mxu0 %v6504_v48  ;;  %5292 = vmatprep.mubr.msk.f32.mxu0 %vm6188_vm0, %v6189_v1 }
0x2fd8   :  { %5606 = vmatprep.subr.bf16.mxu0 %v6187_v0 }
0x2fdb   :  { %5608 = vmatpush3.bf16.msra.mxu0 %v6507_v51 }
0x2fdc   :  { %5290 = vmatprep.subr.mxu0 %v6189_v1 }
0x2fdf   :  { %5291 = vmatpush3.msra.mxu0 %v6969_v41 }
0x2fe0   :  { %5615 = vmatprep.subr.bf16.mxu0 %v6187_v0 }
0x30a9   :  { %v3084_v42 = vpop.f32.mrb[28].mxu0 }
0x30aa   :  { %3089 = vrot.lane.b32.xlu1 %v3084_v42, %s7345_s1  ;;  %v5274_v45 = vpop.f32.mrb[29].mxu0 }
0x30ae   :  { %3183 = vrot.lane.b32.xlu1 %v3181_v24, %s7347_s22 }
0x30b2   :  { %3192 = vrot.lane.b32.xlu1 %v6939_v20, %s7347_s22 }
0x311c   :  { %v3090_v47 = vpop.permute.xlu1 %3089 }
0x311d   :  { %v3092_v49 = vadd.f32 %v3090_v47, %v3000_v26 }
0x311f   :  { %5783 = vtanh.f32 %v3092_v49 }
0x3120   :  { %v3184_v5 = vpop.permute.xlu1 %3183 }
0x3124   :  { %v3193_v14 = vpop.permute.xlu1 %3192 }
0x3129   :  { %v5784_v10 = vpop.eup %5783 }
0x312a   :  { %3097 = vrot.lane.b32.xlu0 %v5784_v10, %s6193_s21  ;;  %v3460_v10 = vld [vmem:[#allocation2 + $0xc] sm:$0x3] }
0x319c   :  { %v3098_v55 = vpop.permute.xlu0 %3097 }
0x319d   :  { %v3100_v19 = vmul.f32 %v3098_v55, %v3095_v50 }
0x319f   :  { %v3101_v56 = vadd.f32 %v3100_v19, %v3094_v31 }
0x31a1   :  { %v6979_v57 = vclamps-f32 %v3101_v56, 5.0 }
0x31a3   :  { %3446 = vst.msk [vmem:[#allocation18 + $0xa] sm:$0x3] %vm748_vm4, %v6979_v57  ;;  %5280 = vmatmul.mubr.msk.f32.vlgmr.msra.gmra.mrb[34].mxu1 %vm208_vm1, %v6979_v57 }
0x31a4   :  { %5611 = vmatpush3.bf16.msra.mxu1 %v6549_v8  ;;  %5303 = vmatprep.mubr.msk.f32.mxu1 %vm6188_vm0, %v6189_v1 }
0x31a5   :  { %5612 = vmatprep.subr.bf16.mxu1 %v6187_v0 }
0x31a8   :  { %5614 = vmatpush3.bf16.msra.mxu1 %v6555_v12 }
0x31a9   :  { %5621 = vmatprep.subr.bf16.mxu1 %v6187_v0 }
0x3276   :  { %v3173_v32 = vpop.f32.mrb[34].mxu1 }
0x3277   :  { %v3174_v59 = vadd.f32 %v6899_v4, %v3173_v32  ;;  %v5281_v61 = vpop.f32.mrb[35].mxu1 }
0x3279   :  { %v3177_v62 = vmul.f32 0.5, %v3174_v59  ;;  %3448 = vst.msk [vmem:[#allocation20 + $0xa] sm:$0x3] %vm750_vm5, %v3174_v59 }
0x327b   :  { %v3178_v2 = vmul.f32 1.442695, %v3177_v62 }
0x327d   :  { %5785 = vpow2.f32 %v3178_v2 }
0x3287   :  { %v6993_v3 = vpop.eup %5785 }
0x3288   :  { %v3186_v43 = vmul.f32 %v6993_v3, %v3184_v5 }
0x328a   :  { %3188 = vrot.lane.b32.xlu0 %v3186_v43, %s6194_s11 }
0x328e   :  { %3275 = vrot.lane.b32.xlu0 %v6939_v20, %s7345_s1 }
0x32fc   :  { %v3189_v46 = vpop.permute.xlu0 %3188 }
0x32fd   :  { %v3191_v11 = vadd.f32 %v3189_v46, %v3174_v59 }
0x32ff   :  { %v3195_v15 = vsel %vm490_vm6, %v3191_v11, %v3193_v14  ;;  %3456 = vst.msk [vmem:[#allocation23 + $0xa] sm:$0x3] %vm750_vm5, %v3191_v11 }
0x3300   :  { %5293 = vmatmul.mubr.msk.f32.vlgmr.msra.gmra.mrb[30].mxu0 %vm218_vm3, %v3195_v15  ;;  %v3276_v58 = vpop.permute.xlu0 %3275 }
0x3301   :  { %5617 = vmatpush3.bf16.msra.mxu0 %v6574_v30  ;;  %5314 = vmatprep.mubr.msk.f32.mxu0 %vm6188_vm0, %v6189_v1 }
0x3302   :  { %5618 = vmatprep.subr.bf16.mxu0 %v6187_v0 }
0x3305   :  { %5620 = vmatpush3.bf16.msra.mxu0 %v6584_v35 }
0x3306   :  { %5627 = vmatprep.subr.bf16.mxu0 %v6187_v0 }
0x33d3   :  { %v3265_v16 = vpop.f32.mrb[30].mxu0 }
0x33d4   :  { %v3266_v53 = vadd.f32 %v7008_v21, %v3265_v16  ;;  %v5294_v22 = vpop.f32.mrb[31].mxu0  ;;  %v3721_v16 = vld [vmem:[#allocation5 + $0xc] sm:$0x3] }
0x33d6   :  { %v4697_v23 = vmul.f32 -1.442695, %v3266_v53 }
0x33d8   :  { %5787 = vpow2.f32 %v4697_v23 }
0x33e2   :  { %v5788_v44 = vpop.eup %5787 }
0x33e3   :  { %v3272_v52 = vadd.f32 1.0, %v5788_v44 }
0x33e5   :  { %5789 = vrcp.f32 %v3272_v52 }
0x33ef   :  { %v5790_v25 = vpop.eup %5789 }
0x33f0   :  { %v3278_v26 = vmul.f32 %v5790_v25, %v3276_v58  ;;  %v3361_v38 = vsub.f32 1.0, %v5790_v25  ;;  %v3360_v42 = vmul.f32 %v5790_v25, %v6939_v20 }
0x33f2   :  { %3280 = vrot.lane.b32.xlu1 %v3278_v26, %s6193_s21 }
0x3464   :  { %v3281_v27 = vpop.permute.xlu1 %3280 }
0x3465   :  { %5304 = vmatmul.mubr.msk.f32.vlgmr.msra.gmra.mrb[36].mxu1 %vm584_vm7, %v3281_v27 }
0x3466   :  { %5623 = vmatpush3.bf16.msra.mxu1 %v6445_v7  ;;  %5327 = vmatprep.mubr.msk.f32.mxu1 %vm6188_vm0, %v6189_v1 }
0x3467   :  { %5624 = vmatprep.subr.bf16.mxu1 %v6187_v0 }
0x346a   :  { %5626 = vmatpush3.bf16.msra.mxu1 %v6451_v9 }
0x346b   :  { %5325 = vmatprep.subr.mxu1 %v6189_v1 }
0x346e   :  { %5326 = vmatpush3.msra.mxu1 %v6930_v13 }
0x346f   :  { %5630 = vmatprep.subr.bf16.mxu1 %v6187_v0 }
0x3538   :  { %v3350_v28 = vpop.f32.mrb[36].mxu1 }
0x3539   :  { %3355 = vrot.lane.b32.xlu0 %v3350_v28, %s6195_s10  ;;  %v5305_v6 = vpop.f32.mrb[37].mxu1 }
0x35ab   :  { %v3356_v33 = vpop.permute.xlu0 %3355 }
0x35ac   :  { %v3358_v34 = vadd.f32 %v3356_v33, %v3266_v53 }
0x35ae   :  { %5791 = vtanh.f32 %v3358_v34 }
0x35b8   :  { %v5792_v37 = vpop.eup %5791 }
0x35b9   :  { %3363 = vrot.lane.b32.xlu1 %v5792_v37, %s6195_s10 }
0x35bd   :  { %3465 = vrot.lane.b32.xlu1 %v6979_v57, %s6191_s19 }
0x362b   :  { %v3364_v40 = vpop.permute.xlu1 %3363 }
0x362c   :  { %v3366_v45 = vmul.f32 %v3364_v40, %v3361_v38 }
0x362e   :  { %v3367_v24 = vadd.f32 %v3366_v45, %v3360_v42 }
0x362f   :  { %v3466_v55 = vpop.permute.xlu1 %3465 }
0x3630   :  { %v7026_v47 = vclamps-f32 %v3367_v24, 5.0 }
0x3632   :  { %3444 = vst.msk [vmem:[#allocation17 + $0xa] sm:$0x3] %vm746_vm8, %v7026_v47  ;;  %5315 = vmatmul.mubr.msk.f32.vlgmr.msra.gmra.mrb[32].mxu0 %vm584_vm7, %v7026_v47 }
0x3633   :  { %5629 = vmatpush3.bf16.msra.mxu0 %v6470_v18  ;;  %5334 = vmatprep.mubr.msk.f32.mxu0 %vm6188_vm0, %v6189_v1 }
0x3634   :  { %5633 = vmatprep.subr.bf16.mxu0 %v6187_v0 }
0x3705   :  { %v3439_v49 = vpop.f32.mrb[32].mxu0 }
0x3706   :  { %3458 = vst.msk [vmem:[#allocation24 + $0xa] sm:$0x3] %vm750_vm5, %v3439_v49  ;;  %3462 = vrot.lane.b32.xlu0 %v3439_v49, %s6190_s23  ;;  %v5316_v20 = vpop.f32.mrb[33].mxu0 }
0x370a   :  { %3549 = vrot.lane.b32.xlu0 %v6979_v57, %s6190_s23 }
0x3778   :  { %v3463_v50 = vpop.permute.xlu0 %3462 }
0x3779   :  { %v3468_v31 = vsel %vm208_vm1, %v3460_v10, %v3463_v50 }
0x377a   :  { %v3469_v19 = vsel %vm210_vm2, %v3468_v31, %v3466_v55 }
0x377b   :  { %5328 = vmatmul.mubr.msk.f32.vlgmr.msra.gmra.mrb[38].mxu1 %vm218_vm3, %v3469_v19 }
0x377c   :  { %5632 = vmatpush3.bf16.msra.mxu1 %v6485_v36  ;;  %5341 = vmatprep.mubr.msk.f32.mxu1 %vm6188_vm0, %v6189_v1  ;;  %v3550_v43 = vpop.permute.xlu0 %3549 }
0x377d   :  { %5639 = vmatprep.subr.bf16.mxu1 %v6187_v0 }
0x384e   :  { %v3539_v56 = vpop.f32.mrb[38].mxu1 }
0x384f   :  { %v3540_v32 = vadd.f32 %v6865_v63, %v3539_v56  ;;  %v5329_v59 = vpop.f32.mrb[39].mxu1 }
0x3851   :  { %v4702_v61 = vmul.f32 -1.442695, %v3540_v32 }
0x3853   :  { %5793 = vpow2.f32 %v4702_v61 }
0x385d   :  { %v5794_v62 = vpop.eup %5793 }
0x385e   :  { %v3546_v2 = vadd.f32 1.0, %v5794_v62 }
0x3860   :  { %5795 = vrcp.f32 %v3546_v2 }
0x386a   :  { %v5796_v5 = vpop.eup %5795 }
0x386b   :  { %v3552_v46 = vmul.f32 %v5796_v5, %v3550_v43  ;;  %v3635_v44 = vsub.f32 1.0, %v5796_v5  ;;  %v3634_v25 = vmul.f32 %v5796_v5, %v6979_v57 }
0x386d   :  { %3554 = vrot.lane.b32.xlu1 %v3552_v46, %s6192_s0 }
0x38df   :  { %v3555_v11 = vpop.permute.xlu1 %3554 }
0x38e0   :  { %5335 = vmatmul.mubr.msk.f32.vlgmr.msra.gmra.mrb[34].mxu0 %vm208_vm1, %v3555_v11 }
0x38e1   :  { %5635 = vmatpush3.bf16.msra.mxu0 %v6504_v48  ;;  %5354 = vmatprep.mubr.msk.f32.mxu0 %vm6188_vm0, %v6189_v1 }
0x38e2   :  { %5636 = vmatprep.subr.bf16.mxu0 %v6187_v0 }
0x38e5   :  { %5638 = vmatpush3.bf16.msra.mxu0 %v6507_v51 }
0x38e6   :  { %5352 = vmatprep.subr.mxu0 %v6189_v1 }
0x38e9   :  { %5353 = vmatpush3.msra.mxu0 %v6969_v41 }
0x38ea   :  { %5645 = vmatprep.subr.bf16.mxu0 %v6187_v0 }
0x39b3   :  { %v3624_v14 = vpop.f32.mrb[34].mxu0 }
0x39b4   :  { %3629 = vrot.lane.b32.xlu0 %v3624_v14, %s7345_s1  ;;  %v5336_v15 = vpop.f32.mrb[35].mxu0 }
0x39b8   :  { %3723 = vrot.lane.b32.xlu0 %v3721_v16, %s7347_s22 }
0x39bc   :  { %3732 = vrot.lane.b32.xlu0 %v7026_v47, %s7347_s22 }
0x3a26   :  { %v3630_v53 = vpop.permute.xlu0 %3629 }
0x3a27   :  { %v3632_v22 = vadd.f32 %v3630_v53, %v3540_v32  ;;  %v4000_v53 = vld [vmem:[#allocation2 + $0xe] sm:$0x3] }
0x3a29   :  { %5797 = vtanh.f32 %v3632_v22 }
0x3a2a   :  { %v3724_v38 = vpop.permute.xlu0 %3723 }
0x3a2e   :  { %v3733_v24 = vpop.permute.xlu0 %3732 }
0x3a33   :  { %v5798_v23 = vpop.eup %5797 }
0x3a34   :  { %3637 = vrot.lane.b32.xlu1 %v5798_v23, %s6193_s21 }
0x3aa6   :  { %v3638_v52 = vpop.permute.xlu1 %3637 }
0x3aa7   :  { %v3640_v58 = vmul.f32 %v3638_v52, %v3635_v44 }
0x3aa9   :  { %v3641_v26 = vadd.f32 %v3640_v58, %v3634_v25 }
0x3aab   :  { %v7064_v27 = vclamps-f32 %v3641_v26, 5.0 }
0x3aad   :  { %3986 = vst.msk [vmem:[#allocation18 + $0xc] sm:$0x3] %vm748_vm4, %v7064_v27  ;;  %5342 = vmatmul.mubr.msk.f32.vlgmr.msra.gmra.mrb[40].mxu1 %vm208_vm1, %v7064_v27 }
0x3aae   :  { %5641 = vmatpush3.bf16.msra.mxu1 %v6549_v8  ;;  %5365 = vmatprep.mubr.msk.f32.mxu1 %vm6188_vm0, %v6189_v1 }
0x3aaf   :  { %5642 = vmatprep.subr.bf16.mxu1 %v6187_v0 }
0x3ab2   :  { %5644 = vmatpush3.bf16.msra.mxu1 %v6555_v12 }
0x3ab3   :  { %5651 = vmatprep.subr.bf16.mxu1 %v6187_v0 }
0x3b80   :  { %v3713_v57 = vpop.f32.mrb[40].mxu1 }
0x3b81   :  { %v3714_v28 = vadd.f32 %v6899_v4, %v3713_v57  ;;  %v5343_v6 = vpop.f32.mrb[41].mxu1 }
0x3b83   :  { %v3717_v33 = vmul.f32 0.5, %v3714_v28  ;;  %3988 = vst.msk [vmem:[#allocation20 + $0xc] sm:$0x3] %vm750_vm5, %v3714_v28 }
0x3b85   :  { %v3718_v34 = vmul.f32 1.442695, %v3717_v33 }
0x3b87   :  { %5799 = vpow2.f32 %v3718_v34 }
0x3b91   :  { %v7078_v37 = vpop.eup %5799 }
0x3b92   :  { %v3726_v40 = vmul.f32 %v7078_v37, %v3724_v38 }
0x3b94   :  { %3728 = vrot.lane.b32.xlu1 %v3726_v40, %s6194_s11  ;;  %v4261_v40 = vld [vmem:[#allocation5 + $0xe] sm:$0x3] }
0x3b98   :  { %3815 = vrot.lane.b32.xlu1 %v7026_v47, %s7345_s1 }
0x3c06   :  { %v3729_v42 = vpop.permute.xlu1 %3728 }
0x3c07   :  { %v3731_v45 = vadd.f32 %v3729_v42, %v3714_v28 }
0x3c09   :  { %v3735_v49 = vsel %vm490_vm6, %v3731_v45, %v3733_v24  ;;  %3996 = vst.msk [vmem:[#allocation23 + $0xc] sm:$0x3] %vm750_vm5, %v3731_v45 }
0x3c0a   :  { %5355 = vmatmul.mubr.msk.f32.vlgmr.msra.gmra.mrb[36].mxu0 %vm218_vm3, %v3735_v49  ;;  %v3816_v32 = vpop.permute.xlu1 %3815 }
0x3c0b   :  { %5647 = vmatpush3.bf16.msra.mxu0 %v6574_v30  ;;  %5376 = vmatprep.mubr.msk.f32.mxu0 %vm6188_vm0, %v6189_v1 }
0x3c0c   :  { %5648 = vmatprep.subr.bf16.mxu0 %v6187_v0 }
0x3c0f   :  { %5650 = vmatpush3.bf16.msra.mxu0 %v6584_v35 }
0x3c10   :  { %5657 = vmatprep.subr.bf16.mxu0 %v6187_v0 }
0x3cdd   :  { %v3805_v20 = vpop.f32.mrb[36].mxu0 }
0x3cde   :  { %v3806_v10 = vadd.f32 %v7008_v21, %v3805_v20  ;;  %v5356_v50 = vpop.f32.mrb[37].mxu0 }
0x3ce0   :  { %v4707_v55 = vmul.f32 -1.442695, %v3806_v10 }
0x3ce2   :  { %5801 = vpow2.f32 %v4707_v55 }
0x3cec   :  { %v5802_v31 = vpop.eup %5801 }
0x3ced   :  { %v3812_v19 = vadd.f32 1.0, %v5802_v31 }
0x3cef   :  { %5803 = vrcp.f32 %v3812_v19 }
0x3cf9   :  { %v5804_v56 = vpop.eup %5803 }
0x3cfa   :  { %v3818_v59 = vmul.f32 %v5804_v56, %v3816_v32  ;;  %v3900_v11 = vmul.f32 %v5804_v56, %v7026_v47 }
0x3cfc   :  { %3820 = vrot.lane.b32.xlu0 %v3818_v59, %s6193_s21 }
0x3d6e   :  { %v3821_v61 = vpop.permute.xlu0 %3820 }
0x3d6f   :  { %5366 = vmatmul.mubr.msk.f32.vlgmr.msra.gmra.mrb[42].mxu1 %vm584_vm7, %v3821_v61 }
0x3d70   :  { %5653 = vmatpush3.bf16.msra.mxu1 %v6445_v7  ;;  %5389 = vmatprep.mubr.msk.f32.mxu1 %vm6188_vm0, %v6189_v1 }
0x3d71   :  { %5654 = vmatprep.subr.bf16.mxu1 %v6187_v0 }
0x3d74   :  { %5656 = vmatpush3.bf16.msra.mxu1 %v6451_v9  ;;  %v3901_v9 = vsub.f32 1.0, %v5804_v56 }
0x3d75   :  { %5387 = vmatprep.subr.mxu1 %v6189_v1 }
0x3d78   :  { %5388 = vmatpush3.msra.mxu1 %v6930_v13 }
0x3d79   :  { %5660 = vmatprep.subr.bf16.mxu1 %v6187_v0 }
0x3e42   :  { %v3890_v62 = vpop.f32.mrb[42].mxu1 }
0x3e43   :  { %3895 = vrot.lane.b32.xlu1 %v3890_v62, %s6195_s10  ;;  %v5367_v2 = vpop.f32.mrb[43].mxu1 }
0x3eb5   :  { %v3896_v5 = vpop.permute.xlu1 %3895 }
0x3eb6   :  { %v3898_v43 = vadd.f32 %v3896_v5, %v3806_v10 }
0x3eb8   :  { %5805 = vtanh.f32 %v3898_v43 }
0x3ec2   :  { %v5806_v7 = vpop.eup %5805 }
0x3ec3   :  { %3903 = vrot.lane.b32.xlu0 %v5806_v7, %s6195_s10 }
0x3ec7   :  { %4005 = vrot.lane.b32.xlu0 %v7064_v27, %s6191_s19 }
0x3f35   :  { %v3904_v46 = vpop.permute.xlu0 %3903 }
0x3f36   :  { %v3906_v13 = vmul.f32 %v3904_v46, %v3901_v9 }
0x3f38   :  { %v3907_v14 = vadd.f32 %v3906_v13, %v3900_v11 }
0x3f39   :  { %v4006_v23 = vpop.permute.xlu0 %4005 }
0x3f3a   :  { %v7109_v15 = vclamps-f32 %v3907_v14, 5.0 }
0x3f3c   :  { %3984 = vst.msk [vmem:[#allocation17 + $0xc] sm:$0x3] %vm746_vm8, %v7109_v15  ;;  %5377 = vmatmul.mubr.msk.f32.vlgmr.msra.gmra.mrb[38].mxu0 %vm584_vm7, %v7109_v15 }
0x3f3d   :  { %5659 = vmatpush3.bf16.msra.mxu0 %v6470_v18  ;;  %5396 = vmatprep.mubr.msk.f32.mxu0 %vm6188_vm0, %v6189_v1 }
0x3f3e   :  { %5663 = vmatprep.subr.bf16.mxu0 %v6187_v0 }
0x400f   :  { %v3979_v16 = vpop.f32.mrb[38].mxu0 }
0x4010   :  { %3998 = vst.msk [vmem:[#allocation24 + $0xc] sm:$0x3] %vm750_vm5, %v3979_v16  ;;  %4002 = vrot.lane.b32.xlu1 %v3979_v16, %s6190_s23  ;;  %v5378_v47 = vpop.f32.mrb[39].mxu0 }
0x4014   :  { %4089 = vrot.lane.b32.xlu1 %v7064_v27, %s6190_s23  ;;  %s6197_s23 = smov [#allocation21]  }
0x4015   :  { %s4580_s19 = sshll.u32 %s6197_s23, 4  ;;  %s7198_s19 = int_to_ptr.vmem [resolvable:$true] %s4580_s19 }
0x4082   :  { %v4003_v22 = vpop.permute.xlu1 %4002 }
0x4083   :  { %v4008_v44 = vsel %vm208_vm1, %v4000_v53, %v4003_v22 }
0x4084   :  { %v4009_v18 = vsel %vm210_vm2, %v4008_v44, %v4006_v23 }
0x4085   :  { %5390 = vmatmul.mubr.msk.f32.vlgmr.msra.gmra.mrb[44].mxu1 %vm218_vm3, %v4009_v18 }
0x4086   :  { %5662 = vmatpush3.bf16.msra.mxu1 %v6485_v36  ;;  %5403 = vmatprep.mubr.msk.f32.mxu1 %vm6188_vm0, %v6189_v1  ;;  %v4090_v33 = vpop.permute.xlu1 %4089 }
0x4087   :  { %5669 = vmatprep.subr.bf16.mxu1 %v6187_v0 }
0x4158   :  { %v4079_v52 = vpop.f32.mrb[44].mxu1 }
0x4159   :  { %v4080_v25 = vadd.f32 %v6865_v63, %v4079_v52  ;;  %v5391_v58 = vpop.f32.mrb[45].mxu1 }
0x415b   :  { %v4712_v26 = vmul.f32 -1.442695, %v4080_v25 }
0x415d   :  { %5807 = vpow2.f32 %v4712_v26 }
0x4167   :  { %v5808_v57 = vpop.eup %5807 }
0x4168   :  { %v4086_v28 = vadd.f32 1.0, %v5808_v57 }
0x416a   :  { %5809 = vrcp.f32 %v4086_v28 }
0x4174   :  { %v5810_v6 = vpop.eup %5809 }
0x4175   :  { %v4092_v34 = vmul.f32 %v5810_v6, %v4090_v33  ;;  %v4175_v45 = vsub.f32 1.0, %v5810_v6  ;;  %v4174_v24 = vmul.f32 %v5810_v6, %v7064_v27 }
0x4177   :  { %4094 = vrot.lane.b32.xlu0 %v4092_v34, %s6192_s0 }
0x41e9   :  { %v4095_v36 = vpop.permute.xlu0 %4094 }
0x41ea   :  { %5397 = vmatmul.mubr.msk.f32.vlgmr.msra.gmra.mrb[40].mxu0 %vm208_vm1, %v4095_v36 }
0x41eb   :  { %5665 = vmatpush3.bf16.msra.mxu0 %v6504_v48  ;;  %5416 = vmatprep.mubr.msk.f32.mxu0 %vm6188_vm0, %v6189_v1 }
0x41ec   :  { %5666 = vmatprep.subr.bf16.mxu0 %v6187_v0 }
0x41ef   :  { %5668 = vmatpush3.bf16.msra.mxu0 %v6507_v51 }
0x41f0   :  { %5414 = vmatprep.subr.mxu0 %v6189_v1 }
0x41f3   :  { %5415 = vmatpush3.msra.mxu0 %v6969_v41 }
0x41f4   :  { %5675 = vmatprep.subr.bf16.mxu0 %v6187_v0 }
0x42bd   :  { %v4164_v63 = vpop.f32.mrb[40].mxu0 }
0x42be   :  { %4169 = vrot.lane.b32.xlu1 %v4164_v63, %s7345_s1  ;;  %v5398_v38 = vpop.f32.mrb[41].mxu0 }
0x42c2   :  { %4263 = vrot.lane.b32.xlu1 %v4261_v40, %s7347_s22 }
0x42c6   :  { %4272 = vrot.lane.b32.xlu1 %v7109_v15, %s7347_s22  ;;  %s4556_s22 = sshll.u32 %s6196_s5, 4  ;;  %s4557_s22 = int_to_ptr.vmem [resolvable:$true] %s4556_s22 }
0x42c7   :  { %s6024_s0 = scalar_lea.vmem %s4557_s22, 256  ;;  %p6029_p3 = scmp.lt.s32.totalorder %s4557_s22, %s4557_s22 }
0x42c8   :  { %p6025_p2 = scmp.ne.s32.totalorder %s4557_s22, %s6024_s0  ;;  %p6030_p4 = scmp.lt.s32.totalorder %s6024_s0, %s6024_s0 }
0x42ca   :  { %p6031_p5 = por %p6030_p4, %p6029_p3 }
0x42cc   :  { %p6032_p6 = pnand %p6031_p5, %p6025_p2 }
0x4330   :  { %v4170_v48 = vpop.permute.xlu1 %4169 }
0x4331   :  { %v4172_v42 = vadd.f32 %v4170_v48, %v4080_v25 }
0x4333   :  { %5811 = vtanh.f32 %v4172_v42 }
0x4334   :  { %v4264_v32 = vpop.permute.xlu1 %4263 }
0x433d   :  { %v5812_v51 = vpop.eup %5811 }
0x433e   :  { %4177 = vrot.lane.b32.xlu0 %v5812_v51, %s6193_s21 }
0x43b0   :  { %v4178_v41 = vpop.permute.xlu0 %4177 }
0x43b1   :  { %v4180_v49 = vmul.f32 %v4178_v41, %v4175_v45 }
0x43b3   :  { %v4181_v20 = vadd.f32 %v4180_v49, %v4174_v24 }
0x43b5   :  { %v4714_v10 = vclamps-f32 %v4181_v20, 5.0 }
0x43b7   :  { %4526 = vst.msk [vmem:[#allocation18 + $0xe] sm:$0x3] %vm748_vm4, %v4714_v10  ;;  %5404 = vmatmul.mubr.msk.f32.vlgmr.msra.gmra.mrb[46].mxu1 %vm208_vm1, %v4714_v10 }
0x43b8   :  { %5671 = vmatpush3.bf16.msra.mxu1 %v6549_v8  ;;  %5427 = vmatprep.mubr.msk.f32.mxu1 %vm6188_vm0, %v6189_v1 }
0x43b9   :  { %5672 = vmatprep.subr.bf16.mxu1 %v6187_v0 }
0x43bc   :  { %5674 = vmatpush3.bf16.msra.mxu1 %v6555_v12  ;;  %v4273_v12 = vpop.permute.xlu1 %4272 }
0x448a   :  { %v4253_v50 = vpop.f32.mrb[46].mxu1 }
0x448b   :  { %v4254_v55 = vadd.f32 %v6899_v4, %v4253_v50  ;;  %v5405_v27 = vpop.f32.mrb[47].mxu1 }
0x448d   :  { %v4257_v31 = vmul.f32 0.5, %v4254_v55  ;;  %4528 = vst.msk [vmem:[#allocation20 + $0xe] sm:$0x3] %vm750_vm5, %v4254_v55 }
0x448f   :  { %v4258_v19 = vmul.f32 1.442695, %v4257_v31 }
0x4491   :  { %5813 = vpow2.f32 %v4258_v19 }
0x449b   :  { %v5814_v56 = vpop.eup %5813 }
0x449c   :  { %v4266_v59 = vmul.f32 %v5814_v56, %v4264_v32 }
0x449e   :  { %4268 = vrot.lane.b32.xlu0 %v4266_v59, %s6194_s11 }
0x44a2   :  { %4355 = vrot.lane.b32.xlu0 %v7109_v15, %s7345_s1 }
0x4510   :  { %v4269_v8 = vpop.permute.xlu0 %4268 }
0x4511   :  { %v4271_v61 = vadd.f32 %v4269_v8, %v4254_v55 }
0x4513   :  { %v4275_v62 = vsel %vm490_vm6, %v4271_v61, %v4273_v12  ;;  %4536 = vst.msk [vmem:[#allocation23 + $0xe] sm:$0x3] %vm750_vm5, %v4271_v61 }
0x4514   :  { %5417 = vmatmul.mubr.msk.f32.vlgmr.msra.gmra.mrb[42].mxu0 %vm218_vm3, %v4275_v62  ;;  %v4356_v11 = vpop.permute.xlu0 %4355 }
0x4515   :  { %5677 = vmatpush3.bf16.msra.mxu0 %v6574_v30  ;;  %5438 = vmatprep.mubr.msk.f32.mxu0 %vm6188_vm0, %v6189_v1 }
0x4516   :  { %5678 = vmatprep.subr.bf16.mxu0 %v6187_v0 }
0x4519   :  { %5680 = vmatpush3.bf16.msra.mxu0 %v6584_v35 }
0x45e7   :  { %v4345_v4 = vpop.f32.mrb[42].mxu0 }
0x45e8   :  { %v4346_v2 = vadd.f32 %v7008_v21, %v4345_v4  ;;  %v5418_v5 = vpop.f32.mrb[43].mxu0 }
0x45ea   :  { %v4717_v43 = vmul.f32 -1.442695, %v4346_v2 }
0x45ec   :  { %5815 = vpow2.f32 %v4717_v43 }
0x45f6   :  { %v5816_v7 = vpop.eup %5815 }
0x45f7   :  { %v4352_v9 = vadd.f32 1.0, %v5816_v7 }
0x45f9   :  { %5817 = vrcp.f32 %v4352_v9 }
0x4603   :  { %v5818_v46 = vpop.eup %5817 }
0x4604   :  { %v4358_v13 = vmul.f32 %v5818_v46, %v4356_v11  ;;  %v4440_v53 = vmul.f32 %v5818_v46, %v7109_v15 }
0x4606   :  { %4360 = vrot.lane.b32.xlu1 %v4358_v13, %s6193_s21 }
0x4678   :  { %v4361_v30 = vpop.permute.xlu1 %4360 }
0x4679   :  { %5428 = vmatmul.mubr.msk.f32.vlgmr.msra.gmra.mrb[48].mxu1 %vm584_vm7, %v4361_v30 }
0x474c   :  { %v4430_v0 = vpop.f32.mrb[48].mxu1 }
0x474d   :  { %4435 = vrot.lane.b32.xlu0 %v4430_v0, %s6195_s10  ;;  %v5429_v1 = vpop.f32.mrb[49].mxu1 }
0x4751   :  { %753 = vrot.lane.b32.xlu0 %v6523_v60, %s6194_s11 }
0x4755   :  { %1830 = vrot.lane.b32.xlu0 %v6727_v54, %s6194_s11 }
0x4759   :  { %2910 = vrot.lane.b32.xlu0 %v6903_v39, %s6194_s11  ;;  %v4441_v39 = vsub.f32 1.0, %v5818_v46 }
0x475d   :  { %3990 = vrot.lane.b32.xlu0 %v7078_v37, %s6194_s11 }
0x47bf   :  { %v4436_v35 = vpop.permute.xlu0 %4435 }
0x47c0   :  { %v4438_v21 = vadd.f32 %v4436_v35, %v4346_v2 }
0x47c2   :  { %5819 = vtanh.f32 %v4438_v21 }
0x47c3   :  { %v754_v14 = vpop.permute.xlu0 %753 }
0x47c4   :  { %756 = vst.msk [vmem:[#allocation21] sm:$0x3] %vm750_vm5, %v754_v14 }
0x47c7   :  { %v1831_v16 = vpop.permute.xlu0 %1830 }
0x47c8   :  { %1834 = vst.msk [vmem:[#allocation21 + $0x4] sm:$0x3] %vm750_vm5, %v1831_v16 }
0x47cb   :  { %v2911_v47 = vpop.permute.xlu0 %2910 }
0x47cc   :  { %v5820_v60 = vpop.eup %5819  ;;  %2914 = vst.msk [vmem:[#allocation21 + $0x8] sm:$0x3] %vm750_vm5, %v2911_v47 }
0x47cd   :  { %4443 = vrot.lane.b32.xlu1 %v5820_v60, %s6195_s10 }
0x47cf   :  { %v3991_v54 = vpop.permute.xlu0 %3990 }
0x47d0   :  { %3994 = vst.msk [vmem:[#allocation21 + $0xc] sm:$0x3] %vm750_vm5, %v3991_v54 }
0x47d1   :  { %1290 = vrot.lane.b32.xlu1 %v6644_v29, %s6194_s11 }
0x47d5   :  { %2370 = vrot.lane.b32.xlu1 %v6810_v17, %s6194_s11 }
0x47d9   :  { %3450 = vrot.lane.b32.xlu1 %v6993_v3, %s6194_s11 }
0x47dd   :  { %4530 = vrot.lane.b32.xlu1 %v5814_v56, %s6194_s11 }
0x483f   :  { %v4444_v37 = vpop.permute.xlu1 %4443 }
0x4840   :  { %v4446_v22 = vmul.f32 %v4444_v37, %v4441_v39 }
0x4842   :  { %v4447_v23 = vadd.f32 %v4446_v22, %v4440_v53 }
0x4843   :  { %v1291_v44 = vpop.permute.xlu1 %1290 }
0x4844   :  { %v4719_v18 = vclamps-f32 %v4447_v23, 5.0  ;;  %1294 = vst.msk [vmem:[#allocation21 + $0x2] sm:$0x3] %vm750_vm5, %v1291_v44 }
0x4846   :  { %4524 = vst.msk [vmem:[#allocation17 + $0xe] sm:$0x3] %vm746_vm8, %v4719_v18  ;;  %5439 = vmatmul.mubr.msk.f32.vlgmr.msra.gmra.mrb[44].mxu0 %vm584_vm7, %v4719_v18 }
0x4847   :  { %v2371_v29 = vpop.permute.xlu1 %2370 }
0x4848   :  { %2374 = vst.msk [vmem:[#allocation21 + $0x6] sm:$0x3] %vm750_vm5, %v2371_v29 }
0x484b   :  { %v3451_v17 = vpop.permute.xlu1 %3450 }
0x484c   :  { %3454 = vst.msk [vmem:[#allocation21 + $0xa] sm:$0x3] %vm750_vm5, %v3451_v17 }
0x484f   :  { %v4531_v3 = vpop.permute.xlu1 %4530 }
0x4850   :  { %4534 = vst.msk [vmem:[#allocation21 + $0xe] sm:$0x3] %vm750_vm5, %v4531_v3 }
0x4851   :  { %6035 = shalt.err (!%p6032_p6)
}
0x4852   :  { %s6036_s3 = scalar_lea.hbm %s7318_s15, 256 }
0x4853   :  { %p6037_p7 = scmp.ne.s32.totalorder %s7318_s15, %s6036_s3  ;;  %p6040_p8 = scmp.lt.u32.totalorder %s6036_s3, %s7318_s15 }
0x4855   :  { %p6042_p9 = pnand %p6040_p8, %p6037_p7 }
0x4857   :  { %6045 = shalt.err (!%p6042_p9)
}
0x4858   :  { %4562 = dma.vmem_to_hbm [thread:$0]  %s4557_s22, 256, %s7318_s15, [#allocation19], %s7345_s1, %s7345_s1, %s7344_s9  }
0x4859   :  { %s6046_s27 = scalar_lea.vmem %s7198_s19, 256  ;;  %p6051_p11 = scmp.lt.s32.totalorder %s7198_s19, %s7198_s19 }
0x485a   :  { %p6047_p10 = scmp.ne.s32.totalorder %s7198_s19, %s6046_s27  ;;  %p6052_p12 = scmp.lt.s32.totalorder %s6046_s27, %s6046_s27 }
0x485c   :  { %p6053_p13 = por %p6052_p12, %p6051_p11 }
0x485e   :  { %p6054_p0 = pnand %p6053_p13, %p6047_p10 }
0x4860   :  { %6057 = shalt.err (!%p6054_p0)
}
0x4861   :  { %s6058_s4 = scalar_lea.hbm %s7320_s17, 256 }
0x4862   :  { %p6059_p1 = scmp.ne.s32.totalorder %s7320_s17, %s6058_s4  ;;  %p6062_p2 = scmp.lt.u32.totalorder %s6058_s4, %s7320_s17 }
0x4864   :  { %p6064_p3 = pnand %p6062_p2, %p6059_p1 }
0x4866   :  { %6067 = shalt.err (!%p6064_p3)
}
0x4867   :  { %4586 = dma.vmem_to_hbm [thread:$0]  %s7198_s19, 256, %s7320_s17, [#allocation22], %s7345_s1, %s7345_s1, %s7344_s9  }
0x4868   :  { %s6198_s2 = smov [#allocation17]   ;;  %s6199_s22 = smov [#allocation20]  }
0x4869   :  { %s4544_s5 = sshll.u32 %s6198_s2, 4  ;;  %s4568_s23 = sshll.u32 %s6199_s22, 4  ;;  %s4545_s5 = int_to_ptr.vmem [resolvable:$true] %s4544_s5  ;;  %s7235_s23 = int_to_ptr.vmem [resolvable:$true] %s4568_s23 }
0x486a   :  { %s6068_s0 = scalar_lea.vmem %s4545_s5, 256  ;;  %p6073_p5 = scmp.lt.s32.totalorder %s4545_s5, %s4545_s5 }
0x486b   :  { %p6069_p4 = scmp.ne.s32.totalorder %s4545_s5, %s6068_s0  ;;  %p6074_p6 = scmp.lt.s32.totalorder %s6068_s0, %s6068_s0 }
0x486d   :  { %p6075_p7 = por %p6074_p6, %p6073_p5 }
0x486f   :  { %p6076_p8 = pnand %p6075_p7, %p6069_p4 }
0x4871   :  { %6079 = shalt.err (!%p6076_p8)
}
0x4872   :  { %s6080_s3 = scalar_lea.hbm %s7317_s14, 256 }
0x4873   :  { %p6081_p9 = scmp.ne.s32.totalorder %s7317_s14, %s6080_s3  ;;  %p6084_p10 = scmp.lt.u32.totalorder %s6080_s3, %s7317_s14 }
0x4875   :  { %p6086_p11 = pnand %p6084_p10, %p6081_p9 }
0x4877   :  { %6089 = shalt.err (!%p6086_p11)
}
0x4878   :  { %4550 = dma.vmem_to_hbm [thread:$0]  %s4545_s5, 256, %s7317_s14, [#allocation4], %s7345_s1, %s7345_s1, %s7344_s9  }
0x4879   :  { %s6090_s30 = scalar_lea.vmem %s7235_s23, 256  ;;  %p6095_p13 = scmp.lt.s32.totalorder %s7235_s23, %s7235_s23 }
0x487a   :  { %p6091_p12 = scmp.ne.s32.totalorder %s7235_s23, %s6090_s30  ;;  %p6096_p0 = scmp.lt.s32.totalorder %s6090_s30, %s6090_s30 }
0x487c   :  { %p6097_p1 = por %p6096_p0, %p6095_p13 }
0x487e   :  { %p6098_p2 = pnand %p6097_p1, %p6091_p12 }
0x4880   :  { %6101 = shalt.err (!%p6098_p2)
}
0x4881   :  { %s6102_s25 = scalar_lea.hbm %s7319_s16, 256 }
0x4882   :  { %p6103_p3 = scmp.ne.s32.totalorder %s7319_s16, %s6102_s25  ;;  %p6106_p4 = scmp.lt.u32.totalorder %s6102_s25, %s7319_s16 }
0x4884   :  { %p6108_p5 = pnand %p6106_p4, %p6103_p3 }
0x4886   :  { %6111 = shalt.err (!%p6108_p5)
}
0x4887   :  { %4574 = dma.vmem_to_hbm [thread:$0]  %s7235_s23, 256, %s7319_s16, [#allocation19], %s7345_s1, %s7345_s1, %s7344_s9  }
0x4888   :  { %s6200_s26 = smov [#allocation23]  }
0x4889   :  { %s4592_s15 = sshll.u32 %s6200_s26, 4  ;;  %s4593_s15 = int_to_ptr.vmem [resolvable:$true] %s4592_s15 }
0x488a   :  { %s6112_s12 = scalar_lea.vmem %s4593_s15, 256  ;;  %p6117_p7 = scmp.lt.s32.totalorder %s4593_s15, %s4593_s15 }
0x488b   :  { %p6113_p6 = scmp.ne.s32.totalorder %s4593_s15, %s6112_s12  ;;  %p6118_p8 = scmp.lt.s32.totalorder %s6112_s12, %s6112_s12 }
0x488d   :  { %p6119_p9 = por %p6118_p8, %p6117_p7 }
0x488f   :  { %p6120_p10 = pnand %p6119_p9, %p6113_p6 }
0x4891   :  { %6123 = shalt.err (!%p6120_p10)
}
0x4892   :  { %s6124_s22 = scalar_lea.hbm %s7321_s18, 256 }
0x4893   :  { %p6125_p11 = scmp.ne.s32.totalorder %s7321_s18, %s6124_s22  ;;  %p6128_p12 = scmp.lt.u32.totalorder %s6124_s22, %s7321_s18 }
0x4895   :  { %p6130_p13 = pnand %p6128_p12, %p6125_p11 }
0x4897   :  { %6133 = shalt.err (!%p6130_p13)
}
0x4898   :  { %4598 = dma.vmem_to_hbm [thread:$0]  %s4593_s15, 256, %s7321_s18, [#allocation22], %s7345_s1, %s7345_s1, %s7344_s9  }
0x4899   :  { %s6201_s24 = smov [#allocation24]  }
0x489a   :  { %s4604_s17 = sshll.u32 %s6201_s24, 4  ;;  %s4605_s17 = int_to_ptr.vmem [resolvable:$true] %s4604_s17 }
0x489b   :  { %s6134_s19 = scalar_lea.vmem %s4605_s17, 256  ;;  %p6139_p1 = scmp.lt.s32.totalorder %s4605_s17, %s4605_s17 }
0x489c   :  { %p6135_p0 = scmp.ne.s32.totalorder %s4605_s17, %s6134_s19  ;;  %p6140_p2 = scmp.lt.s32.totalorder %s6134_s19, %s6134_s19 }
0x489e   :  { %p6141_p3 = por %p6140_p2, %p6139_p1 }
0x48a0   :  { %p6142_p4 = pnand %p6141_p3, %p6135_p0 }
0x4919   :  { %v4519_v15 = vpop.f32.mrb[44].mxu0 }
0x491a   :  { %4538 = vst.msk [vmem:[#allocation24 + $0xe] sm:$0x3] %vm750_vm5, %v4519_v15  ;;  %v5440_v52 = vpop.f32.mrb[45].mxu0 }
0x491b   :  { %6145 = shalt.err (!%p6142_p4)
}
0x491c   :  { %s7349_s20 = sld [smem:[#allocation39_spill]] }
0x4922   :  { %s6146_s30 = scalar_lea.hbm %s7349_s20, 256 }
0x4923   :  { %p6147_p5 = scmp.ne.s32.totalorder %s7349_s20, %s6146_s30  ;;  %p6150_p6 = scmp.lt.u32.totalorder %s6146_s30, %s7349_s20 }
0x4925   :  { %p6152_p7 = pnand %p6150_p6, %p6147_p5 }
0x4927   :  { %6155 = shalt.err (!%p6152_p7)
}
0x4928   :  { %4610 = dma.vmem_to_hbm [thread:$0]  %s4605_s17, 256, %s7349_s20, [#allocation25], %s7345_s1, %s7345_s1, %s7344_s9  }
0x4929   :  { %6166 = dma.done.wait [#allocation4], 256  }
0x492a   :  { %6167 = vsyncadd [#allocation4], 4294967040 }
0x492b   :  { %6168 = dma.done.wait [#allocation19], 512  }
0x492c   :  { %6169 = vsyncadd [#allocation19], 4294966784 }
0x492d   :  { %6170 = dma.done.wait [#allocation22], 512  }
0x492e   :  { %6171 = vsyncadd [#allocation22], 4294966784 }
0x492f   :  { %6172 = dma.done.wait [#allocation25], 256  }
0x4930   :  { %6173 = vsyncadd [#allocation25], 4294967040 }
0x4931   :  { %4629 = vsyncpa [#allocation3], 1 }
0x4932   :  { %4630 = vsyncpa [#allocation6], 1 }
0x4933   :  { %4631 = vsyncpa [#allocation9], 1 }
0x4934   :  { %4632 = vsyncpa [#allocation12], 1 }
0x4935   :  { %4633 = vsyncpa [#allocation15], 1 }
0x4936   :  { %4634 = vsyncpa [#allocation4], 1 }
0x4937   :  { %4635 = vsyncpa [#allocation19], 1 }
0x4938   :  { %4636 = vsyncpa [#allocation22], 1 }
0x4939   :  { %4637 = vsyncpa [#allocation25], 1 }

</bundles_post_ra>
